<compile_context>
chip_gen: v6e
topology: v6e:2x2x1
jax: 0.10.0
libtpu: 0.0.40
codegen_flags: <defaults>
</compile_context>

<pallas_src>
import functools

import jax
import jax.numpy as jnp
import numpy as np
from jax import lax
from jax.experimental import pallas as pl
from jax.experimental.pallas import tpu as pltpu


# Conservative budget for the whole-sequence-resident design (v7x: 64 MiB / TC).
_VMEM_RESIDENT_BUDGET = 40 * (1 << 20)


def _vmem_limit_bytes(*arrays):
    need = sum(int(np.prod(a.shape)) * np.dtype(a.dtype).itemsize for a in arrays)
    if need > _VMEM_RESIDENT_BUDGET:
        # TODO(synk): stream gx/out in time chunks once T*B*H no longer fits VMEM.
        raise NotImplementedError("sequence too large for VMEM-resident BiLSTM kernel")
    return int(min(100 << 20, 2 * need + (8 << 20)))


# ----------------------------------------------------------------------------
# Fused bidirectional LSTM recurrence kernel (single pallas_call, no grid).
#
# gx   : [T, B, 8H]  precomputed x-projection (+bias), gate-interleaved layout
#                    [i_f i_b f_f f_b g_f g_b o_f o_b]; bwd half time-reversed
#                    (row s holds bwd gates for time T-1-s).
# lens : [B, 1] int32 sequence lengths.
# wbd  : [2H, 8H]    block-diagonal recurrent weights in the same column layout.
# scale/beta : [1, 8H]  per-lane activation constants (0.5/0.5 sigmoid, 1/0 tanh).
# fuse_head=False -> out : [T, B, 2H]  (fwd half at time s, bwd half reversed)
# fuse_head=True  -> out : [T, B, NP]  logits (NP = num_tag padded to 128 lanes)
# ----------------------------------------------------------------------------
def _bilstm_kernel(*args, T, H, fuse_head):
    if fuse_head:
        gx_ref, lens_ref, wbd_ref, scale_ref, beta_ref, wh_ref, bh_ref, out_ref = args
    else:
        gx_ref, lens_ref, wbd_ref, scale_ref, beta_ref, out_ref = args

    B = gx_ref.shape[1]
    H2 = 2 * H

    # Hoist every loop-invariant load off the serial critical path.
    # TODO(synk): pltpu.matmul_push_rhs/acc_lhs/pop could keep wbd pinned in the
    #             MXU staging registers across all T steps.
    wbd = wbd_ref[...]          # (2H, 8H)
    scale = scale_ref[...]      # (1, 8H)
    beta = beta_ref[...]        # (1, 8H)
    lens = lens_ref[...]        # (B, 1) int32
    col = lax.broadcasted_iota(jnp.int32, (1, H2), 1)
    t_base = jnp.where(col < H, 0, T - 1)      # per-lane time base (fwd / bwd)
    t_sign = jnp.where(col < H, 1, -1)         # per-lane time direction

    if fuse_head:
        wh_f = wh_ref[0:H, :]                  # (H, NP)
        wh_b = wh_ref[H:H2, :]                 # (H, NP)
        np_pad = wh_ref.shape[1]
        # initialize logits with the (zero-padded) linear bias
        out_ref[...] = jnp.broadcast_to(bh_ref[...].reshape(1, 1, np_pad),
                                        (T, B, np_pad))

    def step(s, carry):
        h, c = carry                           # (B, 2H) each, [fwd | bwd]
        tb = T - 1 - s                         # backward-direction time index

        # gates = precomputed x-projection + block-diagonal h-projection
        g = gx_ref[s] + jnp.dot(h, wbd, preferred_element_type=jnp.float32)  # (B, 8H)
        # single full-width tanh: sigmoid(x) = 0.5*tanh(0.5*x) + 0.5
        a = jnp.tanh(g * scale) * scale + beta
        i = a[:, 0 * H2:1 * H2]
        f = a[:, 1 * H2:2 * H2]
        gg = a[:, 2 * H2:3 * H2]
        o = a[:, 3 * H2:4 * H2]
        c_new = f * c + i * gg
        h_new = o * jnp.tanh(c_new)

        # packed-sequence masking (exact select): fwd lanes use time s,
        # bwd lanes use time T-1-s.
        m = (t_base + t_sign * s) < lens       # (B, 2H) bool
        h = jnp.where(m, h_new, h)
        c = jnp.where(m, c_new, c)
        y = jnp.where(m, h_new, 0.0)           # masked output, (B, 2H)

        if fuse_head:
            # fused Linear head: accumulate into the lane-dense logits buffer
            out_ref[s] = out_ref[s] + jnp.dot(
                y[:, :H], wh_f, preferred_element_type=jnp.float32)
            out_ref[tb] = out_ref[tb] + jnp.dot(
                y[:, H:], wh_b, preferred_element_type=jnp.float32)
        else:
            # one full-row store per step; bwd half is in reversed time order
            # (un-reversed by the wrapper with a cheap XLA flip).
            out_ref[s] = y
        return h, c

    zeros = jnp.zeros((B, H2), jnp.float32)
    lax.fori_loop(0, T, step, (zeros, zeros), unroll=min(T, 8))


# ----------------------------------------------------------------------------
# Wrapper-side precomputation (plain XLA, one-off per layer).
# ----------------------------------------------------------------------------
def _gate_tables(whhf, whhb, H):
    """Block-diag recurrent weight + activation constants in interleaved layout."""
    whhf_r = whhf.reshape(H, 4, H)
    whhb_r = whhb.reshape(H, 4, H)
    top = jnp.stack([whhf_r, jnp.zeros_like(whhf_r)], axis=2).reshape(H, 8 * H)
    bot = jnp.stack([jnp.zeros_like(whhb_r), whhb_r], axis=2).reshape(H, 8 * H)
    w_bd = jnp.concatenate([top, bot], axis=0)                            # (2H, 8H)
    scale = jnp.repeat(jnp.array([0.5, 0.5, 1.0, 0.5], jnp.float32),
                       2 * H).reshape(1, 8 * H)
    beta = jnp.repeat(jnp.array([0.5, 0.5, 0.0, 0.5], jnp.float32),
                      2 * H).reshape(1, 8 * H)
    return w_bd, scale, beta


def _gate_inputs(x_tbd, wihf, wihb, bf, bb, H):
    """Single merged input-projection GEMM for both directions -> [T, B, 8H]
    with the bwd half time-reversed and gates interleaved per direction."""
    T, B, _ = x_tbd.shape
    w_x = jnp.concatenate([wihf, wihb], axis=1)                           # (D, 8H)
    b_x = jnp.concatenate([bf, bb], axis=0)                               # (8H,)
    gx = jnp.einsum("tbd,dg->tbg", x_tbd, w_x) + b_x                      # (T, B, 8H)
    gxf = gx[:, :, :4 * H].reshape(T, B, 4, H)                            # fwd, time t
    gxb = gx[::-1, :, 4 * H:].reshape(T, B, 4, H)                         # bwd, reversed
    return jnp.stack([gxf, gxb], axis=3).reshape(T, B, 8 * H)


# ----------------------------------------------------------------------------
# pallas_call wrappers.
# ----------------------------------------------------------------------------
def _bilstm(gx, lens, w_bd, scale, beta, *, H):
    T, B, _ = gx.shape
    out_shape = jax.ShapeDtypeStruct((T, B, 2 * H), jnp.float32)
    vspec = pl.BlockSpec(memory_space=pltpu.MemorySpace.VMEM)
    kernel = functools.partial(_bilstm_kernel, T=T, H=H, fuse_head=False)
    return pl.pallas_call(
        kernel,
        out_shape=out_shape,
        in_specs=[vspec] * 5,
        out_specs=vspec,
        compiler_params=pltpu.CompilerParams(
            vmem_limit_bytes=_vmem_limit_bytes(gx, lens, w_bd, scale, beta,
                                               out_shape)),
    )(gx, lens, w_bd, scale, beta)


def _bilstm_fused_head(gx, lens, w_bd, scale, beta, w_head, b_head, *, H):
    T, B, _ = gx.shape
    np_pad = w_head.shape[1]
    out_shape = jax.ShapeDtypeStruct((T, B, np_pad), jnp.float32)
    vspec = pl.BlockSpec(memory_space=pltpu.MemorySpace.VMEM)
    kernel = functools.partial(_bilstm_kernel, T=T, H=H, fuse_head=True)
    return pl.pallas_call(
        kernel,
        out_shape=out_shape,
        in_specs=[vspec] * 7,
        out_specs=vspec,
        compiler_params=pltpu.CompilerParams(
            vmem_limit_bytes=_vmem_limit_bytes(gx, lens, w_bd, scale, beta,
                                               w_head, b_head, out_shape)),
    )(gx, lens, w_bd, scale, beta, w_head, b_head)


# ----------------------------------------------------------------------------
# Full forward pass (eval mode).
# ----------------------------------------------------------------------------
def rnn_forward(embeddings, lengths, params):
    """embeddings: [B, T, D] float32, lengths: [B] int (descending)."""
    B, T, _ = embeddings.shape
    x = jnp.transpose(embeddings, (1, 0, 2))                   # time-major [T, B, D]
    lens = lengths.astype(jnp.int32).reshape(B, 1)

    w_lin_t, b_lin = params["linear"]
    num_tag = w_lin_t.shape[1]
    H = params["lstm"][0][0][1].shape[0]
    np_pad = 128 * pl.cdiv(num_tag, 128)                       # lane-dense logits
    w_head = jnp.zeros((2 * H, np_pad), jnp.float32).at[:, :num_tag].set(w_lin_t)
    b_head = jnp.zeros((1, np_pad), jnp.float32).at[:, :num_tag].set(b_lin[None, :])

    n_layers = len(params["lstm"])
    y = None
    for li, layer in enumerate(params["lstm"]):
        (wihf, whhf, bf), (wihb, whhb, bb) = layer
        gx = _gate_inputs(x, wihf, wihb, bf, bb, H)             # [T, B, 8H]
        w_bd, scale, beta = _gate_tables(whhf, whhb, H)
        if li == n_layers - 1:
            # last layer: Linear head fused into the recurrence kernel
            logits = _bilstm_fused_head(gx, lens, w_bd, scale, beta,
                                        w_head, b_head, H=H)    # [T, B, np_pad]
            y = logits[:, :, :num_tag]
        else:
            out = _bilstm(gx, lens, w_bd, scale, beta, H=H)     # [T, B, 2H]
            # bwd half is stored in reversed time order; un-reverse it here.
            x = jnp.concatenate([out[:, :, :H], out[::-1, :, H:]], axis=-1)
            # (nn.LSTM inter-layer dropout is identity in eval mode)
    # F.dropout(..., training=False) -> identity
    return jnp.transpose(y, (1, 0, 2))                          # [B, T, num_tag]


# ----------------------------------------------------------------------------
# Pure-JAX reference (for correctness check).
# ----------------------------------------------------------------------------
def _ref_direction(x_btd, lengths, w_ih_t, w_hh_t, b, reverse):
    B, T, _ = x_btd.shape
    H = w_hh_t.shape[0]
    ts = jnp.arange(T)
    if reverse:
        ts = ts[::-1]

    def step(carry, t):
        h, c = carry
        xt = x_btd[:, t, :]
        gates = xt @ w_ih_t + h @ w_hh_t + b
        i = jax.nn.sigmoid(gates[:, :H])
        f = jax.nn.sigmoid(gates[:, H:2 * H])
        g = jnp.tanh(gates[:, 2 * H:3 * H])
        o = jax.nn.sigmoid(gates[:, 3 * H:])
        c_new = f * c + i * g
        h_new = o * jnp.tanh(c_new)
        valid = (t < lengths)[:, None]
        h = jnp.where(valid, h_new, h)
        c = jnp.where(valid, c_new, c)
        out = jnp.where(valid, h_new, 0.0)
        return (h, c), (t, out)

    init = (jnp.zeros((B, H), jnp.float32), jnp.zeros((B, H), jnp.float32))
    _, (tt, outs) = lax.scan(step, init, ts)
    out_tbh = jnp.zeros((T, B, H), jnp.float32).at[tt].set(outs)
    return jnp.transpose(out_tbh, (1, 0, 2))


def rnn_forward_ref(embeddings, lengths, params):
    x = embeddings
    for layer in params["lstm"]:
        outs = [_ref_direction(x, lengths, *layer[d], reverse=bool(d))
                for d in range(2)]
        x = jnp.concatenate(outs, axis=-1)
    w_lin_t, b_lin = params["linear"]
    return x @ w_lin_t + b_lin


# ----------------------------------------------------------------------------
# Deterministic parameter init (shapes follow nn.LSTM / nn.Linear).
# ----------------------------------------------------------------------------
def make_params(key, input_size, hidden_size, num_layer, num_tag, bi=True):
    assert bi, "this synthetic setup uses bi_flag=True"
    H = hidden_size
    k = 1.0 / np.sqrt(H)
    layers = []
    for l in range(num_layer):
        d_in = input_size if l == 0 else 2 * H
        dirs = []
        for _ in range(2):
            key, k1, k2, k3, k4 = jax.random.split(key, 5)
            w_ih = jax.random.uniform(k1, (4 * H, d_in), jnp.float32, -k, k)
            w_hh = jax.random.uniform(k2, (4 * H, H), jnp.float32, -k, k)
            b_ih = jax.random.uniform(k3, (4 * H,), jnp.float32, -k, k)
            b_hh = jax.random.uniform(k4, (4 * H,), jnp.float32, -k, k)
            dirs.append((w_ih.T, w_hh.T, b_ih + b_hh))   # store transposed
        layers.append(tuple(dirs))
    key, k5, k6 = jax.random.split(key, 3)
    kl = 1.0 / np.sqrt(2 * H)
    w_lin = jax.random.uniform(k5, (num_tag, 2 * H), jnp.float32, -kl, kl)
    b_lin = jax.random.uniform(k6, (num_tag,), jnp.float32, -kl, kl)
    return {"lstm": layers, "linear": (w_lin.T, b_lin)}


if __name__ == "__main__":
    # batch=8 (fills f32 sublanes), seq=8, input_size=32, hidden=32,
    # num_tag=8, two stacked bidirectional LSTM layers (cell_type='LSTM').
    B, T, D, H, NUM_TAG, NUM_LAYER = 8, 8, 32, 32, 8, 2

    key = jax.random.PRNGKey(0)
    key, k_emb = jax.random.split(key)
    embeddings = jax.random.normal(k_emb, (B, T, D), jnp.float32)
    # descending lengths, as required by pack_padded_sequence
    lengths = jnp.array([8, 8, 7, 6, 5, 4, 3, 2], dtype=jnp.int32)

    params = make_params(key, D, H, NUM_LAYER, NUM_TAG, bi=True)

    fwd = jax.jit(rnn_forward)
    out = jax.block_until_ready(fwd(embeddings, lengths, params))

    ref = jax.block_until_ready(rnn_forward_ref(embeddings, lengths, params))
    np.testing.assert_allclose(np.asarray(out), np.asarray(ref),
                               rtol=1e-2, atol=1e-2)
    assert out.shape == (B, T, NUM_TAG) and out.dtype == jnp.float32

    print("KERNEL_OK")
</pallas_src>

<mosaic_0001>
module attributes {stable_mosaic.version = 11 : i64} {
  func.func @_bilstm_kernel(%arg0: memref<8x8x256xf32, #tpu.memory_space<vmem>>, %arg1: memref<8x1xi32, #tpu.memory_space<vmem>>, %arg2: memref<64x256xf32, #tpu.memory_space<vmem>>, %arg3: memref<1x256xf32, #tpu.memory_space<vmem>>, %arg4: memref<1x256xf32, #tpu.memory_space<vmem>>, %arg5: memref<8x8x64xf32, #tpu.memory_space<vmem>>) attributes {dimension_semantics = [], scalar_prefetch = 0 : i64, scratch_operands = 0 : i64, tpu.core_type = #tpu.core_type<tc>} {
    %c0 = arith.constant 0 : index
    %c0_0 = arith.constant 0 : index
    %0 = vector.load %arg2[%c0, %c0_0] : memref<64x256xf32, #tpu.memory_space<vmem>>, vector<64x256xf32>
    %c0_1 = arith.constant 0 : index
    %c0_2 = arith.constant 0 : index
    %1 = vector.load %arg3[%c0_1, %c0_2] : memref<1x256xf32, #tpu.memory_space<vmem>>, vector<1x256xf32>
    %c0_3 = arith.constant 0 : index
    %c0_4 = arith.constant 0 : index
    %2 = vector.load %arg4[%c0_3, %c0_4] : memref<1x256xf32, #tpu.memory_space<vmem>>, vector<1x256xf32>
    %c0_5 = arith.constant 0 : index
    %c0_6 = arith.constant 0 : index
    %3 = vector.load %arg1[%c0_5, %c0_6] : memref<8x1xi32, #tpu.memory_space<vmem>>, vector<8x1xi32>
    %4 = tpu.iota {dimensions = array<i32: 1>} : vector<1x64xi32>
    %c32_i32 = arith.constant 32 : i32
    %5 = vector.broadcast %c32_i32 : i32 to vector<1x64xi32>
    %6 = arith.cmpi slt, %4, %5 : vector<1x64xi32>
    %c0_i32 = arith.constant 0 : i32
    %c7_i32 = arith.constant 7 : i32
    %7 = vector.broadcast %c0_i32 : i32 to vector<1x64xi32>
    %8 = vector.broadcast %c7_i32 : i32 to vector<1x64xi32>
    %9 = arith.select %6, %7, %8 : vector<1x64xi1>, vector<1x64xi32>
    %c32_i32_7 = arith.constant 32 : i32
    %10 = vector.broadcast %c32_i32_7 : i32 to vector<1x64xi32>
    %11 = arith.cmpi slt, %4, %10 : vector<1x64xi32>
    %c1_i32 = arith.constant 1 : i32
    %c-1_i32 = arith.constant -1 : i32
    %12 = vector.broadcast %c1_i32 : i32 to vector<1x64xi32>
    %13 = vector.broadcast %c-1_i32 : i32 to vector<1x64xi32>
    %14 = arith.select %11, %12, %13 : vector<1x64xi1>, vector<1x64xi32>
    %cst = arith.constant 0.000000e+00 : f32
    %15 = vector.broadcast %cst : f32 to vector<8x64xf32>
    %c0_i32_8 = arith.constant 0 : i32
    %16 = arith.index_cast %c0_i32_8 : i32 to index
    %c0_9 = arith.constant 0 : index
    %c0_10 = arith.constant 0 : index
    %17 = vector.load %arg0[%16, %c0_9, %c0_10] : memref<8x8x256xf32, #tpu.memory_space<vmem>>, vector<1x8x256xf32>
    %18 = vector.shape_cast %17 : vector<1x8x256xf32> to vector<8x256xf32>
    %cst_11 = arith.constant dense<0.000000e+00> : vector<8x256xf32>
    %19 = tpu.matmul %15, %0, %cst_11 {dimension_numbers = #tpu.dot_dimension_numbers<[1], [0], [0], [1], [0, 0, 1, 1], [], []>} : vector<8x64xf32>, vector<64x256xf32>, vector<8x256xf32> -> vector<8x256xf32>
    %20 = arith.addf %18, %19 : vector<8x256xf32>
    %21 = vector.broadcast %1 : vector<1x256xf32> to vector<8x256xf32>
    %22 = arith.mulf %20, %21 : vector<8x256xf32>
    %23 = math.tanh %22 : vector<8x256xf32>
    %24 = vector.broadcast %1 : vector<1x256xf32> to vector<8x256xf32>
    %25 = arith.mulf %23, %24 : vector<8x256xf32>
    %26 = vector.broadcast %2 : vector<1x256xf32> to vector<8x256xf32>
    %27 = arith.addf %25, %26 : vector<8x256xf32>
    %28 = vector.extract_strided_slice %27 {offsets = [0, 0], sizes = [8, 64], strides = [1, 1]} : vector<8x256xf32> to vector<8x64xf32>
    %29 = vector.extract_strided_slice %27 {offsets = [0, 64], sizes = [8, 64], strides = [1, 1]} : vector<8x256xf32> to vector<8x64xf32>
    %30 = vector.extract_strided_slice %27 {offsets = [0, 128], sizes = [8, 64], strides = [1, 1]} : vector<8x256xf32> to vector<8x64xf32>
    %31 = vector.extract_strided_slice %27 {offsets = [0, 192], sizes = [8, 64], strides = [1, 1]} : vector<8x256xf32> to vector<8x64xf32>
    %32 = arith.mulf %29, %15 : vector<8x64xf32>
    %33 = arith.mulf %28, %30 : vector<8x64xf32>
    %34 = arith.addf %32, %33 : vector<8x64xf32>
    %35 = math.tanh %34 : vector<8x64xf32>
    %36 = arith.mulf %31, %35 : vector<8x64xf32>
    %37 = vector.broadcast %c0_i32_8 : i32 to vector<1x64xi32>
    %38 = arith.muli %14, %37 : vector<1x64xi32>
    %39 = arith.addi %9, %38 : vector<1x64xi32>
    %40 = vector.broadcast %39 : vector<1x64xi32> to vector<8x64xi32>
    %41 = vector.broadcast %3 : vector<8x1xi32> to vector<8x64xi32>
    %42 = arith.cmpi slt, %40, %41 : vector<8x64xi32>
    %43 = arith.select %42, %36, %15 : vector<8x64xi1>, vector<8x64xf32>
    %44 = arith.select %42, %34, %15 : vector<8x64xi1>, vector<8x64xf32>
    %cst_12 = arith.constant 0.000000e+00 : f32
    %45 = vector.broadcast %cst_12 : f32 to vector<8x64xf32>
    %46 = arith.select %42, %36, %45 : vector<8x64xi1>, vector<8x64xf32>
    %47 = arith.index_cast %c0_i32_8 : i32 to index
    %c0_13 = arith.constant 0 : index
    %c0_14 = arith.constant 0 : index
    %48 = vector.load %arg5[%47, %c0_13, %c0_14] : memref<8x8x64xf32, #tpu.memory_space<vmem>>, vector<1x8x64xf32>
    %49 = vector.shape_cast %48 : vector<1x8x64xf32> to vector<8x64xf32>
    %50 = vector.shape_cast %46 : vector<8x64xf32> to vector<1x8x64xf32>
    tpu.vector_store %arg5[%47, %c0_13, %c0_14], %50 {strides = array<i32>} : memref<8x8x64xf32, #tpu.memory_space<vmem>>, vector<1x8x64xf32>,
    %c1_i32_15 = arith.constant 1 : i32
    %51 = arith.index_cast %c1_i32_15 : i32 to index
    %c0_16 = arith.constant 0 : index
    %c0_17 = arith.constant 0 : index
    %52 = vector.load %arg0[%51, %c0_16, %c0_17] : memref<8x8x256xf32, #tpu.memory_space<vmem>>, vector<1x8x256xf32>
    %53 = vector.shape_cast %52 : vector<1x8x256xf32> to vector<8x256xf32>
    %cst_18 = arith.constant dense<0.000000e+00> : vector<8x256xf32>
    %54 = tpu.matmul %43, %0, %cst_18 {dimension_numbers = #tpu.dot_dimension_numbers<[1], [0], [0], [1], [0, 0, 1, 1], [], []>} : vector<8x64xf32>, vector<64x256xf32>, vector<8x256xf32> -> vector<8x256xf32>
    %55 = arith.addf %53, %54 : vector<8x256xf32>
    %56 = vector.broadcast %1 : vector<1x256xf32> to vector<8x256xf32>
    %57 = arith.mulf %55, %56 : vector<8x256xf32>
    %58 = math.tanh %57 : vector<8x256xf32>
    %59 = vector.broadcast %1 : vector<1x256xf32> to vector<8x256xf32>
    %60 = arith.mulf %58, %59 : vector<8x256xf32>
    %61 = vector.broadcast %2 : vector<1x256xf32> to vector<8x256xf32>
    %62 = arith.addf %60, %61 : vector<8x256xf32>
    %63 = vector.extract_strided_slice %62 {offsets = [0, 0], sizes = [8, 64], strides = [1, 1]} : vector<8x256xf32> to vector<8x64xf32>
    %64 = vector.extract_strided_slice %62 {offsets = [0, 64], sizes = [8, 64], strides = [1, 1]} : vector<8x256xf32> to vector<8x64xf32>
    %65 = vector.extract_strided_slice %62 {offsets = [0, 128], sizes = [8, 64], strides = [1, 1]} : vector<8x256xf32> to vector<8x64xf32>
    %66 = vector.extract_strided_slice %62 {offsets = [0, 192], sizes = [8, 64], strides = [1, 1]} : vector<8x256xf32> to vector<8x64xf32>
    %67 = arith.mulf %64, %44 : vector<8x64xf32>
    %68 = arith.mulf %63, %65 : vector<8x64xf32>
    %69 = arith.addf %67, %68 : vector<8x64xf32>
    %70 = math.tanh %69 : vector<8x64xf32>
    %71 = arith.mulf %66, %70 : vector<8x64xf32>
    %72 = vector.broadcast %c1_i32_15 : i32 to vector<1x64xi32>
    %73 = arith.muli %14, %72 : vector<1x64xi32>
    %74 = arith.addi %9, %73 : vector<1x64xi32>
    %75 = vector.broadcast %74 : vector<1x64xi32> to vector<8x64xi32>
    %76 = vector.broadcast %3 : vector<8x1xi32> to vector<8x64xi32>
    %77 = arith.cmpi slt, %75, %76 : vector<8x64xi32>
    %78 = arith.select %77, %71, %43 : vector<8x64xi1>, vector<8x64xf32>
    %79 = arith.select %77, %69, %44 : vector<8x64xi1>, vector<8x64xf32>
    %cst_19 = arith.constant 0.000000e+00 : f32
    %80 = vector.broadcast %cst_19 : f32 to vector<8x64xf32>
    %81 = arith.select %77, %71, %80 : vector<8x64xi1>, vector<8x64xf32>
    %82 = arith.index_cast %c1_i32_15 : i32 to index
    %c0_20 = arith.constant 0 : index
    %c0_21 = arith.constant 0 : index
    %83 = vector.load %arg5[%82, %c0_20, %c0_21] : memref<8x8x64xf32, #tpu.memory_space<vmem>>, vector<1x8x64xf32>
    %84 = vector.shape_cast %83 : vector<1x8x64xf32> to vector<8x64xf32>
    %85 = vector.shape_cast %81 : vector<8x64xf32> to vector<1x8x64xf32>
    tpu.vector_store %arg5[%82, %c0_20, %c0_21], %85 {strides = array<i32>} : memref<8x8x64xf32, #tpu.memory_space<vmem>>, vector<1x8x64xf32>,
    %c2_i32 = arith.constant 2 : i32
    %86 = arith.index_cast %c2_i32 : i32 to index
    %c0_22 = arith.constant 0 : index
    %c0_23 = arith.constant 0 : index
    %87 = vector.load %arg0[%86, %c0_22, %c0_23] : memref<8x8x256xf32, #tpu.memory_space<vmem>>, vector<1x8x256xf32>
    %88 = vector.shape_cast %87 : vector<1x8x256xf32> to vector<8x256xf32>
    %cst_24 = arith.constant dense<0.000000e+00> : vector<8x256xf32>
    %89 = tpu.matmul %78, %0, %cst_24 {dimension_numbers = #tpu.dot_dimension_numbers<[1], [0], [0], [1], [0, 0, 1, 1], [], []>} : vector<8x64xf32>, vector<64x256xf32>, vector<8x256xf32> -> vector<8x256xf32>
    %90 = arith.addf %88, %89 : vector<8x256xf32>
    %91 = vector.broadcast %1 : vector<1x256xf32> to vector<8x256xf32>
    %92 = arith.mulf %90, %91 : vector<8x256xf32>
    %93 = math.tanh %92 : vector<8x256xf32>
    %94 = vector.broadcast %1 : vector<1x256xf32> to vector<8x256xf32>
    %95 = arith.mulf %93, %94 : vector<8x256xf32>
    %96 = vector.broadcast %2 : vector<1x256xf32> to vector<8x256xf32>
    %97 = arith.addf %95, %96 : vector<8x256xf32>
    %98 = vector.extract_strided_slice %97 {offsets = [0, 0], sizes = [8, 64], strides = [1, 1]} : vector<8x256xf32> to vector<8x64xf32>
    %99 = vector.extract_strided_slice %97 {offsets = [0, 64], sizes = [8, 64], strides = [1, 1]} : vector<8x256xf32> to vector<8x64xf32>
    %100 = vector.extract_strided_slice %97 {offsets = [0, 128], sizes = [8, 64], strides = [1, 1]} : vector<8x256xf32> to vector<8x64xf32>
    %101 = vector.extract_strided_slice %97 {offsets = [0, 192], sizes = [8, 64], strides = [1, 1]} : vector<8x256xf32> to vector<8x64xf32>
    %102 = arith.mulf %99, %79 : vector<8x64xf32>
    %103 = arith.mulf %98, %100 : vector<8x64xf32>
    %104 = arith.addf %102, %103 : vector<8x64xf32>
    %105 = math.tanh %104 : vector<8x64xf32>
    %106 = arith.mulf %101, %105 : vector<8x64xf32>
    %107 = vector.broadcast %c2_i32 : i32 to vector<1x64xi32>
    %108 = arith.muli %14, %107 : vector<1x64xi32>
    %109 = arith.addi %9, %108 : vector<1x64xi32>
    %110 = vector.broadcast %109 : vector<1x64xi32> to vector<8x64xi32>
    %111 = vector.broadcast %3 : vector<8x1xi32> to vector<8x64xi32>
    %112 = arith.cmpi slt, %110, %111 : vector<8x64xi32>
    %113 = arith.select %112, %106, %78 : vector<8x64xi1>, vector<8x64xf32>
    %114 = arith.select %112, %104, %79 : vector<8x64xi1>, vector<8x64xf32>
    %cst_25 = arith.constant 0.000000e+00 : f32
    %115 = vector.broadcast %cst_25 : f32 to vector<8x64xf32>
    %116 = arith.select %112, %106, %115 : vector<8x64xi1>, vector<8x64xf32>
    %117 = arith.index_cast %c2_i32 : i32 to index
    %c0_26 = arith.constant 0 : index
    %c0_27 = arith.constant 0 : index
    %118 = vector.load %arg5[%117, %c0_26, %c0_27] : memref<8x8x64xf32, #tpu.memory_space<vmem>>, vector<1x8x64xf32>
    %119 = vector.shape_cast %118 : vector<1x8x64xf32> to vector<8x64xf32>
    %120 = vector.shape_cast %116 : vector<8x64xf32> to vector<1x8x64xf32>
    tpu.vector_store %arg5[%117, %c0_26, %c0_27], %120 {strides = array<i32>} : memref<8x8x64xf32, #tpu.memory_space<vmem>>, vector<1x8x64xf32>,
    %c3_i32 = arith.constant 3 : i32
    %121 = arith.index_cast %c3_i32 : i32 to index
    %c0_28 = arith.constant 0 : index
    %c0_29 = arith.constant 0 : index
    %122 = vector.load %arg0[%121, %c0_28, %c0_29] : memref<8x8x256xf32, #tpu.memory_space<vmem>>, vector<1x8x256xf32>
    %123 = vector.shape_cast %122 : vector<1x8x256xf32> to vector<8x256xf32>
    %cst_30 = arith.constant dense<0.000000e+00> : vector<8x256xf32>
    %124 = tpu.matmul %113, %0, %cst_30 {dimension_numbers = #tpu.dot_dimension_numbers<[1], [0], [0], [1], [0, 0, 1, 1], [], []>} : vector<8x64xf32>, vector<64x256xf32>, vector<8x256xf32> -> vector<8x256xf32>
    %125 = arith.addf %123, %124 : vector<8x256xf32>
    %126 = vector.broadcast %1 : vector<1x256xf32> to vector<8x256xf32>
    %127 = arith.mulf %125, %126 : vector<8x256xf32>
    %128 = math.tanh %127 : vector<8x256xf32>
    %129 = vector.broadcast %1 : vector<1x256xf32> to vector<8x256xf32>
    %130 = arith.mulf %128, %129 : vector<8x256xf32>
    %131 = vector.broadcast %2 : vector<1x256xf32> to vector<8x256xf32>
    %132 = arith.addf %130, %131 : vector<8x256xf32>
    %133 = vector.extract_strided_slice %132 {offsets = [0, 0], sizes = [8, 64], strides = [1, 1]} : vector<8x256xf32> to vector<8x64xf32>
    %134 = vector.extract_strided_slice %132 {offsets = [0, 64], sizes = [8, 64], strides = [1, 1]} : vector<8x256xf32> to vector<8x64xf32>
    %135 = vector.extract_strided_slice %132 {offsets = [0, 128], sizes = [8, 64], strides = [1, 1]} : vector<8x256xf32> to vector<8x64xf32>
    %136 = vector.extract_strided_slice %132 {offsets = [0, 192], sizes = [8, 64], strides = [1, 1]} : vector<8x256xf32> to vector<8x64xf32>
    %137 = arith.mulf %134, %114 : vector<8x64xf32>
    %138 = arith.mulf %133, %135 : vector<8x64xf32>
    %139 = arith.addf %137, %138 : vector<8x64xf32>
    %140 = math.tanh %139 : vector<8x64xf32>
    %141 = arith.mulf %136, %140 : vector<8x64xf32>
    %142 = vector.broadcast %c3_i32 : i32 to vector<1x64xi32>
    %143 = arith.muli %14, %142 : vector<1x64xi32>
    %144 = arith.addi %9, %143 : vector<1x64xi32>
    %145 = vector.broadcast %144 : vector<1x64xi32> to vector<8x64xi32>
    %146 = vector.broadcast %3 : vector<8x1xi32> to vector<8x64xi32>
    %147 = arith.cmpi slt, %145, %146 : vector<8x64xi32>
    %148 = arith.select %147, %141, %113 : vector<8x64xi1>, vector<8x64xf32>
    %149 = arith.select %147, %139, %114 : vector<8x64xi1>, vector<8x64xf32>
    %cst_31 = arith.constant 0.000000e+00 : f32
    %150 = vector.broadcast %cst_31 : f32 to vector<8x64xf32>
    %151 = arith.select %147, %141, %150 : vector<8x64xi1>, vector<8x64xf32>
    %152 = arith.index_cast %c3_i32 : i32 to index
    %c0_32 = arith.constant 0 : index
    %c0_33 = arith.constant 0 : index
    %153 = vector.load %arg5[%152, %c0_32, %c0_33] : memref<8x8x64xf32, #tpu.memory_space<vmem>>, vector<1x8x64xf32>
    %154 = vector.shape_cast %153 : vector<1x8x64xf32> to vector<8x64xf32>
    %155 = vector.shape_cast %151 : vector<8x64xf32> to vector<1x8x64xf32>
    tpu.vector_store %arg5[%152, %c0_32, %c0_33], %155 {strides = array<i32>} : memref<8x8x64xf32, #tpu.memory_space<vmem>>, vector<1x8x64xf32>,
    %c4_i32 = arith.constant 4 : i32
    %156 = arith.index_cast %c4_i32 : i32 to index
    %c0_34 = arith.constant 0 : index
    %c0_35 = arith.constant 0 : index
    %157 = vector.load %arg0[%156, %c0_34, %c0_35] : memref<8x8x256xf32, #tpu.memory_space<vmem>>, vector<1x8x256xf32>
    %158 = vector.shape_cast %157 : vector<1x8x256xf32> to vector<8x256xf32>
    %cst_36 = arith.constant dense<0.000000e+00> : vector<8x256xf32>
    %159 = tpu.matmul %148, %0, %cst_36 {dimension_numbers = #tpu.dot_dimension_numbers<[1], [0], [0], [1], [0, 0, 1, 1], [], []>} : vector<8x64xf32>, vector<64x256xf32>, vector<8x256xf32> -> vector<8x256xf32>
    %160 = arith.addf %158, %159 : vector<8x256xf32>
    %161 = vector.broadcast %1 : vector<1x256xf32> to vector<8x256xf32>
    %162 = arith.mulf %160, %161 : vector<8x256xf32>
    %163 = math.tanh %162 : vector<8x256xf32>
    %164 = vector.broadcast %1 : vector<1x256xf32> to vector<8x256xf32>
    %165 = arith.mulf %163, %164 : vector<8x256xf32>
    %166 = vector.broadcast %2 : vector<1x256xf32> to vector<8x256xf32>
    %167 = arith.addf %165, %166 : vector<8x256xf32>
    %168 = vector.extract_strided_slice %167 {offsets = [0, 0], sizes = [8, 64], strides = [1, 1]} : vector<8x256xf32> to vector<8x64xf32>
    %169 = vector.extract_strided_slice %167 {offsets = [0, 64], sizes = [8, 64], strides = [1, 1]} : vector<8x256xf32> to vector<8x64xf32>
    %170 = vector.extract_strided_slice %167 {offsets = [0, 128], sizes = [8, 64], strides = [1, 1]} : vector<8x256xf32> to vector<8x64xf32>
    %171 = vector.extract_strided_slice %167 {offsets = [0, 192], sizes = [8, 64], strides = [1, 1]} : vector<8x256xf32> to vector<8x64xf32>
    %172 = arith.mulf %169, %149 : vector<8x64xf32>
    %173 = arith.mulf %168, %170 : vector<8x64xf32>
    %174 = arith.addf %172, %173 : vector<8x64xf32>
    %175 = math.tanh %174 : vector<8x64xf32>
    %176 = arith.mulf %171, %175 : vector<8x64xf32>
    %177 = vector.broadcast %c4_i32 : i32 to vector<1x64xi32>
    %178 = arith.muli %14, %177 : vector<1x64xi32>
    %179 = arith.addi %9, %178 : vector<1x64xi32>
    %180 = vector.broadcast %179 : vector<1x64xi32> to vector<8x64xi32>
    %181 = vector.broadcast %3 : vector<8x1xi32> to vector<8x64xi32>
    %182 = arith.cmpi slt, %180, %181 : vector<8x64xi32>
    %183 = arith.select %182, %176, %148 : vector<8x64xi1>, vector<8x64xf32>
    %184 = arith.select %182, %174, %149 : vector<8x64xi1>, vector<8x64xf32>
    %cst_37 = arith.constant 0.000000e+00 : f32
    %185 = vector.broadcast %cst_37 : f32 to vector<8x64xf32>
    %186 = arith.select %182, %176, %185 : vector<8x64xi1>, vector<8x64xf32>
    %187 = arith.index_cast %c4_i32 : i32 to index
    %c0_38 = arith.constant 0 : index
    %c0_39 = arith.constant 0 : index
    %188 = vector.load %arg5[%187, %c0_38, %c0_39] : memref<8x8x64xf32, #tpu.memory_space<vmem>>, vector<1x8x64xf32>
    %189 = vector.shape_cast %188 : vector<1x8x64xf32> to vector<8x64xf32>
    %190 = vector.shape_cast %186 : vector<8x64xf32> to vector<1x8x64xf32>
    tpu.vector_store %arg5[%187, %c0_38, %c0_39], %190 {strides = array<i32>} : memref<8x8x64xf32, #tpu.memory_space<vmem>>, vector<1x8x64xf32>,
    %c5_i32 = arith.constant 5 : i32
    %191 = arith.index_cast %c5_i32 : i32 to index
    %c0_40 = arith.constant 0 : index
    %c0_41 = arith.constant 0 : index
    %192 = vector.load %arg0[%191, %c0_40, %c0_41] : memref<8x8x256xf32, #tpu.memory_space<vmem>>, vector<1x8x256xf32>
    %193 = vector.shape_cast %192 : vector<1x8x256xf32> to vector<8x256xf32>
    %cst_42 = arith.constant dense<0.000000e+00> : vector<8x256xf32>
    %194 = tpu.matmul %183, %0, %cst_42 {dimension_numbers = #tpu.dot_dimension_numbers<[1], [0], [0], [1], [0, 0, 1, 1], [], []>} : vector<8x64xf32>, vector<64x256xf32>, vector<8x256xf32> -> vector<8x256xf32>
    %195 = arith.addf %193, %194 : vector<8x256xf32>
    %196 = vector.broadcast %1 : vector<1x256xf32> to vector<8x256xf32>
    %197 = arith.mulf %195, %196 : vector<8x256xf32>
    %198 = math.tanh %197 : vector<8x256xf32>
    %199 = vector.broadcast %1 : vector<1x256xf32> to vector<8x256xf32>
    %200 = arith.mulf %198, %199 : vector<8x256xf32>
    %201 = vector.broadcast %2 : vector<1x256xf32> to vector<8x256xf32>
    %202 = arith.addf %200, %201 : vector<8x256xf32>
    %203 = vector.extract_strided_slice %202 {offsets = [0, 0], sizes = [8, 64], strides = [1, 1]} : vector<8x256xf32> to vector<8x64xf32>
    %204 = vector.extract_strided_slice %202 {offsets = [0, 64], sizes = [8, 64], strides = [1, 1]} : vector<8x256xf32> to vector<8x64xf32>
    %205 = vector.extract_strided_slice %202 {offsets = [0, 128], sizes = [8, 64], strides = [1, 1]} : vector<8x256xf32> to vector<8x64xf32>
    %206 = vector.extract_strided_slice %202 {offsets = [0, 192], sizes = [8, 64], strides = [1, 1]} : vector<8x256xf32> to vector<8x64xf32>
    %207 = arith.mulf %204, %184 : vector<8x64xf32>
    %208 = arith.mulf %203, %205 : vector<8x64xf32>
    %209 = arith.addf %207, %208 : vector<8x64xf32>
    %210 = math.tanh %209 : vector<8x64xf32>
    %211 = arith.mulf %206, %210 : vector<8x64xf32>
    %212 = vector.broadcast %c5_i32 : i32 to vector<1x64xi32>
    %213 = arith.muli %14, %212 : vector<1x64xi32>
    %214 = arith.addi %9, %213 : vector<1x64xi32>
    %215 = vector.broadcast %214 : vector<1x64xi32> to vector<8x64xi32>
    %216 = vector.broadcast %3 : vector<8x1xi32> to vector<8x64xi32>
    %217 = arith.cmpi slt, %215, %216 : vector<8x64xi32>
    %218 = arith.select %217, %211, %183 : vector<8x64xi1>, vector<8x64xf32>
    %219 = arith.select %217, %209, %184 : vector<8x64xi1>, vector<8x64xf32>
    %cst_43 = arith.constant 0.000000e+00 : f32
    %220 = vector.broadcast %cst_43 : f32 to vector<8x64xf32>
    %221 = arith.select %217, %211, %220 : vector<8x64xi1>, vector<8x64xf32>
    %222 = arith.index_cast %c5_i32 : i32 to index
    %c0_44 = arith.constant 0 : index
    %c0_45 = arith.constant 0 : index
    %223 = vector.load %arg5[%222, %c0_44, %c0_45] : memref<8x8x64xf32, #tpu.memory_space<vmem>>, vector<1x8x64xf32>
    %224 = vector.shape_cast %223 : vector<1x8x64xf32> to vector<8x64xf32>
    %225 = vector.shape_cast %221 : vector<8x64xf32> to vector<1x8x64xf32>
    tpu.vector_store %arg5[%222, %c0_44, %c0_45], %225 {strides = array<i32>} : memref<8x8x64xf32, #tpu.memory_space<vmem>>, vector<1x8x64xf32>,
    %c6_i32 = arith.constant 6 : i32
    %226 = arith.index_cast %c6_i32 : i32 to index
    %c0_46 = arith.constant 0 : index
    %c0_47 = arith.constant 0 : index
    %227 = vector.load %arg0[%226, %c0_46, %c0_47] : memref<8x8x256xf32, #tpu.memory_space<vmem>>, vector<1x8x256xf32>
    %228 = vector.shape_cast %227 : vector<1x8x256xf32> to vector<8x256xf32>
    %cst_48 = arith.constant dense<0.000000e+00> : vector<8x256xf32>
    %229 = tpu.matmul %218, %0, %cst_48 {dimension_numbers = #tpu.dot_dimension_numbers<[1], [0], [0], [1], [0, 0, 1, 1], [], []>} : vector<8x64xf32>, vector<64x256xf32>, vector<8x256xf32> -> vector<8x256xf32>
    %230 = arith.addf %228, %229 : vector<8x256xf32>
    %231 = vector.broadcast %1 : vector<1x256xf32> to vector<8x256xf32>
    %232 = arith.mulf %230, %231 : vector<8x256xf32>
    %233 = math.tanh %232 : vector<8x256xf32>
    %234 = vector.broadcast %1 : vector<1x256xf32> to vector<8x256xf32>
    %235 = arith.mulf %233, %234 : vector<8x256xf32>
    %236 = vector.broadcast %2 : vector<1x256xf32> to vector<8x256xf32>
    %237 = arith.addf %235, %236 : vector<8x256xf32>
    %238 = vector.extract_strided_slice %237 {offsets = [0, 0], sizes = [8, 64], strides = [1, 1]} : vector<8x256xf32> to vector<8x64xf32>
    %239 = vector.extract_strided_slice %237 {offsets = [0, 64], sizes = [8, 64], strides = [1, 1]} : vector<8x256xf32> to vector<8x64xf32>
    %240 = vector.extract_strided_slice %237 {offsets = [0, 128], sizes = [8, 64], strides = [1, 1]} : vector<8x256xf32> to vector<8x64xf32>
    %241 = vector.extract_strided_slice %237 {offsets = [0, 192], sizes = [8, 64], strides = [1, 1]} : vector<8x256xf32> to vector<8x64xf32>
    %242 = arith.mulf %239, %219 : vector<8x64xf32>
    %243 = arith.mulf %238, %240 : vector<8x64xf32>
    %244 = arith.addf %242, %243 : vector<8x64xf32>
    %245 = math.tanh %244 : vector<8x64xf32>
    %246 = arith.mulf %241, %245 : vector<8x64xf32>
    %247 = vector.broadcast %c6_i32 : i32 to vector<1x64xi32>
    %248 = arith.muli %14, %247 : vector<1x64xi32>
    %249 = arith.addi %9, %248 : vector<1x64xi32>
    %250 = vector.broadcast %249 : vector<1x64xi32> to vector<8x64xi32>
    %251 = vector.broadcast %3 : vector<8x1xi32> to vector<8x64xi32>
    %252 = arith.cmpi slt, %250, %251 : vector<8x64xi32>
    %253 = arith.select %252, %246, %218 : vector<8x64xi1>, vector<8x64xf32>
    %254 = arith.select %252, %244, %219 : vector<8x64xi1>, vector<8x64xf32>
    %cst_49 = arith.constant 0.000000e+00 : f32
    %255 = vector.broadcast %cst_49 : f32 to vector<8x64xf32>
    %256 = arith.select %252, %246, %255 : vector<8x64xi1>, vector<8x64xf32>
    %257 = arith.index_cast %c6_i32 : i32 to index
    %c0_50 = arith.constant 0 : index
    %c0_51 = arith.constant 0 : index
    %258 = vector.load %arg5[%257, %c0_50, %c0_51] : memref<8x8x64xf32, #tpu.memory_space<vmem>>, vector<1x8x64xf32>
    %259 = vector.shape_cast %258 : vector<1x8x64xf32> to vector<8x64xf32>
    %260 = vector.shape_cast %256 : vector<8x64xf32> to vector<1x8x64xf32>
    tpu.vector_store %arg5[%257, %c0_50, %c0_51], %260 {strides = array<i32>} : memref<8x8x64xf32, #tpu.memory_space<vmem>>, vector<1x8x64xf32>,
    %c7_i32_52 = arith.constant 7 : i32
    %261 = arith.index_cast %c7_i32_52 : i32 to index
    %c0_53 = arith.constant 0 : index
    %c0_54 = arith.constant 0 : index
    %262 = vector.load %arg0[%261, %c0_53, %c0_54] : memref<8x8x256xf32, #tpu.memory_space<vmem>>, vector<1x8x256xf32>
    %263 = vector.shape_cast %262 : vector<1x8x256xf32> to vector<8x256xf32>
    %cst_55 = arith.constant dense<0.000000e+00> : vector<8x256xf32>
    %264 = tpu.matmul %253, %0, %cst_55 {dimension_numbers = #tpu.dot_dimension_numbers<[1], [0], [0], [1], [0, 0, 1, 1], [], []>} : vector<8x64xf32>, vector<64x256xf32>, vector<8x256xf32> -> vector<8x256xf32>
    %265 = arith.addf %263, %264 : vector<8x256xf32>
    %266 = vector.broadcast %1 : vector<1x256xf32> to vector<8x256xf32>
    %267 = arith.mulf %265, %266 : vector<8x256xf32>
    %268 = math.tanh %267 : vector<8x256xf32>
    %269 = vector.broadcast %1 : vector<1x256xf32> to vector<8x256xf32>
    %270 = arith.mulf %268, %269 : vector<8x256xf32>
    %271 = vector.broadcast %2 : vector<1x256xf32> to vector<8x256xf32>
    %272 = arith.addf %270, %271 : vector<8x256xf32>
    %273 = vector.extract_strided_slice %272 {offsets = [0, 0], sizes = [8, 64], strides = [1, 1]} : vector<8x256xf32> to vector<8x64xf32>
    %274 = vector.extract_strided_slice %272 {offsets = [0, 64], sizes = [8, 64], strides = [1, 1]} : vector<8x256xf32> to vector<8x64xf32>
    %275 = vector.extract_strided_slice %272 {offsets = [0, 128], sizes = [8, 64], strides = [1, 1]} : vector<8x256xf32> to vector<8x64xf32>
    %276 = vector.extract_strided_slice %272 {offsets = [0, 192], sizes = [8, 64], strides = [1, 1]} : vector<8x256xf32> to vector<8x64xf32>
    %277 = arith.mulf %274, %254 : vector<8x64xf32>
    %278 = arith.mulf %273, %275 : vector<8x64xf32>
    %279 = arith.addf %277, %278 : vector<8x64xf32>
    %280 = math.tanh %279 : vector<8x64xf32>
    %281 = arith.mulf %276, %280 : vector<8x64xf32>
    %282 = vector.broadcast %c7_i32_52 : i32 to vector<1x64xi32>
    %283 = arith.muli %14, %282 : vector<1x64xi32>
    %284 = arith.addi %9, %283 : vector<1x64xi32>
    %285 = vector.broadcast %284 : vector<1x64xi32> to vector<8x64xi32>
    %286 = vector.broadcast %3 : vector<8x1xi32> to vector<8x64xi32>
    %287 = arith.cmpi slt, %285, %286 : vector<8x64xi32>
    %288 = arith.select %287, %281, %253 : vector<8x64xi1>, vector<8x64xf32>
    %289 = arith.select %287, %279, %254 : vector<8x64xi1>, vector<8x64xf32>
    %cst_56 = arith.constant 0.000000e+00 : f32
    %290 = vector.broadcast %cst_56 : f32 to vector<8x64xf32>
    %291 = arith.select %287, %281, %290 : vector<8x64xi1>, vector<8x64xf32>
    %292 = arith.index_cast %c7_i32_52 : i32 to index
    %c0_57 = arith.constant 0 : index
    %c0_58 = arith.constant 0 : index
    %293 = vector.load %arg5[%292, %c0_57, %c0_58] : memref<8x8x64xf32, #tpu.memory_space<vmem>>, vector<1x8x64xf32>
    %294 = vector.shape_cast %293 : vector<1x8x64xf32> to vector<8x64xf32>
    %295 = vector.shape_cast %291 : vector<8x64xf32> to vector<1x8x64xf32>
    tpu.vector_store %arg5[%292, %c0_57, %c0_58], %295 {strides = array<i32>} : memref<8x8x64xf32, #tpu.memory_space<vmem>>, vector<1x8x64xf32>,
    %c8_i32 = arith.constant 8 : i32
    return
  }
}

module attributes {stable_mosaic.version = 11 : i64} {
  func.func @_bilstm_kernel(%arg0: memref<8x8x256xf32, #tpu.memory_space<vmem>>, %arg1: memref<8x1xi32, #tpu.memory_space<vmem>>, %arg2: memref<64x256xf32, #tpu.memory_space<vmem>>, %arg3: memref<1x256xf32, #tpu.memory_space<vmem>>, %arg4: memref<1x256xf32, #tpu.memory_space<vmem>>, %arg5: memref<64x128xf32, #tpu.memory_space<vmem>>, %arg6: memref<1x128xf32, #tpu.memory_space<vmem>>, %arg7: memref<8x8x128xf32, #tpu.memory_space<vmem>>) attributes {dimension_semantics = [], scalar_prefetch = 0 : i64, scratch_operands = 0 : i64, tpu.core_type = #tpu.core_type<tc>} {
    %c0 = arith.constant 0 : index
    %c0_0 = arith.constant 0 : index
    %0 = vector.load %arg2[%c0, %c0_0] : memref<64x256xf32, #tpu.memory_space<vmem>>, vector<64x256xf32>
    %c0_1 = arith.constant 0 : index
    %c0_2 = arith.constant 0 : index
    %1 = vector.load %arg3[%c0_1, %c0_2] : memref<1x256xf32, #tpu.memory_space<vmem>>, vector<1x256xf32>
    %c0_3 = arith.constant 0 : index
    %c0_4 = arith.constant 0 : index
    %2 = vector.load %arg4[%c0_3, %c0_4] : memref<1x256xf32, #tpu.memory_space<vmem>>, vector<1x256xf32>
    %c0_5 = arith.constant 0 : index
    %c0_6 = arith.constant 0 : index
    %3 = vector.load %arg1[%c0_5, %c0_6] : memref<8x1xi32, #tpu.memory_space<vmem>>, vector<8x1xi32>
    %4 = tpu.iota {dimensions = array<i32: 1>} : vector<1x64xi32>
    %c32_i32 = arith.constant 32 : i32
    %5 = vector.broadcast %c32_i32 : i32 to vector<1x64xi32>
    %6 = arith.cmpi slt, %4, %5 : vector<1x64xi32>
    %c0_i32 = arith.constant 0 : i32
    %c7_i32 = arith.constant 7 : i32
    %7 = vector.broadcast %c0_i32 : i32 to vector<1x64xi32>
    %8 = vector.broadcast %c7_i32 : i32 to vector<1x64xi32>
    %9 = arith.select %6, %7, %8 : vector<1x64xi1>, vector<1x64xi32>
    %c32_i32_7 = arith.constant 32 : i32
    %10 = vector.broadcast %c32_i32_7 : i32 to vector<1x64xi32>
    %11 = arith.cmpi slt, %4, %10 : vector<1x64xi32>
    %c1_i32 = arith.constant 1 : i32
    %c-1_i32 = arith.constant -1 : i32
    %12 = vector.broadcast %c1_i32 : i32 to vector<1x64xi32>
    %13 = vector.broadcast %c-1_i32 : i32 to vector<1x64xi32>
    %14 = arith.select %11, %12, %13 : vector<1x64xi1>, vector<1x64xi32>
    %c0_8 = arith.constant 0 : index
    %c0_9 = arith.constant 0 : index
    %15 = vector.load %arg5[%c0_8, %c0_9] : memref<64x128xf32, #tpu.memory_space<vmem>>, vector<32x128xf32>
    %c32 = arith.constant 32 : index
    %c0_10 = arith.constant 0 : index
    %16 = vector.load %arg5[%c32, %c0_10] : memref<64x128xf32, #tpu.memory_space<vmem>>, vector<32x128xf32>
    %c0_11 = arith.constant 0 : index
    %c0_12 = arith.constant 0 : index
    %17 = vector.load %arg6[%c0_11, %c0_12] : memref<1x128xf32, #tpu.memory_space<vmem>>, vector<1x128xf32>
    %18 = vector.shape_cast %17 : vector<1x128xf32> to vector<1x1x128xf32>
    %19 = vector.shape_cast %18 : vector<1x1x128xf32> to vector<1x1x128xf32>
    %20 = vector.broadcast %19 : vector<1x1x128xf32> to vector<8x8x128xf32>
    %c0_13 = arith.constant 0 : index
    %c0_14 = arith.constant 0 : index
    %c0_15 = arith.constant 0 : index
    %21 = vector.load %arg7[%c0_13, %c0_14, %c0_15] : memref<8x8x128xf32, #tpu.memory_space<vmem>>, vector<8x8x128xf32>
    tpu.vector_store %arg7[%c0_13, %c0_14, %c0_15], %20 {strides = array<i32>} : memref<8x8x128xf32, #tpu.memory_space<vmem>>, vector<8x8x128xf32>,
    %cst = arith.constant 0.000000e+00 : f32
    %22 = vector.broadcast %cst : f32 to vector<8x64xf32>
    %c0_i32_16 = arith.constant 0 : i32
    %c7_i32_17 = arith.constant 7 : i32
    %23 = arith.subi %c7_i32_17, %c0_i32_16 : i32
    %24 = arith.index_cast %c0_i32_16 : i32 to index
    %c0_18 = arith.constant 0 : index
    %c0_19 = arith.constant 0 : index
    %25 = vector.load %arg0[%24, %c0_18, %c0_19] : memref<8x8x256xf32, #tpu.memory_space<vmem>>, vector<1x8x256xf32>
    %26 = vector.shape_cast %25 : vector<1x8x256xf32> to vector<8x256xf32>
    %cst_20 = arith.constant dense<0.000000e+00> : vector<8x256xf32>
    %27 = tpu.matmul %22, %0, %cst_20 {dimension_numbers = #tpu.dot_dimension_numbers<[1], [0], [0], [1], [0, 0, 1, 1], [], []>} : vector<8x64xf32>, vector<64x256xf32>, vector<8x256xf32> -> vector<8x256xf32>
    %28 = arith.addf %26, %27 : vector<8x256xf32>
    %29 = vector.broadcast %1 : vector<1x256xf32> to vector<8x256xf32>
    %30 = arith.mulf %28, %29 : vector<8x256xf32>
    %31 = math.tanh %30 : vector<8x256xf32>
    %32 = vector.broadcast %1 : vector<1x256xf32> to vector<8x256xf32>
    %33 = arith.mulf %31, %32 : vector<8x256xf32>
    %34 = vector.broadcast %2 : vector<1x256xf32> to vector<8x256xf32>
    %35 = arith.addf %33, %34 : vector<8x256xf32>
    %36 = vector.extract_strided_slice %35 {offsets = [0, 0], sizes = [8, 64], strides = [1, 1]} : vector<8x256xf32> to vector<8x64xf32>
    %37 = vector.extract_strided_slice %35 {offsets = [0, 64], sizes = [8, 64], strides = [1, 1]} : vector<8x256xf32> to vector<8x64xf32>
    %38 = vector.extract_strided_slice %35 {offsets = [0, 128], sizes = [8, 64], strides = [1, 1]} : vector<8x256xf32> to vector<8x64xf32>
    %39 = vector.extract_strided_slice %35 {offsets = [0, 192], sizes = [8, 64], strides = [1, 1]} : vector<8x256xf32> to vector<8x64xf32>
    %40 = arith.mulf %37, %22 : vector<8x64xf32>
    %41 = arith.mulf %36, %38 : vector<8x64xf32>
    %42 = arith.addf %40, %41 : vector<8x64xf32>
    %43 = math.tanh %42 : vector<8x64xf32>
    %44 = arith.mulf %39, %43 : vector<8x64xf32>
    %45 = vector.broadcast %c0_i32_16 : i32 to vector<1x64xi32>
    %46 = arith.muli %14, %45 : vector<1x64xi32>
    %47 = arith.addi %9, %46 : vector<1x64xi32>
    %48 = vector.broadcast %47 : vector<1x64xi32> to vector<8x64xi32>
    %49 = vector.broadcast %3 : vector<8x1xi32> to vector<8x64xi32>
    %50 = arith.cmpi slt, %48, %49 : vector<8x64xi32>
    %51 = arith.select %50, %44, %22 : vector<8x64xi1>, vector<8x64xf32>
    %52 = arith.select %50, %42, %22 : vector<8x64xi1>, vector<8x64xf32>
    %cst_21 = arith.constant 0.000000e+00 : f32
    %53 = vector.broadcast %cst_21 : f32 to vector<8x64xf32>
    %54 = arith.select %50, %44, %53 : vector<8x64xi1>, vector<8x64xf32>
    %55 = arith.index_cast %c0_i32_16 : i32 to index
    %c0_22 = arith.constant 0 : index
    %c0_23 = arith.constant 0 : index
    %56 = vector.load %arg7[%55, %c0_22, %c0_23] : memref<8x8x128xf32, #tpu.memory_space<vmem>>, vector<1x8x128xf32>
    %57 = vector.shape_cast %56 : vector<1x8x128xf32> to vector<8x128xf32>
    %58 = vector.extract_strided_slice %54 {offsets = [0, 0], sizes = [8, 32], strides = [1, 1]} : vector<8x64xf32> to vector<8x32xf32>
    %cst_24 = arith.constant dense<0.000000e+00> : vector<8x128xf32>
    %59 = tpu.matmul %58, %15, %cst_24 {dimension_numbers = #tpu.dot_dimension_numbers<[1], [0], [0], [1], [0, 0, 1, 1], [], []>} : vector<8x32xf32>, vector<32x128xf32>, vector<8x128xf32> -> vector<8x128xf32>
    %60 = arith.addf %57, %59 : vector<8x128xf32>
    %61 = arith.index_cast %c0_i32_16 : i32 to index
    %c0_25 = arith.constant 0 : index
    %c0_26 = arith.constant 0 : index
    %62 = vector.load %arg7[%61, %c0_25, %c0_26] : memref<8x8x128xf32, #tpu.memory_space<vmem>>, vector<1x8x128xf32>
    %63 = vector.shape_cast %62 : vector<1x8x128xf32> to vector<8x128xf32>
    %64 = vector.shape_cast %60 : vector<8x128xf32> to vector<1x8x128xf32>
    tpu.vector_store %arg7[%61, %c0_25, %c0_26], %64 {strides = array<i32>} : memref<8x8x128xf32, #tpu.memory_space<vmem>>, vector<1x8x128xf32>,
    %65 = arith.index_cast %23 : i32 to index
    %c0_27 = arith.constant 0 : index
    %c0_28 = arith.constant 0 : index
    %66 = vector.load %arg7[%65, %c0_27, %c0_28] : memref<8x8x128xf32, #tpu.memory_space<vmem>>, vector<1x8x128xf32>
    %67 = vector.shape_cast %66 : vector<1x8x128xf32> to vector<8x128xf32>
    %68 = vector.extract_strided_slice %54 {offsets = [0, 32], sizes = [8, 32], strides = [1, 1]} : vector<8x64xf32> to vector<8x32xf32>
    %cst_29 = arith.constant dense<0.000000e+00> : vector<8x128xf32>
    %69 = tpu.matmul %68, %16, %cst_29 {dimension_numbers = #tpu.dot_dimension_numbers<[1], [0], [0], [1], [0, 0, 1, 1], [], []>} : vector<8x32xf32>, vector<32x128xf32>, vector<8x128xf32> -> vector<8x128xf32>
    %70 = arith.addf %67, %69 : vector<8x128xf32>
    %71 = arith.index_cast %23 : i32 to index
    %c0_30 = arith.constant 0 : index
    %c0_31 = arith.constant 0 : index
    %72 = vector.load %arg7[%71, %c0_30, %c0_31] : memref<8x8x128xf32, #tpu.memory_space<vmem>>, vector<1x8x128xf32>
    %73 = vector.shape_cast %72 : vector<1x8x128xf32> to vector<8x128xf32>
    %74 = vector.shape_cast %70 : vector<8x128xf32> to vector<1x8x128xf32>
    tpu.vector_store %arg7[%71, %c0_30, %c0_31], %74 {strides = array<i32>} : memref<8x8x128xf32, #tpu.memory_space<vmem>>, vector<1x8x128xf32>,
    %c1_i32_32 = arith.constant 1 : i32
    %c7_i32_33 = arith.constant 7 : i32
    %75 = arith.subi %c7_i32_33, %c1_i32_32 : i32
    %76 = arith.index_cast %c1_i32_32 : i32 to index
    %c0_34 = arith.constant 0 : index
    %c0_35 = arith.constant 0 : index
    %77 = vector.load %arg0[%76, %c0_34, %c0_35] : memref<8x8x256xf32, #tpu.memory_space<vmem>>, vector<1x8x256xf32>
    %78 = vector.shape_cast %77 : vector<1x8x256xf32> to vector<8x256xf32>
    %cst_36 = arith.constant dense<0.000000e+00> : vector<8x256xf32>
    %79 = tpu.matmul %51, %0, %cst_36 {dimension_numbers = #tpu.dot_dimension_numbers<[1], [0], [0], [1], [0, 0, 1, 1], [], []>} : vector<8x64xf32>, vector<64x256xf32>, vector<8x256xf32> -> vector<8x256xf32>
    %80 = arith.addf %78, %79 : vector<8x256xf32>
    %81 = vector.broadcast %1 : vector<1x256xf32> to vector<8x256xf32>
    %82 = arith.mulf %80, %81 : vector<8x256xf32>
    %83 = math.tanh %82 : vector<8x256xf32>
    %84 = vector.broadcast %1 : vector<1x256xf32> to vector<8x256xf32>
    %85 = arith.mulf %83, %84 : vector<8x256xf32>
    %86 = vector.broadcast %2 : vector<1x256xf32> to vector<8x256xf32>
    %87 = arith.addf %85, %86 : vector<8x256xf32>
    %88 = vector.extract_strided_slice %87 {offsets = [0, 0], sizes = [8, 64], strides = [1, 1]} : vector<8x256xf32> to vector<8x64xf32>
    %89 = vector.extract_strided_slice %87 {offsets = [0, 64], sizes = [8, 64], strides = [1, 1]} : vector<8x256xf32> to vector<8x64xf32>
    %90 = vector.extract_strided_slice %87 {offsets = [0, 128], sizes = [8, 64], strides = [1, 1]} : vector<8x256xf32> to vector<8x64xf32>
    %91 = vector.extract_strided_slice %87 {offsets = [0, 192], sizes = [8, 64], strides = [1, 1]} : vector<8x256xf32> to vector<8x64xf32>
    %92 = arith.mulf %89, %52 : vector<8x64xf32>
    %93 = arith.mulf %88, %90 : vector<8x64xf32>
    %94 = arith.addf %92, %93 : vector<8x64xf32>
    %95 = math.tanh %94 : vector<8x64xf32>
    %96 = arith.mulf %91, %95 : vector<8x64xf32>
    %97 = vector.broadcast %c1_i32_32 : i32 to vector<1x64xi32>
    %98 = arith.muli %14, %97 : vector<1x64xi32>
    %99 = arith.addi %9, %98 : vector<1x64xi32>
    %100 = vector.broadcast %99 : vector<1x64xi32> to vector<8x64xi32>
    %101 = vector.broadcast %3 : vector<8x1xi32> to vector<8x64xi32>
    %102 = arith.cmpi slt, %100, %101 : vector<8x64xi32>
    %103 = arith.select %102, %96, %51 : vector<8x64xi1>, vector<8x64xf32>
    %104 = arith.select %102, %94, %52 : vector<8x64xi1>, vector<8x64xf32>
    %cst_37 = arith.constant 0.000000e+00 : f32
    %105 = vector.broadcast %cst_37 : f32 to vector<8x64xf32>
    %106 = arith.select %102, %96, %105 : vector<8x64xi1>, vector<8x64xf32>
    %107 = arith.index_cast %c1_i32_32 : i32 to index
    %c0_38 = arith.constant 0 : index
    %c0_39 = arith.constant 0 : index
    %108 = vector.load %arg7[%107, %c0_38, %c0_39] : memref<8x8x128xf32, #tpu.memory_space<vmem>>, vector<1x8x128xf32>
    %109 = vector.shape_cast %108 : vector<1x8x128xf32> to vector<8x128xf32>
    %110 = vector.extract_strided_slice %106 {offsets = [0, 0], sizes = [8, 32], strides = [1, 1]} : vector<8x64xf32> to vector<8x32xf32>
    %cst_40 = arith.constant dense<0.000000e+00> : vector<8x128xf32>
    %111 = tpu.matmul %110, %15, %cst_40 {dimension_numbers = #tpu.dot_dimension_numbers<[1], [0], [0], [1], [0, 0, 1, 1], [], []>} : vector<8x32xf32>, vector<32x128xf32>, vector<8x128xf32> -> vector<8x128xf32>
    %112 = arith.addf %109, %111 : vector<8x128xf32>
    %113 = arith.index_cast %c1_i32_32 : i32 to index
    %c0_41 = arith.constant 0 : index
    %c0_42 = arith.constant 0 : index
    %114 = vector.load %arg7[%113, %c0_41, %c0_42] : memref<8x8x128xf32, #tpu.memory_space<vmem>>, vector<1x8x128xf32>
    %115 = vector.shape_cast %114 : vector<1x8x128xf32> to vector<8x128xf32>
    %116 = vector.shape_cast %112 : vector<8x128xf32> to vector<1x8x128xf32>
    tpu.vector_store %arg7[%113, %c0_41, %c0_42], %116 {strides = array<i32>} : memref<8x8x128xf32, #tpu.memory_space<vmem>>, vector<1x8x128xf32>,
    %117 = arith.index_cast %75 : i32 to index
    %c0_43 = arith.constant 0 : index
    %c0_44 = arith.constant 0 : index
    %118 = vector.load %arg7[%117, %c0_43, %c0_44] : memref<8x8x128xf32, #tpu.memory_space<vmem>>, vector<1x8x128xf32>
    %119 = vector.shape_cast %118 : vector<1x8x128xf32> to vector<8x128xf32>
    %120 = vector.extract_strided_slice %106 {offsets = [0, 32], sizes = [8, 32], strides = [1, 1]} : vector<8x64xf32> to vector<8x32xf32>
    %cst_45 = arith.constant dense<0.000000e+00> : vector<8x128xf32>
    %121 = tpu.matmul %120, %16, %cst_45 {dimension_numbers = #tpu.dot_dimension_numbers<[1], [0], [0], [1], [0, 0, 1, 1], [], []>} : vector<8x32xf32>, vector<32x128xf32>, vector<8x128xf32> -> vector<8x128xf32>
    %122 = arith.addf %119, %121 : vector<8x128xf32>
    %123 = arith.index_cast %75 : i32 to index
    %c0_46 = arith.constant 0 : index
    %c0_47 = arith.constant 0 : index
    %124 = vector.load %arg7[%123, %c0_46, %c0_47] : memref<8x8x128xf32, #tpu.memory_space<vmem>>, vector<1x8x128xf32>
    %125 = vector.shape_cast %124 : vector<1x8x128xf32> to vector<8x128xf32>
    %126 = vector.shape_cast %122 : vector<8x128xf32> to vector<1x8x128xf32>
    tpu.vector_store %arg7[%123, %c0_46, %c0_47], %126 {strides = array<i32>} : memref<8x8x128xf32, #tpu.memory_space<vmem>>, vector<1x8x128xf32>,
    %c2_i32 = arith.constant 2 : i32
    %c7_i32_48 = arith.constant 7 : i32
    %127 = arith.subi %c7_i32_48, %c2_i32 : i32
    %128 = arith.index_cast %c2_i32 : i32 to index
    %c0_49 = arith.constant 0 : index
    %c0_50 = arith.constant 0 : index
    %129 = vector.load %arg0[%128, %c0_49, %c0_50] : memref<8x8x256xf32, #tpu.memory_space<vmem>>, vector<1x8x256xf32>
    %130 = vector.shape_cast %129 : vector<1x8x256xf32> to vector<8x256xf32>
    %cst_51 = arith.constant dense<0.000000e+00> : vector<8x256xf32>
    %131 = tpu.matmul %103, %0, %cst_51 {dimension_numbers = #tpu.dot_dimension_numbers<[1], [0], [0], [1], [0, 0, 1, 1], [], []>} : vector<8x64xf32>, vector<64x256xf32>, vector<8x256xf32> -> vector<8x256xf32>
    %132 = arith.addf %130, %131 : vector<8x256xf32>
    %133 = vector.broadcast %1 : vector<1x256xf32> to vector<8x256xf32>
    %134 = arith.mulf %132, %133 : vector<8x256xf32>
    %135 = math.tanh %134 : vector<8x256xf32>
    %136 = vector.broadcast %1 : vector<1x256xf32> to vector<8x256xf32>
    %137 = arith.mulf %135, %136 : vector<8x256xf32>
    %138 = vector.broadcast %2 : vector<1x256xf32> to vector<8x256xf32>
    %139 = arith.addf %137, %138 : vector<8x256xf32>
    %140 = vector.extract_strided_slice %139 {offsets = [0, 0], sizes = [8, 64], strides = [1, 1]} : vector<8x256xf32> to vector<8x64xf32>
    %141 = vector.extract_strided_slice %139 {offsets = [0, 64], sizes = [8, 64], strides = [1, 1]} : vector<8x256xf32> to vector<8x64xf32>
    %142 = vector.extract_strided_slice %139 {offsets = [0, 128], sizes = [8, 64], strides = [1, 1]} : vector<8x256xf32> to vector<8x64xf32>
    %143 = vector.extract_strided_slice %139 {offsets = [0, 192], sizes = [8, 64], strides = [1, 1]} : vector<8x256xf32> to vector<8x64xf32>
    %144 = arith.mulf %141, %104 : vector<8x64xf32>
    %145 = arith.mulf %140, %142 : vector<8x64xf32>
    %146 = arith.addf %144, %145 : vector<8x64xf32>
    %147 = math.tanh %146 : vector<8x64xf32>
    %148 = arith.mulf %143, %147 : vector<8x64xf32>
    %149 = vector.broadcast %c2_i32 : i32 to vector<1x64xi32>
    %150 = arith.muli %14, %149 : vector<1x64xi32>
    %151 = arith.addi %9, %150 : vector<1x64xi32>
    %152 = vector.broadcast %151 : vector<1x64xi32> to vector<8x64xi32>
    %153 = vector.broadcast %3 : vector<8x1xi32> to vector<8x64xi32>
    %154 = arith.cmpi slt, %152, %153 : vector<8x64xi32>
    %155 = arith.select %154, %148, %103 : vector<8x64xi1>, vector<8x64xf32>
    %156 = arith.select %154, %146, %104 : vector<8x64xi1>, vector<8x64xf32>
    %cst_52 = arith.constant 0.000000e+00 : f32
    %157 = vector.broadcast %cst_52 : f32 to vector<8x64xf32>
    %158 = arith.select %154, %148, %157 : vector<8x64xi1>, vector<8x64xf32>
    %159 = arith.index_cast %c2_i32 : i32 to index
    %c0_53 = arith.constant 0 : index
    %c0_54 = arith.constant 0 : index
    %160 = vector.load %arg7[%159, %c0_53, %c0_54] : memref<8x8x128xf32, #tpu.memory_space<vmem>>, vector<1x8x128xf32>
    %161 = vector.shape_cast %160 : vector<1x8x128xf32> to vector<8x128xf32>
    %162 = vector.extract_strided_slice %158 {offsets = [0, 0], sizes = [8, 32], strides = [1, 1]} : vector<8x64xf32> to vector<8x32xf32>
    %cst_55 = arith.constant dense<0.000000e+00> : vector<8x128xf32>
    %163 = tpu.matmul %162, %15, %cst_55 {dimension_numbers = #tpu.dot_dimension_numbers<[1], [0], [0], [1], [0, 0, 1, 1], [], []>} : vector<8x32xf32>, vector<32x128xf32>, vector<8x128xf32> -> vector<8x128xf32>
    %164 = arith.addf %161, %163 : vector<8x128xf32>
    %165 = arith.index_cast %c2_i32 : i32 to index
    %c0_56 = arith.constant 0 : index
    %c0_57 = arith.constant 0 : index
    %166 = vector.load %arg7[%165, %c0_56, %c0_57] : memref<8x8x128xf32, #tpu.memory_space<vmem>>, vector<1x8x128xf32>
    %167 = vector.shape_cast %166 : vector<1x8x128xf32> to vector<8x128xf32>
    %168 = vector.shape_cast %164 : vector<8x128xf32> to vector<1x8x128xf32>
    tpu.vector_store %arg7[%165, %c0_56, %c0_57], %168 {strides = array<i32>} : memref<8x8x128xf32, #tpu.memory_space<vmem>>, vector<1x8x128xf32>,
    %169 = arith.index_cast %127 : i32 to index
    %c0_58 = arith.constant 0 : index
    %c0_59 = arith.constant 0 : index
    %170 = vector.load %arg7[%169, %c0_58, %c0_59] : memref<8x8x128xf32, #tpu.memory_space<vmem>>, vector<1x8x128xf32>
    %171 = vector.shape_cast %170 : vector<1x8x128xf32> to vector<8x128xf32>
    %172 = vector.extract_strided_slice %158 {offsets = [0, 32], sizes = [8, 32], strides = [1, 1]} : vector<8x64xf32> to vector<8x32xf32>
    %cst_60 = arith.constant dense<0.000000e+00> : vector<8x128xf32>
    %173 = tpu.matmul %172, %16, %cst_60 {dimension_numbers = #tpu.dot_dimension_numbers<[1], [0], [0], [1], [0, 0, 1, 1], [], []>} : vector<8x32xf32>, vector<32x128xf32>, vector<8x128xf32> -> vector<8x128xf32>
    %174 = arith.addf %171, %173 : vector<8x128xf32>
    %175 = arith.index_cast %127 : i32 to index
    %c0_61 = arith.constant 0 : index
    %c0_62 = arith.constant 0 : index
    %176 = vector.load %arg7[%175, %c0_61, %c0_62] : memref<8x8x128xf32, #tpu.memory_space<vmem>>, vector<1x8x128xf32>
    %177 = vector.shape_cast %176 : vector<1x8x128xf32> to vector<8x128xf32>
    %178 = vector.shape_cast %174 : vector<8x128xf32> to vector<1x8x128xf32>
    tpu.vector_store %arg7[%175, %c0_61, %c0_62], %178 {strides = array<i32>} : memref<8x8x128xf32, #tpu.memory_space<vmem>>, vector<1x8x128xf32>,
    %c3_i32 = arith.constant 3 : i32
    %c7_i32_63 = arith.constant 7 : i32
    %179 = arith.subi %c7_i32_63, %c3_i32 : i32
    %180 = arith.index_cast %c3_i32 : i32 to index
    %c0_64 = arith.constant 0 : index
    %c0_65 = arith.constant 0 : index
    %181 = vector.load %arg0[%180, %c0_64, %c0_65] : memref<8x8x256xf32, #tpu.memory_space<vmem>>, vector<1x8x256xf32>
    %182 = vector.shape_cast %181 : vector<1x8x256xf32> to vector<8x256xf32>
    %cst_66 = arith.constant dense<0.000000e+00> : vector<8x256xf32>
    %183 = tpu.matmul %155, %0, %cst_66 {dimension_numbers = #tpu.dot_dimension_numbers<[1], [0], [0], [1], [0, 0, 1, 1], [], []>} : vector<8x64xf32>, vector<64x256xf32>, vector<8x256xf32> -> vector<8x256xf32>
    %184 = arith.addf %182, %183 : vector<8x256xf32>
    %185 = vector.broadcast %1 : vector<1x256xf32> to vector<8x256xf32>
    %186 = arith.mulf %184, %185 : vector<8x256xf32>
    %187 = math.tanh %186 : vector<8x256xf32>
    %188 = vector.broadcast %1 : vector<1x256xf32> to vector<8x256xf32>
    %189 = arith.mulf %187, %188 : vector<8x256xf32>
    %190 = vector.broadcast %2 : vector<1x256xf32> to vector<8x256xf32>
    %191 = arith.addf %189, %190 : vector<8x256xf32>
    %192 = vector.extract_strided_slice %191 {offsets = [0, 0], sizes = [8, 64], strides = [1, 1]} : vector<8x256xf32> to vector<8x64xf32>
    %193 = vector.extract_strided_slice %191 {offsets = [0, 64], sizes = [8, 64], strides = [1, 1]} : vector<8x256xf32> to vector<8x64xf32>
    %194 = vector.extract_strided_slice %191 {offsets = [0, 128], sizes = [8, 64], strides = [1, 1]} : vector<8x256xf32> to vector<8x64xf32>
    %195 = vector.extract_strided_slice %191 {offsets = [0, 192], sizes = [8, 64], strides = [1, 1]} : vector<8x256xf32> to vector<8x64xf32>
    %196 = arith.mulf %193, %156 : vector<8x64xf32>
    %197 = arith.mulf %192, %194 : vector<8x64xf32>
    %198 = arith.addf %196, %197 : vector<8x64xf32>
    %199 = math.tanh %198 : vector<8x64xf32>
    %200 = arith.mulf %195, %199 : vector<8x64xf32>
    %201 = vector.broadcast %c3_i32 : i32 to vector<1x64xi32>
    %202 = arith.muli %14, %201 : vector<1x64xi32>
    %203 = arith.addi %9, %202 : vector<1x64xi32>
    %204 = vector.broadcast %203 : vector<1x64xi32> to vector<8x64xi32>
    %205 = vector.broadcast %3 : vector<8x1xi32> to vector<8x64xi32>
    %206 = arith.cmpi slt, %204, %205 : vector<8x64xi32>
    %207 = arith.select %206, %200, %155 : vector<8x64xi1>, vector<8x64xf32>
    %208 = arith.select %206, %198, %156 : vector<8x64xi1>, vector<8x64xf32>
    %cst_67 = arith.constant 0.000000e+00 : f32
    %209 = vector.broadcast %cst_67 : f32 to vector<8x64xf32>
    %210 = arith.select %206, %200, %209 : vector<8x64xi1>, vector<8x64xf32>
    %211 = arith.index_cast %c3_i32 : i32 to index
    %c0_68 = arith.constant 0 : index
    %c0_69 = arith.constant 0 : index
    %212 = vector.load %arg7[%211, %c0_68, %c0_69] : memref<8x8x128xf32, #tpu.memory_space<vmem>>, vector<1x8x128xf32>
    %213 = vector.shape_cast %212 : vector<1x8x128xf32> to vector<8x128xf32>
    %214 = vector.extract_strided_slice %210 {offsets = [0, 0], sizes = [8, 32], strides = [1, 1]} : vector<8x64xf32> to vector<8x32xf32>
    %cst_70 = arith.constant dense<0.000000e+00> : vector<8x128xf32>
    %215 = tpu.matmul %214, %15, %cst_70 {dimension_numbers = #tpu.dot_dimension_numbers<[1], [0], [0], [1], [0, 0, 1, 1], [], []>} : vector<8x32xf32>, vector<32x128xf32>, vector<8x128xf32> -> vector<8x128xf32>
    %216 = arith.addf %213, %215 : vector<8x128xf32>
    %217 = arith.index_cast %c3_i32 : i32 to index
    %c0_71 = arith.constant 0 : index
    %c0_72 = arith.constant 0 : index
    %218 = vector.load %arg7[%217, %c0_71, %c0_72] : memref<8x8x128xf32, #tpu.memory_space<vmem>>, vector<1x8x128xf32>
    %219 = vector.shape_cast %218 : vector<1x8x128xf32> to vector<8x128xf32>
    %220 = vector.shape_cast %216 : vector<8x128xf32> to vector<1x8x128xf32>
    tpu.vector_store %arg7[%217, %c0_71, %c0_72], %220 {strides = array<i32>} : memref<8x8x128xf32, #tpu.memory_space<vmem>>, vector<1x8x128xf32>,
    %221 = arith.index_cast %179 : i32 to index
    %c0_73 = arith.constant 0 : index
    %c0_74 = arith.constant 0 : index
    %222 = vector.load %arg7[%221, %c0_73, %c0_74] : memref<8x8x128xf32, #tpu.memory_space<vmem>>, vector<1x8x128xf32>
    %223 = vector.shape_cast %222 : vector<1x8x128xf32> to vector<8x128xf32>
    %224 = vector.extract_strided_slice %210 {offsets = [0, 32], sizes = [8, 32], strides = [1, 1]} : vector<8x64xf32> to vector<8x32xf32>
    %cst_75 = arith.constant dense<0.000000e+00> : vector<8x128xf32>
    %225 = tpu.matmul %224, %16, %cst_75 {dimension_numbers = #tpu.dot_dimension_numbers<[1], [0], [0], [1], [0, 0, 1, 1], [], []>} : vector<8x32xf32>, vector<32x128xf32>, vector<8x128xf32> -> vector<8x128xf32>
    %226 = arith.addf %223, %225 : vector<8x128xf32>
    %227 = arith.index_cast %179 : i32 to index
    %c0_76 = arith.constant 0 : index
    %c0_77 = arith.constant 0 : index
    %228 = vector.load %arg7[%227, %c0_76, %c0_77] : memref<8x8x128xf32, #tpu.memory_space<vmem>>, vector<1x8x128xf32>
    %229 = vector.shape_cast %228 : vector<1x8x128xf32> to vector<8x128xf32>
    %230 = vector.shape_cast %226 : vector<8x128xf32> to vector<1x8x128xf32>
    tpu.vector_store %arg7[%227, %c0_76, %c0_77], %230 {strides = array<i32>} : memref<8x8x128xf32, #tpu.memory_space<vmem>>, vector<1x8x128xf32>,
    %c4_i32 = arith.constant 4 : i32
    %c7_i32_78 = arith.constant 7 : i32
    %231 = arith.subi %c7_i32_78, %c4_i32 : i32
    %232 = arith.index_cast %c4_i32 : i32 to index
    %c0_79 = arith.constant 0 : index
    %c0_80 = arith.constant 0 : index
    %233 = vector.load %arg0[%232, %c0_79, %c0_80] : memref<8x8x256xf32, #tpu.memory_space<vmem>>, vector<1x8x256xf32>
    %234 = vector.shape_cast %233 : vector<1x8x256xf32> to vector<8x256xf32>
    %cst_81 = arith.constant dense<0.000000e+00> : vector<8x256xf32>
    %235 = tpu.matmul %207, %0, %cst_81 {dimension_numbers = #tpu.dot_dimension_numbers<[1], [0], [0], [1], [0, 0, 1, 1], [], []>} : vector<8x64xf32>, vector<64x256xf32>, vector<8x256xf32> -> vector<8x256xf32>
    %236 = arith.addf %234, %235 : vector<8x256xf32>
    %237 = vector.broadcast %1 : vector<1x256xf32> to vector<8x256xf32>
    %238 = arith.mulf %236, %237 : vector<8x256xf32>
    %239 = math.tanh %238 : vector<8x256xf32>
    %240 = vector.broadcast %1 : vector<1x256xf32> to vector<8x256xf32>
    %241 = arith.mulf %239, %240 : vector<8x256xf32>
    %242 = vector.broadcast %2 : vector<1x256xf32> to vector<8x256xf32>
    %243 = arith.addf %241, %242 : vector<8x256xf32>
    %244 = vector.extract_strided_slice %243 {offsets = [0, 0], sizes = [8, 64], strides = [1, 1]} : vector<8x256xf32> to vector<8x64xf32>
    %245 = vector.extract_strided_slice %243 {offsets = [0, 64], sizes = [8, 64], strides = [1, 1]} : vector<8x256xf32> to vector<8x64xf32>
    %246 = vector.extract_strided_slice %243 {offsets = [0, 128], sizes = [8, 64], strides = [1, 1]} : vector<8x256xf32> to vector<8x64xf32>
    %247 = vector.extract_strided_slice %243 {offsets = [0, 192], sizes = [8, 64], strides = [1, 1]} : vector<8x256xf32> to vector<8x64xf32>
    %248 = arith.mulf %245, %208 : vector<8x64xf32>
    %249 = arith.mulf %244, %246 : vector<8x64xf32>
    %250 = arith.addf %248, %249 : vector<8x64xf32>
    %251 = math.tanh %250 : vector<8x64xf32>
    %252 = arith.mulf %247, %251 : vector<8x64xf32>
    %253 = vector.broadcast %c4_i32 : i32 to vector<1x64xi32>
    %254 = arith.muli %14, %253 : vector<1x64xi32>
    %255 = arith.addi %9, %254 : vector<1x64xi32>
    %256 = vector.broadcast %255 : vector<1x64xi32> to vector<8x64xi32>
    %257 = vector.broadcast %3 : vector<8x1xi32> to vector<8x64xi32>
    %258 = arith.cmpi slt, %256, %257 : vector<8x64xi32>
    %259 = arith.select %258, %252, %207 : vector<8x64xi1>, vector<8x64xf32>
    %260 = arith.select %258, %250, %208 : vector<8x64xi1>, vector<8x64xf32>
    %cst_82 = arith.constant 0.000000e+00 : f32
    %261 = vector.broadcast %cst_82 : f32 to vector<8x64xf32>
    %262 = arith.select %258, %252, %261 : vector<8x64xi1>, vector<8x64xf32>
    %263 = arith.index_cast %c4_i32 : i32 to index
    %c0_83 = arith.constant 0 : index
    %c0_84 = arith.constant 0 : index
    %264 = vector.load %arg7[%263, %c0_83, %c0_84] : memref<8x8x128xf32, #tpu.memory_space<vmem>>, vector<1x8x128xf32>
    %265 = vector.shape_cast %264 : vector<1x8x128xf32> to vector<8x128xf32>
    %266 = vector.extract_strided_slice %262 {offsets = [0, 0], sizes = [8, 32], strides = [1, 1]} : vector<8x64xf32> to vector<8x32xf32>
    %cst_85 = arith.constant dense<0.000000e+00> : vector<8x128xf32>
    %267 = tpu.matmul %266, %15, %cst_85 {dimension_numbers = #tpu.dot_dimension_numbers<[1], [0], [0], [1], [0, 0, 1, 1], [], []>} : vector<8x32xf32>, vector<32x128xf32>, vector<8x128xf32> -> vector<8x128xf32>
    %268 = arith.addf %265, %267 : vector<8x128xf32>
    %269 = arith.index_cast %c4_i32 : i32 to index
    %c0_86 = arith.constant 0 : index
    %c0_87 = arith.constant 0 : index
    %270 = vector.load %arg7[%269, %c0_86, %c0_87] : memref<8x8x128xf32, #tpu.memory_space<vmem>>, vector<1x8x128xf32>
    %271 = vector.shape_cast %270 : vector<1x8x128xf32> to vector<8x128xf32>
    %272 = vector.shape_cast %268 : vector<8x128xf32> to vector<1x8x128xf32>
    tpu.vector_store %arg7[%269, %c0_86, %c0_87], %272 {strides = array<i32>} : memref<8x8x128xf32, #tpu.memory_space<vmem>>, vector<1x8x128xf32>,
    %273 = arith.index_cast %231 : i32 to index
    %c0_88 = arith.constant 0 : index
    %c0_89 = arith.constant 0 : index
    %274 = vector.load %arg7[%273, %c0_88, %c0_89] : memref<8x8x128xf32, #tpu.memory_space<vmem>>, vector<1x8x128xf32>
    %275 = vector.shape_cast %274 : vector<1x8x128xf32> to vector<8x128xf32>
    %276 = vector.extract_strided_slice %262 {offsets = [0, 32], sizes = [8, 32], strides = [1, 1]} : vector<8x64xf32> to vector<8x32xf32>
    %cst_90 = arith.constant dense<0.000000e+00> : vector<8x128xf32>
    %277 = tpu.matmul %276, %16, %cst_90 {dimension_numbers = #tpu.dot_dimension_numbers<[1], [0], [0], [1], [0, 0, 1, 1], [], []>} : vector<8x32xf32>, vector<32x128xf32>, vector<8x128xf32> -> vector<8x128xf32>
    %278 = arith.addf %275, %277 : vector<8x128xf32>
    %279 = arith.index_cast %231 : i32 to index
    %c0_91 = arith.constant 0 : index
    %c0_92 = arith.constant 0 : index
    %280 = vector.load %arg7[%279, %c0_91, %c0_92] : memref<8x8x128xf32, #tpu.memory_space<vmem>>, vector<1x8x128xf32>
    %281 = vector.shape_cast %280 : vector<1x8x128xf32> to vector<8x128xf32>
    %282 = vector.shape_cast %278 : vector<8x128xf32> to vector<1x8x128xf32>
    tpu.vector_store %arg7[%279, %c0_91, %c0_92], %282 {strides = array<i32>} : memref<8x8x128xf32, #tpu.memory_space<vmem>>, vector<1x8x128xf32>,
    %c5_i32 = arith.constant 5 : i32
    %c7_i32_93 = arith.constant 7 : i32
    %283 = arith.subi %c7_i32_93, %c5_i32 : i32
    %284 = arith.index_cast %c5_i32 : i32 to index
    %c0_94 = arith.constant 0 : index
    %c0_95 = arith.constant 0 : index
    %285 = vector.load %arg0[%284, %c0_94, %c0_95] : memref<8x8x256xf32, #tpu.memory_space<vmem>>, vector<1x8x256xf32>
    %286 = vector.shape_cast %285 : vector<1x8x256xf32> to vector<8x256xf32>
    %cst_96 = arith.constant dense<0.000000e+00> : vector<8x256xf32>
    %287 = tpu.matmul %259, %0, %cst_96 {dimension_numbers = #tpu.dot_dimension_numbers<[1], [0], [0], [1], [0, 0, 1, 1], [], []>} : vector<8x64xf32>, vector<64x256xf32>, vector<8x256xf32> -> vector<8x256xf32>
    %288 = arith.addf %286, %287 : vector<8x256xf32>
    %289 = vector.broadcast %1 : vector<1x256xf32> to vector<8x256xf32>
    %290 = arith.mulf %288, %289 : vector<8x256xf32>
    %291 = math.tanh %290 : vector<8x256xf32>
    %292 = vector.broadcast %1 : vector<1x256xf32> to vector<8x256xf32>
    %293 = arith.mulf %291, %292 : vector<8x256xf32>
    %294 = vector.broadcast %2 : vector<1x256xf32> to vector<8x256xf32>
    %295 = arith.addf %293, %294 : vector<8x256xf32>
    %296 = vector.extract_strided_slice %295 {offsets = [0, 0], sizes = [8, 64], strides = [1, 1]} : vector<8x256xf32> to vector<8x64xf32>
    %297 = vector.extract_strided_slice %295 {offsets = [0, 64], sizes = [8, 64], strides = [1, 1]} : vector<8x256xf32> to vector<8x64xf32>
    %298 = vector.extract_strided_slice %295 {offsets = [0, 128], sizes = [8, 64], strides = [1, 1]} : vector<8x256xf32> to vector<8x64xf32>
    %299 = vector.extract_strided_slice %295 {offsets = [0, 192], sizes = [8, 64], strides = [1, 1]} : vector<8x256xf32> to vector<8x64xf32>
    %300 = arith.mulf %297, %260 : vector<8x64xf32>
    %301 = arith.mulf %296, %298 : vector<8x64xf32>
    %302 = arith.addf %300, %301 : vector<8x64xf32>
    %303 = math.tanh %302 : vector<8x64xf32>
    %304 = arith.mulf %299, %303 : vector<8x64xf32>
    %305 = vector.broadcast %c5_i32 : i32 to vector<1x64xi32>
    %306 = arith.muli %14, %305 : vector<1x64xi32>
    %307 = arith.addi %9, %306 : vector<1x64xi32>
    %308 = vector.broadcast %307 : vector<1x64xi32> to vector<8x64xi32>
    %309 = vector.broadcast %3 : vector<8x1xi32> to vector<8x64xi32>
    %310 = arith.cmpi slt, %308, %309 : vector<8x64xi32>
    %311 = arith.select %310, %304, %259 : vector<8x64xi1>, vector<8x64xf32>
    %312 = arith.select %310, %302, %260 : vector<8x64xi1>, vector<8x64xf32>
    %cst_97 = arith.constant 0.000000e+00 : f32
    %313 = vector.broadcast %cst_97 : f32 to vector<8x64xf32>
    %314 = arith.select %310, %304, %313 : vector<8x64xi1>, vector<8x64xf32>
    %315 = arith.index_cast %c5_i32 : i32 to index
    %c0_98 = arith.constant 0 : index
    %c0_99 = arith.constant 0 : index
    %316 = vector.load %arg7[%315, %c0_98, %c0_99] : memref<8x8x128xf32, #tpu.memory_space<vmem>>, vector<1x8x128xf32>
    %317 = vector.shape_cast %316 : vector<1x8x128xf32> to vector<8x128xf32>
    %318 = vector.extract_strided_slice %314 {offsets = [0, 0], sizes = [8, 32], strides = [1, 1]} : vector<8x64xf32> to vector<8x32xf32>
    %cst_100 = arith.constant dense<0.000000e+00> : vector<8x128xf32>
    %319 = tpu.matmul %318, %15, %cst_100 {dimension_numbers = #tpu.dot_dimension_numbers<[1], [0], [0], [1], [0, 0, 1, 1], [], []>} : vector<8x32xf32>, vector<32x128xf32>, vector<8x128xf32> -> vector<8x128xf32>
    %320 = arith.addf %317, %319 : vector<8x128xf32>
    %321 = arith.index_cast %c5_i32 : i32 to index
    %c0_101 = arith.constant 0 : index
    %c0_102 = arith.constant 0 : index
    %322 = vector.load %arg7[%321, %c0_101, %c0_102] : memref<8x8x128xf32, #tpu.memory_space<vmem>>, vector<1x8x128xf32>
    %323 = vector.shape_cast %322 : vector<1x8x128xf32> to vector<8x128xf32>
    %324 = vector.shape_cast %320 : vector<8x128xf32> to vector<1x8x128xf32>
    tpu.vector_store %arg7[%321, %c0_101, %c0_102], %324 {strides = array<i32>} : memref<8x8x128xf32, #tpu.memory_space<vmem>>, vector<1x8x128xf32>,
    %325 = arith.index_cast %283 : i32 to index
    %c0_103 = arith.constant 0 : index
    %c0_104 = arith.constant 0 : index
    %326 = vector.load %arg7[%325, %c0_103, %c0_104] : memref<8x8x128xf32, #tpu.memory_space<vmem>>, vector<1x8x128xf32>
    %327 = vector.shape_cast %326 : vector<1x8x128xf32> to vector<8x128xf32>
    %328 = vector.extract_strided_slice %314 {offsets = [0, 32], sizes = [8, 32], strides = [1, 1]} : vector<8x64xf32> to vector<8x32xf32>
    %cst_105 = arith.constant dense<0.000000e+00> : vector<8x128xf32>
    %329 = tpu.matmul %328, %16, %cst_105 {dimension_numbers = #tpu.dot_dimension_numbers<[1], [0], [0], [1], [0, 0, 1, 1], [], []>} : vector<8x32xf32>, vector<32x128xf32>, vector<8x128xf32> -> vector<8x128xf32>
    %330 = arith.addf %327, %329 : vector<8x128xf32>
    %331 = arith.index_cast %283 : i32 to index
    %c0_106 = arith.constant 0 : index
    %c0_107 = arith.constant 0 : index
    %332 = vector.load %arg7[%331, %c0_106, %c0_107] : memref<8x8x128xf32, #tpu.memory_space<vmem>>, vector<1x8x128xf32>
    %333 = vector.shape_cast %332 : vector<1x8x128xf32> to vector<8x128xf32>
    %334 = vector.shape_cast %330 : vector<8x128xf32> to vector<1x8x128xf32>
    tpu.vector_store %arg7[%331, %c0_106, %c0_107], %334 {strides = array<i32>} : memref<8x8x128xf32, #tpu.memory_space<vmem>>, vector<1x8x128xf32>,
    %c6_i32 = arith.constant 6 : i32
    %c7_i32_108 = arith.constant 7 : i32
    %335 = arith.subi %c7_i32_108, %c6_i32 : i32
    %336 = arith.index_cast %c6_i32 : i32 to index
    %c0_109 = arith.constant 0 : index
    %c0_110 = arith.constant 0 : index
    %337 = vector.load %arg0[%336, %c0_109, %c0_110] : memref<8x8x256xf32, #tpu.memory_space<vmem>>, vector<1x8x256xf32>
    %338 = vector.shape_cast %337 : vector<1x8x256xf32> to vector<8x256xf32>
    %cst_111 = arith.constant dense<0.000000e+00> : vector<8x256xf32>
    %339 = tpu.matmul %311, %0, %cst_111 {dimension_numbers = #tpu.dot_dimension_numbers<[1], [0], [0], [1], [0, 0, 1, 1], [], []>} : vector<8x64xf32>, vector<64x256xf32>, vector<8x256xf32> -> vector<8x256xf32>
    %340 = arith.addf %338, %339 : vector<8x256xf32>
    %341 = vector.broadcast %1 : vector<1x256xf32> to vector<8x256xf32>
    %342 = arith.mulf %340, %341 : vector<8x256xf32>
    %343 = math.tanh %342 : vector<8x256xf32>
    %344 = vector.broadcast %1 : vector<1x256xf32> to vector<8x256xf32>
    %345 = arith.mulf %343, %344 : vector<8x256xf32>
    %346 = vector.broadcast %2 : vector<1x256xf32> to vector<8x256xf32>
    %347 = arith.addf %345, %346 : vector<8x256xf32>
    %348 = vector.extract_strided_slice %347 {offsets = [0, 0], sizes = [8, 64], strides = [1, 1]} : vector<8x256xf32> to vector<8x64xf32>
    %349 = vector.extract_strided_slice %347 {offsets = [0, 64], sizes = [8, 64], strides = [1, 1]} : vector<8x256xf32> to vector<8x64xf32>
    %350 = vector.extract_strided_slice %347 {offsets = [0, 128], sizes = [8, 64], strides = [1, 1]} : vector<8x256xf32> to vector<8x64xf32>
    %351 = vector.extract_strided_slice %347 {offsets = [0, 192], sizes = [8, 64], strides = [1, 1]} : vector<8x256xf32> to vector<8x64xf32>
    %352 = arith.mulf %349, %312 : vector<8x64xf32>
    %353 = arith.mulf %348, %350 : vector<8x64xf32>
    %354 = arith.addf %352, %353 : vector<8x64xf32>
    %355 = math.tanh %354 : vector<8x64xf32>
    %356 = arith.mulf %351, %355 : vector<8x64xf32>
    %357 = vector.broadcast %c6_i32 : i32 to vector<1x64xi32>
    %358 = arith.muli %14, %357 : vector<1x64xi32>
    %359 = arith.addi %9, %358 : vector<1x64xi32>
    %360 = vector.broadcast %359 : vector<1x64xi32> to vector<8x64xi32>
    %361 = vector.broadcast %3 : vector<8x1xi32> to vector<8x64xi32>
    %362 = arith.cmpi slt, %360, %361 : vector<8x64xi32>
    %363 = arith.select %362, %356, %311 : vector<8x64xi1>, vector<8x64xf32>
    %364 = arith.select %362, %354, %312 : vector<8x64xi1>, vector<8x64xf32>
    %cst_112 = arith.constant 0.000000e+00 : f32
    %365 = vector.broadcast %cst_112 : f32 to vector<8x64xf32>
    %366 = arith.select %362, %356, %365 : vector<8x64xi1>, vector<8x64xf32>
    %367 = arith.index_cast %c6_i32 : i32 to index
    %c0_113 = arith.constant 0 : index
    %c0_114 = arith.constant 0 : index
    %368 = vector.load %arg7[%367, %c0_113, %c0_114] : memref<8x8x128xf32, #tpu.memory_space<vmem>>, vector<1x8x128xf32>
    %369 = vector.shape_cast %368 : vector<1x8x128xf32> to vector<8x128xf32>
    %370 = vector.extract_strided_slice %366 {offsets = [0, 0], sizes = [8, 32], strides = [1, 1]} : vector<8x64xf32> to vector<8x32xf32>
    %cst_115 = arith.constant dense<0.000000e+00> : vector<8x128xf32>
    %371 = tpu.matmul %370, %15, %cst_115 {dimension_numbers = #tpu.dot_dimension_numbers<[1], [0], [0], [1], [0, 0, 1, 1], [], []>} : vector<8x32xf32>, vector<32x128xf32>, vector<8x128xf32> -> vector<8x128xf32>
    %372 = arith.addf %369, %371 : vector<8x128xf32>
    %373 = arith.index_cast %c6_i32 : i32 to index
    %c0_116 = arith.constant 0 : index
    %c0_117 = arith.constant 0 : index
    %374 = vector.load %arg7[%373, %c0_116, %c0_117] : memref<8x8x128xf32, #tpu.memory_space<vmem>>, vector<1x8x128xf32>
    %375 = vector.shape_cast %374 : vector<1x8x128xf32> to vector<8x128xf32>
    %376 = vector.shape_cast %372 : vector<8x128xf32> to vector<1x8x128xf32>
    tpu.vector_store %arg7[%373, %c0_116, %c0_117], %376 {strides = array<i32>} : memref<8x8x128xf32, #tpu.memory_space<vmem>>, vector<1x8x128xf32>,
    %377 = arith.index_cast %335 : i32 to index
    %c0_118 = arith.constant 0 : index
    %c0_119 = arith.constant 0 : index
    %378 = vector.load %arg7[%377, %c0_118, %c0_119] : memref<8x8x128xf32, #tpu.memory_space<vmem>>, vector<1x8x128xf32>
    %379 = vector.shape_cast %378 : vector<1x8x128xf32> to vector<8x128xf32>
    %380 = vector.extract_strided_slice %366 {offsets = [0, 32], sizes = [8, 32], strides = [1, 1]} : vector<8x64xf32> to vector<8x32xf32>
    %cst_120 = arith.constant dense<0.000000e+00> : vector<8x128xf32>
    %381 = tpu.matmul %380, %16, %cst_120 {dimension_numbers = #tpu.dot_dimension_numbers<[1], [0], [0], [1], [0, 0, 1, 1], [], []>} : vector<8x32xf32>, vector<32x128xf32>, vector<8x128xf32> -> vector<8x128xf32>
    %382 = arith.addf %379, %381 : vector<8x128xf32>
    %383 = arith.index_cast %335 : i32 to index
    %c0_121 = arith.constant 0 : index
    %c0_122 = arith.constant 0 : index
    %384 = vector.load %arg7[%383, %c0_121, %c0_122] : memref<8x8x128xf32, #tpu.memory_space<vmem>>, vector<1x8x128xf32>
    %385 = vector.shape_cast %384 : vector<1x8x128xf32> to vector<8x128xf32>
    %386 = vector.shape_cast %382 : vector<8x128xf32> to vector<1x8x128xf32>
    tpu.vector_store %arg7[%383, %c0_121, %c0_122], %386 {strides = array<i32>} : memref<8x8x128xf32, #tpu.memory_space<vmem>>, vector<1x8x128xf32>,
    %c7_i32_123 = arith.constant 7 : i32
    %c7_i32_124 = arith.constant 7 : i32
    %387 = arith.subi %c7_i32_124, %c7_i32_123 : i32
    %388 = arith.index_cast %c7_i32_123 : i32 to index
    %c0_125 = arith.constant 0 : index
    %c0_126 = arith.constant 0 : index
    %389 = vector.load %arg0[%388, %c0_125, %c0_126] : memref<8x8x256xf32, #tpu.memory_space<vmem>>, vector<1x8x256xf32>
    %390 = vector.shape_cast %389 : vector<1x8x256xf32> to vector<8x256xf32>
    %cst_127 = arith.constant dense<0.000000e+00> : vector<8x256xf32>
    %391 = tpu.matmul %363, %0, %cst_127 {dimension_numbers = #tpu.dot_dimension_numbers<[1], [0], [0], [1], [0, 0, 1, 1], [], []>} : vector<8x64xf32>, vector<64x256xf32>, vector<8x256xf32> -> vector<8x256xf32>
    %392 = arith.addf %390, %391 : vector<8x256xf32>
    %393 = vector.broadcast %1 : vector<1x256xf32> to vector<8x256xf32>
    %394 = arith.mulf %392, %393 : vector<8x256xf32>
    %395 = math.tanh %394 : vector<8x256xf32>
    %396 = vector.broadcast %1 : vector<1x256xf32> to vector<8x256xf32>
    %397 = arith.mulf %395, %396 : vector<8x256xf32>
    %398 = vector.broadcast %2 : vector<1x256xf32> to vector<8x256xf32>
    %399 = arith.addf %397, %398 : vector<8x256xf32>
    %400 = vector.extract_strided_slice %399 {offsets = [0, 0], sizes = [8, 64], strides = [1, 1]} : vector<8x256xf32> to vector<8x64xf32>
    %401 = vector.extract_strided_slice %399 {offsets = [0, 64], sizes = [8, 64], strides = [1, 1]} : vector<8x256xf32> to vector<8x64xf32>
    %402 = vector.extract_strided_slice %399 {offsets = [0, 128], sizes = [8, 64], strides = [1, 1]} : vector<8x256xf32> to vector<8x64xf32>
    %403 = vector.extract_strided_slice %399 {offsets = [0, 192], sizes = [8, 64], strides = [1, 1]} : vector<8x256xf32> to vector<8x64xf32>
    %404 = arith.mulf %401, %364 : vector<8x64xf32>
    %405 = arith.mulf %400, %402 : vector<8x64xf32>
    %406 = arith.addf %404, %405 : vector<8x64xf32>
    %407 = math.tanh %406 : vector<8x64xf32>
    %408 = arith.mulf %403, %407 : vector<8x64xf32>
    %409 = vector.broadcast %c7_i32_123 : i32 to vector<1x64xi32>
    %410 = arith.muli %14, %409 : vector<1x64xi32>
    %411 = arith.addi %9, %410 : vector<1x64xi32>
    %412 = vector.broadcast %411 : vector<1x64xi32> to vector<8x64xi32>
    %413 = vector.broadcast %3 : vector<8x1xi32> to vector<8x64xi32>
    %414 = arith.cmpi slt, %412, %413 : vector<8x64xi32>
    %415 = arith.select %414, %408, %363 : vector<8x64xi1>, vector<8x64xf32>
    %416 = arith.select %414, %406, %364 : vector<8x64xi1>, vector<8x64xf32>
    %cst_128 = arith.constant 0.000000e+00 : f32
    %417 = vector.broadcast %cst_128 : f32 to vector<8x64xf32>
    %418 = arith.select %414, %408, %417 : vector<8x64xi1>, vector<8x64xf32>
    %419 = arith.index_cast %c7_i32_123 : i32 to index
    %c0_129 = arith.constant 0 : index
    %c0_130 = arith.constant 0 : index
    %420 = vector.load %arg7[%419, %c0_129, %c0_130] : memref<8x8x128xf32, #tpu.memory_space<vmem>>, vector<1x8x128xf32>
    %421 = vector.shape_cast %420 : vector<1x8x128xf32> to vector<8x128xf32>
    %422 = vector.extract_strided_slice %418 {offsets = [0, 0], sizes = [8, 32], strides = [1, 1]} : vector<8x64xf32> to vector<8x32xf32>
    %cst_131 = arith.constant dense<0.000000e+00> : vector<8x128xf32>
    %423 = tpu.matmul %422, %15, %cst_131 {dimension_numbers = #tpu.dot_dimension_numbers<[1], [0], [0], [1], [0, 0, 1, 1], [], []>} : vector<8x32xf32>, vector<32x128xf32>, vector<8x128xf32> -> vector<8x128xf32>
    %424 = arith.addf %421, %423 : vector<8x128xf32>
    %425 = arith.index_cast %c7_i32_123 : i32 to index
    %c0_132 = arith.constant 0 : index
    %c0_133 = arith.constant 0 : index
    %426 = vector.load %arg7[%425, %c0_132, %c0_133] : memref<8x8x128xf32, #tpu.memory_space<vmem>>, vector<1x8x128xf32>
    %427 = vector.shape_cast %426 : vector<1x8x128xf32> to vector<8x128xf32>
    %428 = vector.shape_cast %424 : vector<8x128xf32> to vector<1x8x128xf32>
    tpu.vector_store %arg7[%425, %c0_132, %c0_133], %428 {strides = array<i32>} : memref<8x8x128xf32, #tpu.memory_space<vmem>>, vector<1x8x128xf32>,
    %429 = arith.index_cast %387 : i32 to index
    %c0_134 = arith.constant 0 : index
    %c0_135 = arith.constant 0 : index
    %430 = vector.load %arg7[%429, %c0_134, %c0_135] : memref<8x8x128xf32, #tpu.memory_space<vmem>>, vector<1x8x128xf32>
    %431 = vector.shape_cast %430 : vector<1x8x128xf32> to vector<8x128xf32>
    %432 = vector.extract_strided_slice %418 {offsets = [0, 32], sizes = [8, 32], strides = [1, 1]} : vector<8x64xf32> to vector<8x32xf32>
    %cst_136 = arith.constant dense<0.000000e+00> : vector<8x128xf32>
    %433 = tpu.matmul %432, %16, %cst_136 {dimension_numbers = #tpu.dot_dimension_numbers<[1], [0], [0], [1], [0, 0, 1, 1], [], []>} : vector<8x32xf32>, vector<32x128xf32>, vector<8x128xf32> -> vector<8x128xf32>
    %434 = arith.addf %431, %433 : vector<8x128xf32>
    %435 = arith.index_cast %387 : i32 to index
    %c0_137 = arith.constant 0 : index
    %c0_138 = arith.constant 0 : index
    %436 = vector.load %arg7[%435, %c0_137, %c0_138] : memref<8x8x128xf32, #tpu.memory_space<vmem>>, vector<1x8x128xf32>
    %437 = vector.shape_cast %436 : vector<1x8x128xf32> to vector<8x128xf32>
    %438 = vector.shape_cast %434 : vector<8x128xf32> to vector<1x8x128xf32>
    tpu.vector_store %arg7[%435, %c0_137, %c0_138], %438 {strides = array<i32>} : memref<8x8x128xf32, #tpu.memory_space<vmem>>, vector<1x8x128xf32>,
    %c8_i32 = arith.constant 8 : i32
    return
  }
}

</mosaic_0001>

<bundles_post_ra>
// kernel: rnn_forward.2
= control target key start
LH: loop header
LB: loop body
LE: loop exit
PB: predicated region body
PF: predicated region fallthrough
CT: control target
= control target key end

     0   :  { %v1068_v3 = vmov 0.0   ;;  %v39_v17 = vlaneseq  ;;  %v1069_v33 = vmov 0   ;;  %s1070_s6 = smov 64   ;;  %v1071_v47 = vmov 7   ;;  %s1549_s2 = inlined_call_operand.vmem [shape: f32[64,256], index: 2, kind: input, shape index: {}]   ;;  %s1550_s3 = inlined_call_operand.vmem [shape: f32[1,256], index: 3, kind: input, shape index: {}]   ;;  %s1551_s0 = inlined_call_operand.vmem [shape: f32[8,8,256], index: 0, kind: input, shape index: {}]   ;;  %s1552_s4 = inlined_call_operand.vmem [shape: f32[1,256], index: 4, kind: input, shape index: {}]   ;;  %s1553_s1 = inlined_call_operand.vmem [shape: s32[8,1], index: 1, kind: input, shape index: {}]   ;;  %s1554_s5 = inlined_call_operand.vmem [shape: f32[8,8,64], index: 5, kind: output, shape index: {}]  }
   0x1   :  { %v1106_v0 = vld [vmem:[%s1549_s2 + $0x78] sm:$0xff]  ;;  %v1111_v1 = vld [vmem:[%s1549_s2 + $0x70] sm:$0xff]  ;;  %v1116_v2 = vld [vmem:[%s1549_s2 + $0x68] sm:$0xff]  ;;  %114 = vmatprep.mubr.f32.mxu0 %v1068_v3  ;;  %247 = vmatprep.mubr.f32.mxu1 %v1068_v3  ;;  %v1072_v49 = vmov 4294967295   ;;  %vm46_vm2 = vcmask 523264  }
   0x2   :  { %66 = vmatprep.subr.mxu0 %v1106_v0  ;;  %v1124_v4 = vld [vmem:[%s1549_s2 + $0x60] sm:$0xff]  ;;  %199 = vmatprep.subr.mxu1 %v1106_v0  ;;  %v1131_v5 = vld [vmem:[%s1549_s2 + $0x58] sm:$0xff]  ;;  %v1138_v6 = vld [vmem:[%s1549_s2 + $0x50] sm:$0xff]  ;;  %v125_v18 = vshrl.u32 %v39_v17, 7  ;;  %v40_v44 = vand.u32 127, %v39_v17 }
   0x3   :  { %67 = vmatpush1.msra.mxu0 %v1111_v1  ;;  %200 = vmatpush1.msra.mxu1 %v1111_v1  ;;  %v1145_v7 = vld [vmem:[%s1549_s2 + $0x48] sm:$0xff]  ;;  %v1152_v8 = vld [vmem:[%s1549_s2 + $0x40] sm:$0xff]  ;;  %v1159_v9 = vld [vmem:[%s1549_s2 + $0x38] sm:$0xff] }
   0x4   :  { %68 = vmatprep.subr.mxu0 %v1116_v2  ;;  %201 = vmatprep.subr.mxu1 %v1116_v2  ;;  %v1166_v10 = vld [vmem:[%s1549_s2 + $0x30] sm:$0xff]  ;;  %v1173_v11 = vld [vmem:[%s1549_s2 + $0x28] sm:$0xff]  ;;  %v1180_v12 = vld [vmem:[%s1549_s2 + $0x20] sm:$0xff]  ;;  %v126_v19 = vsub.s32 0, %v125_v18  ;;  %v130_v21 = vsub.s32 1, %v125_v18  ;;  %vm41_vm0 = vcmp.lt.s32.totalorder %v40_v44, 32 }
   0x5   :  { %69 = vmatpush1.msra.mxu0 %v1124_v4  ;;  %202 = vmatpush1.msra.mxu1 %v1124_v4  ;;  %v1187_v13 = vld [vmem:[%s1549_s2 + $0x18] sm:$0xff]  ;;  %v1194_v14 = vld [vmem:[%s1549_s2 + $0x10] sm:$0xff]  ;;  %v1201_v15 = vld [vmem:[%s1549_s2 + $0x8] sm:$0xff]  ;;  %v1267_v48 = vsel %vm41_vm0, 0, %v1071_v47  ;;  %v1269_v50 = vsel %vm41_vm0, 1, %v1072_v49 }
   0x6   :  { %70 = vmatprep.subr.mxu0 %v1131_v5  ;;  %203 = vmatprep.subr.mxu1 %v1131_v5  ;;  %v1208_v16 = vld [vmem:[%s1549_s2] sm:$0xff]  ;;  %v45_v25 = vld [vmem:[%s1551_s0 + $0x8] sm:$0xff]  ;;  %v392_v52 = vmul.u32 2, %v1269_v50  ;;  %v508_v53 = vmul.u32 3, %v1269_v50 }
   0x7   :  { %71 = vmatpush1.msra.mxu0 %v1138_v6  ;;  %204 = vmatpush1.msra.mxu1 %v1138_v6  ;;  %v36_v20 = vld [vmem:[%s1550_s3] sm:$0x3]  ;;  %v624_v54 = vmul.u32 4, %v1269_v50  ;;  %v740_v55 = vmul.u32 5, %v1269_v50 }
   0x8   :  { %72 = vmatprep.subr.mxu0 %v1145_v7  ;;  %205 = vmatprep.subr.mxu1 %v1145_v7  ;;  %v44_v22 = vld [vmem:[%s1551_s0] sm:$0xff]  ;;  %v1243_v23 = vrot.slane %v36_v20, %v126_v19  ;;  %v1248_v27 = vrot.slane %v36_v20, %v130_v21  ;;  %v1276_v56 = vadd.s32 %v392_v52, %v1267_v48  ;;  %v856_v60 = vmul.u32 6, %v1269_v50 }
   0x9   :  { %73 = vmatpush1.msra.mxu0 %v1152_v8  ;;  %206 = vmatpush1.msra.mxu1 %v1152_v8  ;;  %v37_v32 = vld [vmem:[%s1552_s4] sm:$0x3]  ;;  %v1279_v57 = vadd.s32 %v508_v53, %v1267_v48  ;;  %v1282_v58 = vadd.s32 %v624_v54, %v1267_v48  ;;  %v1285_v59 = vadd.s32 %v740_v55, %v1267_v48  ;;  %v972_v61 = vmul.u32 7, %v1269_v50 }
   0xa   :  { %74 = vmatprep.subr.mxu0 %v1159_v9  ;;  %207 = vmatprep.subr.mxu1 %v1159_v9  ;;  %v1256_v36 = vrot.slane %v37_v32, %v126_v19  ;;  %v1258_v37 = vrot.slane %v37_v32, %v130_v21  ;;  %v38_v43 = vld [vmem:[%s1553_s1] sm:$0xff]  ;;  %v1290_v62 = vadd.s32 %v856_v60, %v1267_v48 }
   0xb   :  { %75 = vmatpush1.msra.mxu0 %v1166_v10  ;;  %208 = vmatpush1.msra.mxu1 %v1166_v10  ;;  %v1293_v63 = vadd.s32 %v972_v61, %v1267_v48  ;;  %v991_v61 = vld [vmem:[%s1551_s0 + $0x28] sm:$0xff] }
   0xc   :  { %76 = vmatprep.subr.mxu0 %v1173_v11  ;;  %209 = vmatprep.subr.mxu1 %v1173_v11 }
   0xd   :  { %77 = vmatpush1.msra.mxu0 %v1180_v12  ;;  %210 = vmatpush1.msra.mxu1 %v1180_v12 }
   0xe   :  { %78 = vmatprep.subr.mxu0 %v1187_v13  ;;  %211 = vmatprep.subr.mxu1 %v1187_v13 }
   0xf   :  { %79 = vmatpush1.msra.mxu0 %v1194_v14  ;;  %212 = vmatpush1.msra.mxu1 %v1194_v14 }
  0x10   :  { %80 = vmatprep.subr.mxu0 %v1201_v15  ;;  %213 = vmatprep.subr.mxu1 %v1201_v15 }
  0x11   :  { %81 = vmatpush1.msra.mxu0 %v1208_v16  ;;  %214 = vmatpush1.msra.mxu1 %v1208_v16 }
  0x12   :  { %115 = vmatmul.mubr.f32.vlgmr.msra.gmra.mxu0 %v1068_v3  ;;  %314 = vmatprep.subr.mxu0 %v1106_v0 }
  0x13   :  { %315 = vmatpush1.msra.mxu0 %v1111_v1  ;;  %362 = vmatprep.mubr.f32.mxu0 %v1068_v3 }
  0x14   :  { %316 = vmatprep.subr.mxu0 %v1116_v2  ;;  %430 = vmatprep.subr.mxu1 %v1106_v0 }
  0x15   :  { %317 = vmatpush1.msra.mxu0 %v1124_v4  ;;  %1019 = vset.pattern.permute.xlu0 %v1069_v33 }
  0x16   :  { %318 = vmatprep.subr.mxu0 %v1131_v5 }
  0x17   :  { %319 = vmatpush1.msra.mxu0 %v1138_v6 }
  0x18   :  { %320 = vmatprep.subr.mxu0 %v1145_v7 }
  0x19   :  { %321 = vmatpush1.msra.mxu0 %v1152_v8 }
  0x1a   :  { %322 = vmatprep.subr.mxu0 %v1159_v9 }
  0x1b   :  { %323 = vmatpush1.msra.mxu0 %v1166_v10 }
  0x1c   :  { %324 = vmatprep.subr.mxu0 %v1173_v11 }
  0x1d   :  { %325 = vmatpush1.msra.mxu0 %v1180_v12 }
  0x1e   :  { %326 = vmatprep.subr.mxu0 %v1187_v13 }
  0x1f   :  { %327 = vmatpush1.msra.mxu0 %v1194_v14 }
  0x20   :  { %328 = vmatprep.subr.mxu0 %v1201_v15 }
  0x21   :  { %329 = vmatpush1.msra.mxu0 %v1208_v16 }
  0x22   :  { %546 = vmatprep.subr.mxu0 %v1106_v0 }
  0xd2   :  { %v116_v24 = vpop.f32.mrf.mxu0 }
  0xd3   :  { %v121_v26 = vadd.f32 %v116_v24, %v44_v22 }
  0xd4   :  { %v118_v28 = vpop.f32.mrf.mxu0 }
  0xd5   :  { %v134_v29 = vmul.f32 %v1243_v23, %v121_v26  ;;  %v122_v30 = vadd.f32 %v118_v28, %v45_v25  ;;  %v986_v25 = vld [vmem:[%s1551_s0 + $0x10] sm:$0xff]  ;;  %v987_v28 = vld [vmem:[%s1551_s0 + $0x18] sm:$0xff] }
  0xd7   :  { %1020 = vtanh.f32 %v134_v29  ;;  %v135_v31 = vmul.f32 %v1248_v27, %v122_v30 }
  0xd9   :  { %1022 = vtanh.f32 %v135_v31 }
  0xe4   :  { %v1021_v34 = vpop.eup %1020 }
  0xe5   :  { %v138_v35 = vmul.f32 %v1021_v34, %v1243_v23 }
  0xe6   :  { %v1023_v38 = vpop.eup %1022 }
  0xe7   :  { %v139_v39 = vmul.f32 %v1023_v38, %v1248_v27  ;;  %v151_v40 = vadd.f32 %v1256_v36, %v138_v35 }
  0xe9   :  { %v152_v41 = vadd.f32 %v1258_v37, %v139_v39  ;;  %v153_v45 = vmul.f32 0.0, %v151_v40 }
  0xeb   :  { %v154_v42 = vmul.f32 %v152_v41, %v151_v40 }
  0xed   :  { %156 = vrot.lane.b32.xlu0 %v154_v42, %s1070_s6 }
  0xf1   :  { %163 = vperm.xlu0 %1019, %v38_v43  }
 0x15f   :  { %v157_v46 = vpop.permute.xlu0 %156 }
 0x160   :  { %v159_v51 = vadd.f32 %v157_v46, %v153_v45 }
 0x162   :  { %1024 = vtanh.f32 %v159_v51 }
 0x16c   :  { %v1297_v19 = vpop.permute.xlu0 %163 }
 0x16d   :  { %vm165_vm1 = vcmp.lt.s32.totalorder %v1267_v48, %v1297_v19  ;;  %vm394_vm4 = vcmp.lt.s32.totalorder %v1276_v56, %v1297_v19  ;;  %v994_v56 = vld [vmem:[%s1551_s0 + $0x30] sm:$0xff]  ;;  %vm510_vm5 = vcmp.lt.s32.totalorder %v1279_v57, %v1297_v19  ;;  %v998_v57 = vld [vmem:[%s1551_s0 + $0x40] sm:$0xff]  ;;  %vm626_vm6 = vcmp.lt.s32.totalorder %v1282_v58, %v1297_v19 }
 0x16e   :  { %vm742_vm7 = vcmp.lt.s32.totalorder %v1285_v59, %v1297_v19  ;;  %v1007_v59 = vld [vmem:[%s1551_s0 + $0x68] sm:$0xff]  ;;  %vm858_vm8 = vcmp.lt.s32.totalorder %v1290_v62, %v1297_v19  ;;  %v1011_v62 = vld [vmem:[%s1551_s0 + $0x78] sm:$0xff]  ;;  %vm974_vm9 = vcmp.lt.s32.totalorder %v1293_v63, %v1297_v19 }
 0x16f   :  { %v1025_v17 = vpop.eup %1024 }
 0x170   :  { %v161_v18 = vmul.f32 %v1025_v17, %v152_v41 }
 0x172   :  { %167 = vrot.lane.b32.xlu1 %v161_v18, %s1070_s6 }
 0x176   :  { %172 = vrot.lane.b32.xlu1 %v159_v51, %s1070_s6  ;;  %v277_v51 = vadd.s32 %v1269_v50, %v1267_v48  ;;  %v990_v48 = vld [vmem:[%s1551_s0 + $0x20] sm:$0xff] }
 0x178   :  { %vm278_vm3 = vcmp.lt.s32.totalorder %v277_v51, %v1297_v19 }
 0x1e4   :  { %v168_v20 = vpop.permute.xlu1 %167 }
 0x1e5   :  { %v170_v21 = vsel %vm165_vm1, %v168_v20, 0.0 }
 0x1e6   :  { %176 = vst.msk [vmem:[%s1554_s5] sm:$0xff] %vm46_vm2, %v170_v21  ;;  %988 = vmatmul.mubr.msk.f32.vlgmr.msra.gmra.mxu1 %vm46_vm2, %v170_v21 }
 0x1e7   :  { %431 = vmatpush1.msra.mxu1 %v1111_v1  ;;  %478 = vmatprep.mubr.f32.mxu1 %v1068_v3 }
 0x1e8   :  { %v173_v22 = vpop.permute.xlu1 %172  ;;  %432 = vmatprep.subr.mxu1 %v1116_v2 }
 0x1e9   :  { %v175_v24 = vsel %vm165_vm1, %v173_v22, 0.0  ;;  %433 = vmatpush1.msra.mxu1 %v1124_v4 }
 0x1ea   :  { %265 = vrot.lane.b32.xlu1 %v175_v24, %s1070_s6  ;;  %434 = vmatprep.subr.mxu1 %v1131_v5 }
 0x1eb   :  { %435 = vmatpush1.msra.mxu1 %v1138_v6 }
 0x1ec   :  { %436 = vmatprep.subr.mxu1 %v1145_v7 }
 0x1ed   :  { %437 = vmatpush1.msra.mxu1 %v1152_v8 }
 0x1ee   :  { %438 = vmatprep.subr.mxu1 %v1159_v9 }
 0x1ef   :  { %439 = vmatpush1.msra.mxu1 %v1166_v10 }
 0x1f0   :  { %440 = vmatprep.subr.mxu1 %v1173_v11 }
 0x1f1   :  { %441 = vmatpush1.msra.mxu1 %v1180_v12 }
 0x1f2   :  { %442 = vmatprep.subr.mxu1 %v1187_v13 }
 0x1f3   :  { %443 = vmatpush1.msra.mxu1 %v1194_v14 }
 0x1f4   :  { %444 = vmatprep.subr.mxu1 %v1201_v15 }
 0x1f5   :  { %445 = vmatpush1.msra.mxu1 %v1208_v16 }
 0x1f6   :  { %662 = vmatprep.subr.mxu1 %v1106_v0 }
 0x25c   :  { %v266_v43 = vpop.permute.xlu1 %265 }
 0x2a6   :  { %v249_v26 = vpop.f32.mrf.mxu1 }
 0x2a7   :  { %v254_v29 = vadd.f32 %v986_v25, %v249_v26 }
 0x2a8   :  { %v251_v30 = vpop.f32.mrf.mxu1 }
 0x2a9   :  { %v256_v31 = vmul.f32 %v254_v29, %v1243_v23  ;;  %v255_v32 = vadd.f32 %v987_v28, %v251_v30 }
 0x2ab   :  { %1026 = vtanh.f32 %v256_v31  ;;  %v257_v33 = vmul.f32 %v255_v32, %v1248_v27 }
 0x2ad   :  { %1028 = vtanh.f32 %v257_v33 }
 0x2b8   :  { %v1027_v34 = vpop.eup %1026 }
 0x2b9   :  { %v260_v35 = vmul.f32 %v1027_v34, %v1243_v23 }
 0x2ba   :  { %v1029_v38 = vpop.eup %1028 }
 0x2bb   :  { %v261_v39 = vmul.f32 %v1029_v38, %v1248_v27  ;;  %v262_v40 = vadd.f32 %v260_v35, %v1256_v36 }
 0x2bd   :  { %v263_v41 = vadd.f32 %v261_v39, %v1258_v37  ;;  %v268_v44 = vmul.f32 %v266_v43, %v262_v40 }
 0x2bf   :  { %v269_v42 = vmul.f32 %v263_v41, %v262_v40 }
 0x2c1   :  { %271 = vrot.lane.b32.xlu0 %v269_v42, %s1070_s6 }
 0x333   :  { %v272_v45 = vpop.permute.xlu0 %271 }
 0x334   :  { %v274_v46 = vadd.f32 %v272_v45, %v268_v44 }
 0x336   :  { %1030 = vtanh.f32 %v274_v46  ;;  %285 = vrot.lane.b32.xlu0 %v274_v46, %s1070_s6  ;;  %v995_v46 = vld [vmem:[%s1551_s0 + $0x38] sm:$0xff] }
 0x343   :  { %v1031_v47 = vpop.eup %1030 }
 0x344   :  { %v276_v49 = vmul.f32 %v1031_v47, %v263_v41 }
 0x346   :  { %280 = vrot.lane.b32.xlu1 %v276_v49, %s1070_s6 }
 0x3a8   :  { %v286_v52 = vpop.permute.xlu0 %285 }
 0x3a9   :  { %v288_v53 = vsel %vm278_vm3, %v286_v52, %v175_v24 }
 0x3aa   :  { %380 = vrot.lane.b32.xlu1 %v288_v53, %s1070_s6 }
 0x3b8   :  { %v281_v54 = vpop.permute.xlu1 %280 }
 0x3b9   :  { %v283_v55 = vsel %vm278_vm3, %v281_v54, %v170_v21  ;;  %v289_v60 = vsel %vm278_vm3, %v281_v54, 0.0 }
 0x3ba   :  { %989 = vst.msk [vmem:[%s1554_s5 + $0x8] sm:$0xff] %vm46_vm2, %v289_v60  ;;  %992 = vmatmul.mubr.msk.f32.vlgmr.msra.gmra.mxu0 %vm46_vm2, %v283_v55 }
 0x3bb   :  { %547 = vmatpush1.msra.mxu0 %v1111_v1  ;;  %594 = vmatprep.mubr.f32.mxu0 %v1068_v3 }
 0x3bc   :  { %548 = vmatprep.subr.mxu0 %v1116_v2 }
 0x3bd   :  { %549 = vmatpush1.msra.mxu0 %v1124_v4 }
 0x3be   :  { %550 = vmatprep.subr.mxu0 %v1131_v5 }
 0x3bf   :  { %551 = vmatpush1.msra.mxu0 %v1138_v6 }
 0x3c0   :  { %552 = vmatprep.subr.mxu0 %v1145_v7 }
 0x3c1   :  { %553 = vmatpush1.msra.mxu0 %v1152_v8 }
 0x3c2   :  { %554 = vmatprep.subr.mxu0 %v1159_v9 }
 0x3c3   :  { %555 = vmatpush1.msra.mxu0 %v1166_v10 }
 0x3c4   :  { %556 = vmatprep.subr.mxu0 %v1173_v11 }
 0x3c5   :  { %557 = vmatpush1.msra.mxu0 %v1180_v12 }
 0x3c6   :  { %558 = vmatprep.subr.mxu0 %v1187_v13 }
 0x3c7   :  { %559 = vmatpush1.msra.mxu0 %v1194_v14 }
 0x3c8   :  { %560 = vmatprep.subr.mxu0 %v1201_v15 }
 0x3c9   :  { %561 = vmatpush1.msra.mxu0 %v1208_v16 }
 0x3ca   :  { %778 = vmatprep.subr.mxu0 %v1106_v0 }
 0x41c   :  { %v381_v32 = vpop.permute.xlu1 %380 }
 0x47a   :  { %v364_v50 = vpop.f32.mrf.mxu0 }
 0x47b   :  { %v369_v17 = vadd.f32 %v990_v48, %v364_v50 }
 0x47c   :  { %v366_v18 = vpop.f32.mrf.mxu0 }
 0x47d   :  { %v371_v20 = vmul.f32 %v369_v17, %v1243_v23  ;;  %v370_v21 = vadd.f32 %v991_v61, %v366_v18 }
 0x47f   :  { %1032 = vtanh.f32 %v371_v20  ;;  %v372_v22 = vmul.f32 %v370_v21, %v1248_v27 }
 0x481   :  { %1034 = vtanh.f32 %v372_v22 }
 0x48c   :  { %v1033_v24 = vpop.eup %1032 }
 0x48d   :  { %v375_v25 = vmul.f32 %v1033_v24, %v1243_v23 }
 0x48e   :  { %v1035_v26 = vpop.eup %1034 }
 0x48f   :  { %v376_v28 = vmul.f32 %v1035_v26, %v1248_v27  ;;  %v377_v29 = vadd.f32 %v375_v25, %v1256_v36 }
 0x491   :  { %v378_v30 = vadd.f32 %v376_v28, %v1258_v37  ;;  %v383_v33 = vmul.f32 %v381_v32, %v377_v29  ;;  %v999_v32 = vld [vmem:[%s1551_s0 + $0x48] sm:$0xff] }
 0x493   :  { %v384_v31 = vmul.f32 %v378_v30, %v377_v29 }
 0x495   :  { %386 = vrot.lane.b32.xlu0 %v384_v31, %s1070_s6 }
 0x507   :  { %v387_v34 = vpop.permute.xlu0 %386 }
 0x508   :  { %v389_v35 = vadd.f32 %v387_v34, %v383_v33 }
 0x50a   :  { %1036 = vtanh.f32 %v389_v35  ;;  %401 = vrot.lane.b32.xlu0 %v389_v35, %s1070_s6 }
 0x517   :  { %v1037_v38 = vpop.eup %1036 }
 0x518   :  { %v391_v39 = vmul.f32 %v1037_v38, %v378_v30 }
 0x51a   :  { %396 = vrot.lane.b32.xlu1 %v391_v39, %s1070_s6 }
 0x57c   :  { %v402_v40 = vpop.permute.xlu0 %401 }
 0x57d   :  { %v404_v41 = vsel %vm394_vm4, %v402_v40, %v288_v53 }
 0x57e   :  { %496 = vrot.lane.b32.xlu1 %v404_v41, %s1070_s6 }
 0x58c   :  { %v397_v42 = vpop.permute.xlu1 %396 }
 0x58d   :  { %v399_v43 = vsel %vm394_vm4, %v397_v42, %v283_v55  ;;  %v405_v44 = vsel %vm394_vm4, %v397_v42, 0.0 }
 0x58e   :  { %993 = vst.msk [vmem:[%s1554_s5 + $0x10] sm:$0xff] %vm46_vm2, %v405_v44  ;;  %996 = vmatmul.mubr.msk.f32.vlgmr.msra.gmra.mxu1 %vm46_vm2, %v399_v43 }
 0x58f   :  { %663 = vmatpush1.msra.mxu1 %v1111_v1  ;;  %710 = vmatprep.mubr.f32.mxu1 %v1068_v3 }
 0x590   :  { %664 = vmatprep.subr.mxu1 %v1116_v2 }
 0x591   :  { %665 = vmatpush1.msra.mxu1 %v1124_v4 }
 0x592   :  { %666 = vmatprep.subr.mxu1 %v1131_v5 }
 0x593   :  { %667 = vmatpush1.msra.mxu1 %v1138_v6 }
 0x594   :  { %668 = vmatprep.subr.mxu1 %v1145_v7 }
 0x595   :  { %669 = vmatpush1.msra.mxu1 %v1152_v8 }
 0x596   :  { %670 = vmatprep.subr.mxu1 %v1159_v9 }
 0x597   :  { %671 = vmatpush1.msra.mxu1 %v1166_v10 }
 0x598   :  { %672 = vmatprep.subr.mxu1 %v1173_v11 }
 0x599   :  { %673 = vmatpush1.msra.mxu1 %v1180_v12 }
 0x59a   :  { %674 = vmatprep.subr.mxu1 %v1187_v13 }
 0x59b   :  { %675 = vmatpush1.msra.mxu1 %v1194_v14 }
 0x59c   :  { %676 = vmatprep.subr.mxu1 %v1201_v15 }
 0x59d   :  { %677 = vmatpush1.msra.mxu1 %v1208_v16 }
 0x59e   :  { %894 = vmatprep.subr.mxu1 %v1106_v0 }
 0x5f0   :  { %v497_v17 = vpop.permute.xlu1 %496 }
 0x64e   :  { %v480_v45 = vpop.f32.mrf.mxu1 }
 0x64f   :  { %v485_v47 = vadd.f32 %v994_v56, %v480_v45 }
 0x650   :  { %v482_v49 = vpop.f32.mrf.mxu1 }
 0x651   :  { %v487_v51 = vmul.f32 %v485_v47, %v1243_v23  ;;  %v486_v52 = vadd.f32 %v995_v46, %v482_v49 }
 0x653   :  { %1038 = vtanh.f32 %v487_v51  ;;  %v488_v53 = vmul.f32 %v486_v52, %v1248_v27 }
 0x655   :  { %1040 = vtanh.f32 %v488_v53 }
 0x660   :  { %v1039_v54 = vpop.eup %1038 }
 0x661   :  { %v491_v0 = vmul.f32 %v1039_v54, %v1243_v23 }
 0x662   :  { %v1041_v55 = vpop.eup %1040 }
 0x663   :  { %v492_v60 = vmul.f32 %v1041_v55, %v1248_v27  ;;  %v493_v48 = vadd.f32 %v491_v0, %v1256_v36 }
 0x665   :  { %v494_v50 = vadd.f32 %v492_v60, %v1258_v37  ;;  %v499_v18 = vmul.f32 %v497_v17, %v493_v48 }
 0x667   :  { %v500_v61 = vmul.f32 %v494_v50, %v493_v48 }
 0x669   :  { %502 = vrot.lane.b32.xlu0 %v500_v61, %s1070_s6 }
 0x6db   :  { %v503_v20 = vpop.permute.xlu0 %502 }
 0x6dc   :  { %v505_v21 = vadd.f32 %v503_v20, %v499_v18 }
 0x6de   :  { %1042 = vtanh.f32 %v505_v21  ;;  %517 = vrot.lane.b32.xlu0 %v505_v21, %s1070_s6 }
 0x6eb   :  { %v1043_v22 = vpop.eup %1042 }
 0x6ec   :  { %v507_v24 = vmul.f32 %v1043_v22, %v494_v50 }
 0x6ee   :  { %512 = vrot.lane.b32.xlu1 %v507_v24, %s1070_s6 }
 0x750   :  { %v518_v25 = vpop.permute.xlu0 %517 }
 0x751   :  { %v520_v26 = vsel %vm510_vm5, %v518_v25, %v404_v41 }
 0x752   :  { %612 = vrot.lane.b32.xlu1 %v520_v26, %s1070_s6 }
 0x760   :  { %v513_v28 = vpop.permute.xlu1 %512 }
 0x761   :  { %v515_v29 = vsel %vm510_vm5, %v513_v28, %v399_v43  ;;  %v521_v30 = vsel %vm510_vm5, %v513_v28, 0.0 }
 0x762   :  { %997 = vst.msk [vmem:[%s1554_s5 + $0x18] sm:$0xff] %vm46_vm2, %v521_v30  ;;  %1000 = vmatmul.mubr.msk.f32.vlgmr.msra.gmra.mxu0 %vm46_vm2, %v515_v29 }
 0x763   :  { %779 = vmatpush1.msra.mxu0 %v1111_v1  ;;  %826 = vmatprep.mubr.f32.mxu0 %v1068_v3 }
 0x764   :  { %780 = vmatprep.subr.mxu0 %v1116_v2 }
 0x765   :  { %781 = vmatpush1.msra.mxu0 %v1124_v4 }
 0x766   :  { %782 = vmatprep.subr.mxu0 %v1131_v5 }
 0x767   :  { %783 = vmatpush1.msra.mxu0 %v1138_v6 }
 0x768   :  { %784 = vmatprep.subr.mxu0 %v1145_v7 }
 0x769   :  { %785 = vmatpush1.msra.mxu0 %v1152_v8 }
 0x76a   :  { %786 = vmatprep.subr.mxu0 %v1159_v9 }
 0x76b   :  { %787 = vmatpush1.msra.mxu0 %v1166_v10 }
 0x76c   :  { %788 = vmatprep.subr.mxu0 %v1173_v11 }
 0x76d   :  { %789 = vmatpush1.msra.mxu0 %v1180_v12 }
 0x76e   :  { %790 = vmatprep.subr.mxu0 %v1187_v13 }
 0x76f   :  { %791 = vmatpush1.msra.mxu0 %v1194_v14 }
 0x770   :  { %792 = vmatprep.subr.mxu0 %v1201_v15 }
 0x771   :  { %793 = vmatpush1.msra.mxu0 %v1208_v16 }
 0x7c4   :  { %v613_v46 = vpop.permute.xlu1 %612 }
 0x822   :  { %v596_v31 = vpop.f32.mrf.mxu0 }
 0x823   :  { %v601_v33 = vadd.f32 %v998_v57, %v596_v31 }
 0x824   :  { %v598_v34 = vpop.f32.mrf.mxu0 }
 0x825   :  { %v603_v35 = vmul.f32 %v601_v33, %v1243_v23  ;;  %v602_v38 = vadd.f32 %v999_v32, %v598_v34 }
 0x827   :  { %1044 = vtanh.f32 %v603_v35  ;;  %v604_v39 = vmul.f32 %v602_v38, %v1248_v27 }
 0x829   :  { %1046 = vtanh.f32 %v604_v39 }
 0x834   :  { %v1045_v40 = vpop.eup %1044 }
 0x835   :  { %v607_v41 = vmul.f32 %v1045_v40, %v1243_v23 }
 0x836   :  { %v1047_v42 = vpop.eup %1046 }
 0x837   :  { %v608_v43 = vmul.f32 %v1047_v42, %v1248_v27  ;;  %v609_v44 = vadd.f32 %v607_v41, %v1256_v36 }
 0x839   :  { %v610_v56 = vadd.f32 %v608_v43, %v1258_v37  ;;  %v615_v47 = vmul.f32 %v613_v46, %v609_v44 }
 0x83b   :  { %v616_v45 = vmul.f32 %v610_v56, %v609_v44 }
 0x83d   :  { %618 = vrot.lane.b32.xlu0 %v616_v45, %s1070_s6 }
 0x8af   :  { %v619_v49 = vpop.permute.xlu0 %618 }
 0x8b0   :  { %v621_v51 = vadd.f32 %v619_v49, %v615_v47 }
 0x8b2   :  { %1048 = vtanh.f32 %v621_v51  ;;  %633 = vrot.lane.b32.xlu0 %v621_v51, %s1070_s6 }
 0x8bf   :  { %v1049_v52 = vpop.eup %1048 }
 0x8c0   :  { %v623_v53 = vmul.f32 %v1049_v52, %v610_v56 }
 0x8c2   :  { %628 = vrot.lane.b32.xlu1 %v623_v53, %s1070_s6 }
 0x924   :  { %v634_v54 = vpop.permute.xlu0 %633 }
 0x925   :  { %v636_v0 = vsel %vm626_vm6, %v634_v54, %v520_v26  ;;  %v1006_v26 = vld [vmem:[%s1551_s0 + $0x60] sm:$0xff]  ;;  %v1010_v54 = vld [vmem:[%s1551_s0 + $0x70] sm:$0xff] }
 0x926   :  { %728 = vrot.lane.b32.xlu1 %v636_v0, %s1070_s6 }
 0x934   :  { %v629_v55 = vpop.permute.xlu1 %628 }
 0x935   :  { %v631_v60 = vsel %vm626_vm6, %v629_v55, %v515_v29  ;;  %v637_v48 = vsel %vm626_vm6, %v629_v55, 0.0 }
 0x936   :  { %1001 = vst.msk [vmem:[%s1554_s5 + $0x20] sm:$0xff] %vm46_vm2, %v637_v48  ;;  %1004 = vmatmul.mubr.msk.f32.vlgmr.msra.gmra.mxu1 %vm46_vm2, %v631_v60 }
 0x937   :  { %895 = vmatpush1.msra.mxu1 %v1111_v1  ;;  %942 = vmatprep.mubr.f32.mxu1 %v1068_v3  ;;  %v1002_v1 = vld [vmem:[%s1551_s0 + $0x50] sm:$0xff]  ;;  %v1003_v3 = vld [vmem:[%s1551_s0 + $0x58] sm:$0xff] }
 0x938   :  { %896 = vmatprep.subr.mxu1 %v1116_v2 }
 0x939   :  { %897 = vmatpush1.msra.mxu1 %v1124_v4 }
 0x93a   :  { %898 = vmatprep.subr.mxu1 %v1131_v5 }
 0x93b   :  { %899 = vmatpush1.msra.mxu1 %v1138_v6 }
 0x93c   :  { %900 = vmatprep.subr.mxu1 %v1145_v7 }
 0x93d   :  { %901 = vmatpush1.msra.mxu1 %v1152_v8 }
 0x93e   :  { %902 = vmatprep.subr.mxu1 %v1159_v9 }
 0x93f   :  { %903 = vmatpush1.msra.mxu1 %v1166_v10 }
 0x940   :  { %904 = vmatprep.subr.mxu1 %v1173_v11 }
 0x941   :  { %905 = vmatpush1.msra.mxu1 %v1180_v12 }
 0x942   :  { %906 = vmatprep.subr.mxu1 %v1187_v13 }
 0x943   :  { %907 = vmatpush1.msra.mxu1 %v1194_v14 }
 0x944   :  { %908 = vmatprep.subr.mxu1 %v1201_v15 }
 0x945   :  { %909 = vmatpush1.msra.mxu1 %v1208_v16 }
 0x998   :  { %v729_v16 = vpop.permute.xlu1 %728 }
 0x9f6   :  { %v712_v2 = vpop.f32.mrf.mxu1 }
 0x9f7   :  { %v717_v4 = vadd.f32 %v1002_v1, %v712_v2 }
 0x9f8   :  { %v714_v5 = vpop.f32.mrf.mxu1 }
 0x9f9   :  { %v719_v6 = vmul.f32 %v717_v4, %v1243_v23  ;;  %v718_v7 = vadd.f32 %v1003_v3, %v714_v5 }
 0x9fb   :  { %1050 = vtanh.f32 %v719_v6  ;;  %v720_v8 = vmul.f32 %v718_v7, %v1248_v27 }
 0x9fd   :  { %1052 = vtanh.f32 %v720_v8 }
 0xa08   :  { %v1051_v9 = vpop.eup %1050 }
 0xa09   :  { %v723_v10 = vmul.f32 %v1051_v9, %v1243_v23 }
 0xa0a   :  { %v1053_v11 = vpop.eup %1052 }
 0xa0b   :  { %v724_v12 = vmul.f32 %v1053_v11, %v1248_v27  ;;  %v725_v13 = vadd.f32 %v723_v10, %v1256_v36 }
 0xa0d   :  { %v726_v14 = vadd.f32 %v724_v12, %v1258_v37  ;;  %v731_v58 = vmul.f32 %v729_v16, %v725_v13 }
 0xa0f   :  { %v732_v15 = vmul.f32 %v726_v14, %v725_v13 }
 0xa11   :  { %734 = vrot.lane.b32.xlu0 %v732_v15, %s1070_s6 }
 0xa83   :  { %v735_v50 = vpop.permute.xlu0 %734 }
 0xa84   :  { %v737_v61 = vadd.f32 %v735_v50, %v731_v58 }
 0xa86   :  { %1054 = vtanh.f32 %v737_v61  ;;  %749 = vrot.lane.b32.xlu0 %v737_v61, %s1070_s6 }
 0xa93   :  { %v1055_v17 = vpop.eup %1054 }
 0xa94   :  { %v739_v18 = vmul.f32 %v1055_v17, %v726_v14 }
 0xa96   :  { %744 = vrot.lane.b32.xlu1 %v739_v18, %s1070_s6 }
 0xaf8   :  { %v750_v20 = vpop.permute.xlu0 %749 }
 0xaf9   :  { %v752_v21 = vsel %vm742_vm7, %v750_v20, %v636_v0 }
 0xafa   :  { %844 = vrot.lane.b32.xlu1 %v752_v21, %s1070_s6 }
 0xb08   :  { %v745_v22 = vpop.permute.xlu1 %744 }
 0xb09   :  { %v747_v24 = vsel %vm742_vm7, %v745_v22, %v631_v60  ;;  %v753_v25 = vsel %vm742_vm7, %v745_v22, 0.0 }
 0xb0a   :  { %1005 = vst.msk [vmem:[%s1554_s5 + $0x28] sm:$0xff] %vm46_vm2, %v753_v25  ;;  %1008 = vmatmul.mubr.msk.f32.vlgmr.msra.gmra.mxu0 %vm46_vm2, %v747_v24 }
 0xb6c   :  { %v845_v42 = vpop.permute.xlu1 %844 }
 0xbca   :  { %v828_v28 = vpop.f32.mrf.mxu0 }
 0xbcb   :  { %v833_v29 = vadd.f32 %v1006_v26, %v828_v28 }
 0xbcc   :  { %v830_v30 = vpop.f32.mrf.mxu0 }
 0xbcd   :  { %v835_v57 = vmul.f32 %v833_v29, %v1243_v23  ;;  %v834_v31 = vadd.f32 %v1007_v59, %v830_v30 }
 0xbcf   :  { %1056 = vtanh.f32 %v835_v57  ;;  %v836_v32 = vmul.f32 %v834_v31, %v1248_v27 }
 0xbd1   :  { %1058 = vtanh.f32 %v836_v32 }
 0xbdc   :  { %v1057_v33 = vpop.eup %1056 }
 0xbdd   :  { %v839_v34 = vmul.f32 %v1057_v33, %v1243_v23 }
 0xbde   :  { %v1059_v35 = vpop.eup %1058 }
 0xbdf   :  { %v840_v38 = vmul.f32 %v1059_v35, %v1248_v27  ;;  %v841_v39 = vadd.f32 %v839_v34, %v1256_v36 }
 0xbe1   :  { %v842_v40 = vadd.f32 %v840_v38, %v1258_v37  ;;  %v847_v43 = vmul.f32 %v845_v42, %v841_v39 }
 0xbe3   :  { %v848_v41 = vmul.f32 %v842_v40, %v841_v39 }
 0xbe5   :  { %850 = vrot.lane.b32.xlu0 %v848_v41, %s1070_s6 }
 0xc57   :  { %v851_v44 = vpop.permute.xlu0 %850 }
 0xc58   :  { %v853_v56 = vadd.f32 %v851_v44, %v847_v43 }
 0xc5a   :  { %1060 = vtanh.f32 %v853_v56  ;;  %865 = vrot.lane.b32.xlu0 %v853_v56, %s1070_s6 }
 0xc67   :  { %v1061_v45 = vpop.eup %1060 }
 0xc68   :  { %v855_v46 = vmul.f32 %v1061_v45, %v842_v40 }
 0xc6a   :  { %860 = vrot.lane.b32.xlu1 %v855_v46, %s1070_s6 }
 0xccc   :  { %v866_v47 = vpop.permute.xlu0 %865 }
 0xccd   :  { %v868_v49 = vsel %vm858_vm8, %v866_v47, %v752_v21 }
 0xcce   :  { %960 = vrot.lane.b32.xlu1 %v868_v49, %s1070_s6 }
 0xcdc   :  { %v861_v51 = vpop.permute.xlu1 %860 }
 0xcdd   :  { %v863_v52 = vsel %vm858_vm8, %v861_v51, %v747_v24  ;;  %v869_v53 = vsel %vm858_vm8, %v861_v51, 0.0 }
 0xcde   :  { %1009 = vst.msk [vmem:[%s1554_s5 + $0x30] sm:$0xff] %vm46_vm2, %v869_v53  ;;  %1012 = vmatmul.mubr.msk.f32.vlgmr.msra.gmra.mxu1 %vm46_vm2, %v863_v52 }
 0xd40   :  { %v961_v10 = vpop.permute.xlu1 %960 }
 0xd9e   :  { %v944_v0 = vpop.f32.mrf.mxu1 }
 0xd9f   :  { %v949_v55 = vadd.f32 %v1010_v54, %v944_v0 }
 0xda0   :  { %v946_v60 = vpop.f32.mrf.mxu1 }
 0xda1   :  { %v951_v48 = vmul.f32 %v949_v55, %v1243_v23  ;;  %v950_v1 = vadd.f32 %v1011_v62, %v946_v60 }
 0xda3   :  { %1062 = vtanh.f32 %v951_v48  ;;  %v952_v2 = vmul.f32 %v950_v1, %v1248_v27 }
 0xda5   :  { %1064 = vtanh.f32 %v952_v2 }
 0xdb0   :  { %v1063_v3 = vpop.eup %1062 }
 0xdb1   :  { %v955_v4 = vmul.f32 %v1063_v3, %v1243_v23 }
 0xdb2   :  { %v1065_v5 = vpop.eup %1064 }
 0xdb3   :  { %v956_v6 = vmul.f32 %v1065_v5, %v1248_v27  ;;  %v957_v7 = vadd.f32 %v955_v4, %v1256_v36 }
 0xdb5   :  { %v958_v8 = vadd.f32 %v956_v6, %v1258_v37  ;;  %v963_v11 = vmul.f32 %v961_v10, %v957_v7 }
 0xdb7   :  { %v964_v9 = vmul.f32 %v958_v8, %v957_v7 }
 0xdb9   :  { %966 = vrot.lane.b32.xlu0 %v964_v9, %s1070_s6 }
 0xe2b   :  { %v967_v12 = vpop.permute.xlu0 %966 }
 0xe2c   :  { %v969_v13 = vadd.f32 %v967_v12, %v963_v11 }
 0xe2e   :  { %1066 = vtanh.f32 %v969_v13 }
 0xe3b   :  { %v1067_v14 = vpop.eup %1066 }
 0xe3c   :  { %v971_v15 = vmul.f32 %v1067_v14, %v958_v8 }
 0xe3e   :  { %976 = vrot.lane.b32.xlu1 %v971_v15, %s1070_s6 }
 0xeb0   :  { %v977_v23 = vpop.permute.xlu1 %976 }
 0xeb1   :  { %v979_v27 = vsel %vm974_vm9, %v977_v23, 0.0 }
 0xeb2   :  { %1013 = vst.msk [vmem:[%s1554_s5 + $0x38] sm:$0xff] %vm46_vm2, %v979_v27 }

// kernel: rnn_forward.3
= control target key start
LH: loop header
LB: loop body
LE: loop exit
PB: predicated region body
PF: predicated region fallthrough
CT: control target
= control target key end

     0   :  { %v2613_v3 = vmov 0.0   ;;  %v45_v17 = vlaneseq  ;;  %v2614_v33 = vmov 0   ;;  %s2615_s16 = smov 64   ;;  %v2616_v50 = vmov 7   ;;  %s3476_s2 = inlined_call_operand.vmem [shape: f32[64,256], index: 2, kind: input, shape index: {}]   ;;  %s3477_s3 = inlined_call_operand.vmem [shape: f32[1,256], index: 3, kind: input, shape index: {}]   ;;  %s3478_s0 = inlined_call_operand.vmem [shape: f32[8,8,256], index: 0, kind: input, shape index: {}]   ;;  %s3479_s4 = inlined_call_operand.vmem [shape: f32[1,256], index: 4, kind: input, shape index: {}]   ;;  %s3480_s1 = inlined_call_operand.vmem [shape: s32[8,1], index: 1, kind: input, shape index: {}]   ;;  %s3481_s5 = inlined_call_operand.vmem [shape: f32[64,128], index: 5, kind: input, shape index: {}]   ;;  %s3482_s6 = inlined_call_operand.vmem [shape: f32[1,128], index: 6, kind: input, shape index: {}]   ;;  %s3483_s7 = inlined_call_operand.vmem [shape: f32[8,8,128], index: 7, kind: output, shape index: {}]  }
   0x1   :  { %v2663_v0 = vld [vmem:[%s3476_s2 + $0x78] sm:$0xff]  ;;  %v2668_v1 = vld [vmem:[%s3476_s2 + $0x70] sm:$0xff]  ;;  %v2673_v2 = vld [vmem:[%s3476_s2 + $0x68] sm:$0xff]  ;;  %143 = vmatprep.mubr.f32.mxu0 %v2613_v3  ;;  %2377 = vmatprep.subr.mxu1 %v2613_v3  ;;  %v2617_v52 = vmov 4294967295   ;;  %vm2618_vm1 = vmmov 0   ;;  %vm206_vm3 = vcmask 261120  }
   0x2   :  { %95 = vmatprep.subr.mxu0 %v2663_v0  ;;  %v2681_v4 = vld [vmem:[%s3476_s2 + $0x60] sm:$0xff]  ;;  %v2687_v5 = vld [vmem:[%s3476_s2 + $0x58] sm:$0xff]  ;;  %v2693_v6 = vld [vmem:[%s3476_s2 + $0x50] sm:$0xff]  ;;  %v154_v18 = vshrl.u32 %v45_v17, 7  ;;  %2560 = vset.pattern.permute.xlu0 %v2614_v33  ;;  %v46_v47 = vand.u32 127, %v45_v17  ;;  %vm75_vm4 = vcmask 523264  }
   0x3   :  { %96 = vmatpush1.msra.mxu0 %v2668_v1  ;;  %v2699_v7 = vld [vmem:[%s3476_s2 + $0x48] sm:$0xff]  ;;  %v2705_v8 = vld [vmem:[%s3476_s2 + $0x40] sm:$0xff]  ;;  %v2711_v9 = vld [vmem:[%s3476_s2 + $0x38] sm:$0xff]  ;;  %2385 = vmatprep.mubr.msk.f32.mxu1 %vm2618_vm1, %v2613_v3 }
   0x4   :  { %97 = vmatprep.subr.mxu0 %v2673_v2  ;;  %v2717_v10 = vld [vmem:[%s3476_s2 + $0x30] sm:$0xff]  ;;  %v2723_v11 = vld [vmem:[%s3476_s2 + $0x28] sm:$0xff]  ;;  %v2729_v12 = vld [vmem:[%s3476_s2 + $0x20] sm:$0xff]  ;;  %v155_v19 = vsub.s32 0, %v154_v18  ;;  %v159_v21 = vsub.s32 1, %v154_v18  ;;  %vm47_vm0 = vcmp.lt.s32.totalorder %v46_v47, 32 }
   0x5   :  { %98 = vmatpush1.msra.mxu0 %v2681_v4  ;;  %v2735_v13 = vld [vmem:[%s3476_s2 + $0x18] sm:$0xff]  ;;  %v2741_v14 = vld [vmem:[%s3476_s2 + $0x10] sm:$0xff]  ;;  %v2747_v15 = vld [vmem:[%s3476_s2 + $0x8] sm:$0xff]  ;;  %v2828_v51 = vsel %vm47_vm0, 0, %v2616_v50  ;;  %v2830_v53 = vsel %vm47_vm0, 1, %v2617_v52 }
   0x6   :  { %99 = vmatprep.subr.mxu0 %v2687_v5  ;;  %v2753_v16 = vld [vmem:[%s3476_s2] sm:$0xff]  ;;  %v74_v25 = vld [vmem:[%s3478_s0 + $0x8] sm:$0xff]  ;;  %v2810_v44 = vld [vmem:[%s3481_s5 + $0x18] sm:$0xff]  ;;  %v727_v55 = vmul.u32 2, %v2830_v53  ;;  %v996_v56 = vmul.u32 3, %v2830_v53 }
   0x7   :  { %100 = vmatpush1.msra.mxu0 %v2693_v6  ;;  %v42_v20 = vld [vmem:[%s3477_s3] sm:$0x3]  ;;  %v2815_v45 = vld [vmem:[%s3481_s5 + $0x10] sm:$0xff]  ;;  %2378 = vmatpush3.msra.mxu1 %v2810_v44  ;;  %v2822_v46 = vld [vmem:[%s3481_s5 + $0x8] sm:$0xff]  ;;  %v1265_v57 = vmul.u32 4, %v2830_v53  ;;  %v1532_v58 = vmul.u32 5, %v2830_v53 }
   0x8   :  { %101 = vmatprep.subr.mxu0 %v2699_v7  ;;  %v73_v22 = vld [vmem:[%s3478_s0] sm:$0xff]  ;;  %v2783_v23 = vrot.slane %v42_v20, %v155_v19  ;;  %v2788_v27 = vrot.slane %v42_v20, %v159_v21  ;;  %2379 = vmatprep.subr.mxu1 %v2613_v3  ;;  %v2837_v59 = vadd.s32 %v727_v55, %v2828_v51  ;;  %v1799_v63 = vmul.u32 6, %v2830_v53 }
   0x9   :  { %102 = vmatpush1.msra.mxu0 %v2705_v8  ;;  %v43_v32 = vld [vmem:[%s3479_s4] sm:$0x3]  ;;  %2380 = vmatpush3.msra.mxu1 %v2815_v45  ;;  %v2840_v60 = vadd.s32 %v996_v56, %v2828_v51  ;;  %v2843_v61 = vadd.s32 %v1265_v57, %v2828_v51  ;;  %v2846_v62 = vadd.s32 %v1532_v58, %v2828_v51  ;;  %v2066_v17 = vmul.u32 7, %v2830_v53  ;;  %s2619_s4 = smov 96  }
   0xa   :  { %103 = vmatprep.subr.mxu0 %v2711_v9  ;;  %v2796_v36 = vrot.slane %v43_v32, %v155_v19  ;;  %v2798_v37 = vrot.slane %v43_v32, %v159_v21  ;;  %v44_v43 = vld [vmem:[%s3480_s1] sm:$0xff]  ;;  %2381 = vmatprep.subr.mxu1 %v2613_v3  ;;  %v2859_v19 = vadd.s32 %v1799_v63, %v2828_v51 }
   0xb   :  { %104 = vmatpush1.msra.mxu0 %v2717_v10  ;;  %2382 = vmatpush3.msra.mxu1 %v2822_v46  ;;  %v2853_v18 = vld [vmem:[%s3481_s5] sm:$0xff]  ;;  %v2862_v20 = vadd.s32 %v2066_v17, %v2828_v51 }
   0xc   :  { %105 = vmatprep.subr.mxu0 %v2723_v11  ;;  %2383 = vmatprep.subr.mxu1 %v2613_v3 }
   0xd   :  { %106 = vmatpush1.msra.mxu0 %v2729_v12  ;;  %2384 = vmatpush3.msra.mxu1 %v2853_v18 }
   0xe   :  { %107 = vmatprep.subr.mxu0 %v2735_v13  ;;  %2388 = vmatprep.subr.mxu1 %v2613_v3 }
   0xf   :  { %108 = vmatpush1.msra.mxu0 %v2741_v14 }
  0x10   :  { %109 = vmatprep.subr.mxu0 %v2747_v15 }
  0x11   :  { %110 = vmatpush1.msra.mxu0 %v2753_v16 }
  0x12   :  { %144 = vmatmul.mubr.f32.vlgmr.msra.gmra.mxu0 %v2613_v3  ;;  %381 = vmatprep.subr.mxu0 %v2663_v0 }
  0x13   :  { %382 = vmatpush1.msra.mxu0 %v2668_v1  ;;  %429 = vmatprep.mubr.f32.mxu0 %v2613_v3 }
  0x14   :  { %383 = vmatprep.subr.mxu0 %v2673_v2 }
  0x15   :  { %384 = vmatpush1.msra.mxu0 %v2681_v4 }
  0x16   :  { %385 = vmatprep.subr.mxu0 %v2687_v5 }
  0x17   :  { %386 = vmatpush1.msra.mxu0 %v2693_v6 }
  0x18   :  { %387 = vmatprep.subr.mxu0 %v2699_v7 }
  0x19   :  { %388 = vmatpush1.msra.mxu0 %v2705_v8 }
  0x1a   :  { %389 = vmatprep.subr.mxu0 %v2711_v9 }
  0x1b   :  { %390 = vmatpush1.msra.mxu0 %v2717_v10 }
  0x1c   :  { %391 = vmatprep.subr.mxu0 %v2723_v11 }
  0x1d   :  { %392 = vmatpush1.msra.mxu0 %v2729_v12 }
  0x1e   :  { %393 = vmatprep.subr.mxu0 %v2735_v13 }
  0x1f   :  { %394 = vmatpush1.msra.mxu0 %v2741_v14 }
  0x20   :  { %395 = vmatprep.subr.mxu0 %v2747_v15 }
  0x21   :  { %396 = vmatpush1.msra.mxu0 %v2753_v16 }
  0x22   :  { %649 = vmatprep.subr.mxu0 %v2663_v0 }
  0xd2   :  { %v145_v24 = vpop.f32.mrf.mxu0 }
  0xd3   :  { %v150_v26 = vadd.f32 %v145_v24, %v73_v22  ;;  %v2870_v24 = vld [vmem:[%s3482_s6] ss:$0 sm:$0xff] }
  0xd4   :  { %v147_v28 = vpop.f32.mrf.mxu0  ;;  %67 = vst [vmem:[%s3483_s7 + $0x10] sm:$0xff] %v2870_v24  ;;  %68 = vst [vmem:[%s3483_s7 + $0x18] sm:$0xff] %v2870_v24 }
  0xd5   :  { %v163_v29 = vmul.f32 %v2783_v23, %v150_v26  ;;  %v151_v30 = vadd.f32 %v147_v28, %v74_v25  ;;  %69 = vst [vmem:[%s3483_s7 + $0x20] sm:$0xff] %v2870_v24  ;;  %70 = vst [vmem:[%s3483_s7 + $0x28] sm:$0xff] %v2870_v24 }
  0xd7   :  { %2561 = vtanh.f32 %v163_v29  ;;  %v164_v31 = vmul.f32 %v2788_v27, %v151_v30 }
  0xd9   :  { %2563 = vtanh.f32 %v164_v31  ;;  %v2236_v31 = vld [vmem:[%s3478_s0 + $0x10] sm:$0xff] }
  0xe4   :  { %v2562_v34 = vpop.eup %2561 }
  0xe5   :  { %v167_v35 = vmul.f32 %v2562_v34, %v2783_v23  ;;  %v2237_v34 = vld [vmem:[%s3478_s0 + $0x18] sm:$0xff] }
  0xe6   :  { %v2564_v38 = vpop.eup %2563 }
  0xe7   :  { %v168_v39 = vmul.f32 %v2564_v38, %v2788_v27  ;;  %v180_v40 = vadd.f32 %v2796_v36, %v167_v35 }
  0xe9   :  { %v181_v41 = vadd.f32 %v2798_v37, %v168_v39  ;;  %v182_v48 = vmul.f32 0.0, %v180_v40 }
  0xeb   :  { %v183_v42 = vmul.f32 %v181_v41, %v180_v40 }
  0xed   :  { %185 = vrot.lane.b32.xlu0 %v183_v42, %s2615_s16 }
  0xf1   :  { %192 = vperm.xlu0 %2560, %v44_v43  }
 0x15f   :  { %v186_v49 = vpop.permute.xlu0 %185 }
 0x160   :  { %v188_v54 = vadd.f32 %v186_v49, %v182_v48 }
 0x162   :  { %2565 = vtanh.f32 %v188_v54 }
 0x16c   :  { %v2888_v25 = vpop.permute.xlu0 %192 }
 0x16d   :  { %vm194_vm2 = vcmp.lt.s32.totalorder %v2828_v51, %v2888_v25  ;;  %vm729_vm6 = vcmp.lt.s32.totalorder %v2837_v59, %v2888_v25  ;;  %vm998_vm7 = vcmp.lt.s32.totalorder %v2840_v60, %v2888_v25  ;;  %vm1267_vm8 = vcmp.lt.s32.totalorder %v2843_v61, %v2888_v25 }
 0x16e   :  { %vm1534_vm9 = vcmp.lt.s32.totalorder %v2846_v62, %v2888_v25  ;;  %vm1801_vm10 = vcmp.lt.s32.totalorder %v2859_v19, %v2888_v25  ;;  %vm2068_vm11 = vcmp.lt.s32.totalorder %v2862_v20, %v2888_v25  ;;  %v2612_v20 = vld [vmem:[%s3481_s5] sm:$0xff] }
 0x16f   :  { %v2566_v21 = vpop.eup %2565 }
 0x170   :  { %v190_v22 = vmul.f32 %v2566_v21, %v181_v41 }
 0x172   :  { %196 = vrot.lane.b32.xlu1 %v190_v22, %s2615_s16  ;;  %v2939_v22 = vadd.s32 %v2830_v53, %v2828_v51  ;;  %v2245_v51 = vld [vmem:[%s3478_s0 + $0x20] sm:$0xff] }
 0x174   :  { %vm460_vm5 = vcmp.lt.s32.totalorder %v2939_v22, %v2888_v25 }
 0x176   :  { %201 = vrot.lane.b32.xlu1 %v188_v54, %s2615_s16 }
 0x1e4   :  { %v197_v26 = vpop.permute.xlu1 %196 }
 0x1e5   :  { %v2892_v28 = vsel %vm194_vm2, %v197_v26, 0.0 }
 0x1e6   :  { %2386 = vmatmul.mubr.msk.f32.vlgmr.msra.gmra.mxu1 %vm206_vm3, %v2892_v28  ;;  %2238 = vmatmul.mubr.msk.f32.vlgmr.msra.gmra.mxu0 %vm75_vm4, %v2892_v28 }
 0x1e7   :  { %650 = vmatpush1.msra.mxu0 %v2668_v1  ;;  %697 = vmatprep.mubr.f32.mxu0 %v2613_v3 }
 0x1e8   :  { %v202_v29 = vpop.permute.xlu1 %201  ;;  %651 = vmatprep.subr.mxu0 %v2673_v2  ;;  %2396 = vmatprep.mubr.msk.f32.mxu1 %vm2618_vm1, %v2613_v3 }
 0x1e9   :  { %v204_v30 = vsel %vm194_vm2, %v202_v29, 0.0  ;;  %652 = vmatpush1.msra.mxu0 %v2681_v4 }
 0x1ea   :  { %447 = vrot.lane.b32.xlu1 %v204_v30, %s2615_s16  ;;  %653 = vmatprep.subr.mxu0 %v2687_v5 }
 0x1eb   :  { %654 = vmatpush1.msra.mxu0 %v2693_v6 }
 0x1ec   :  { %655 = vmatprep.subr.mxu0 %v2699_v7 }
 0x1ed   :  { %656 = vmatpush1.msra.mxu0 %v2705_v8 }
 0x1ee   :  { %657 = vmatprep.subr.mxu0 %v2711_v9 }
 0x1ef   :  { %658 = vmatpush1.msra.mxu0 %v2717_v10 }
 0x1f0   :  { %659 = vmatprep.subr.mxu0 %v2723_v11 }
 0x1f1   :  { %660 = vmatpush1.msra.mxu0 %v2729_v12 }
 0x1f2   :  { %661 = vmatprep.subr.mxu0 %v2735_v13 }
 0x1f3   :  { %662 = vmatpush1.msra.mxu0 %v2741_v14 }
 0x1f4   :  { %663 = vmatprep.subr.mxu0 %v2747_v15 }
 0x1f5   :  { %664 = vmatpush1.msra.mxu0 %v2753_v16 }
 0x1f6   :  { %918 = vmatprep.subr.mxu0 %v2663_v0 }
 0x25c   :  { %v448_v56 = vpop.permute.xlu1 %447 }
 0x2a6   :  { %v276_v32 = vpop.f32.mrf.mxu1  ;;  %v431_v33 = vpop.f32.mrf.mxu0 }
 0x2a7   :  { %v280_v35 = vadd.f32 %v2870_v24, %v276_v32  ;;  %v436_v38 = vadd.f32 %v2236_v31, %v431_v33 }
 0x2a8   :  { %v2387_v39 = vpop.f32.mrf.mxu1  ;;  %v433_v40 = vpop.f32.mrf.mxu0 }
 0x2a9   :  { %281 = vst [vmem:[%s3483_s7] sm:$0xff] %v280_v35  ;;  %v438_v41 = vmul.f32 %v436_v38, %v2783_v23  ;;  %v437_v42 = vadd.f32 %v2237_v34, %v433_v40 }
 0x2ab   :  { %2567 = vtanh.f32 %v438_v41  ;;  %v439_v43 = vmul.f32 %v437_v42, %v2788_v27 }
 0x2ad   :  { %2569 = vtanh.f32 %v439_v43 }
 0x2b8   :  { %v2568_v47 = vpop.eup %2567 }
 0x2b9   :  { %v442_v48 = vmul.f32 %v2568_v47, %v2783_v23 }
 0x2ba   :  { %v2570_v49 = vpop.eup %2569 }
 0x2bb   :  { %v443_v50 = vmul.f32 %v2570_v49, %v2788_v27  ;;  %v444_v52 = vadd.f32 %v442_v48, %v2796_v36 }
 0x2bd   :  { %v445_v54 = vadd.f32 %v443_v50, %v2798_v37  ;;  %v450_v57 = vmul.f32 %v448_v56, %v444_v52 }
 0x2bf   :  { %v451_v55 = vmul.f32 %v445_v54, %v444_v52 }
 0x2c1   :  { %453 = vrot.lane.b32.xlu0 %v451_v55, %s2615_s16 }
 0x333   :  { %v454_v58 = vpop.permute.xlu0 %453 }
 0x334   :  { %v456_v63 = vadd.f32 %v454_v58, %v450_v57 }
 0x336   :  { %2571 = vtanh.f32 %v456_v63  ;;  %467 = vrot.lane.b32.xlu0 %v456_v63, %s2615_s16 }
 0x343   :  { %v2572_v17 = vpop.eup %2571 }
 0x344   :  { %v458_v21 = vmul.f32 %v2572_v17, %v445_v54 }
 0x346   :  { %462 = vrot.lane.b32.xlu1 %v458_v21, %s2615_s16 }
 0x3a8   :  { %v468_v26 = vpop.permute.xlu0 %467 }
 0x3a9   :  { %v470_v29 = vsel %vm460_vm5, %v468_v26, %v204_v30  ;;  %v2246_v30 = vld [vmem:[%s3478_s0 + $0x28] sm:$0xff]  ;;  %v2254_v26 = vld [vmem:[%s3478_s0 + $0x30] sm:$0xff] }
 0x3aa   :  { %715 = vrot.lane.b32.xlu1 %v470_v29, %s2615_s16 }
 0x3b8   :  { %v2947_v31 = vpop.permute.xlu1 %462 }
 0x3b9   :  { %v465_v32 = vsel %vm460_vm5, %v2947_v31, %v2892_v28  ;;  %v471_v59 = vsel %vm460_vm5, %v2947_v31, 0.0  ;;  %v2291_v31 = vld [vmem:[%s3478_s0 + $0x78] sm:$0xff] }
 0x3ba   :  { %2247 = vmatmul.mubr.msk.f32.vlgmr.msra.gmra.mxu0 %vm75_vm4, %v465_v32 }
 0x3bb   :  { %919 = vmatpush1.msra.mxu0 %v2668_v1  ;;  %966 = vmatprep.mubr.f32.mxu0 %v2613_v3 }
 0x3bc   :  { %920 = vmatprep.subr.mxu0 %v2673_v2 }
 0x3bd   :  { %921 = vmatpush1.msra.mxu0 %v2681_v4 }
 0x3be   :  { %922 = vmatprep.subr.mxu0 %v2687_v5 }
 0x3bf   :  { %923 = vmatpush1.msra.mxu0 %v2693_v6 }
 0x3c0   :  { %924 = vmatprep.subr.mxu0 %v2699_v7 }
 0x3c1   :  { %925 = vmatpush1.msra.mxu0 %v2705_v8 }
 0x3c2   :  { %926 = vmatprep.subr.mxu0 %v2711_v9 }
 0x3c3   :  { %927 = vmatpush1.msra.mxu0 %v2717_v10 }
 0x3c4   :  { %928 = vmatprep.subr.mxu0 %v2723_v11 }
 0x3c5   :  { %929 = vmatpush1.msra.mxu0 %v2729_v12 }
 0x3c6   :  { %930 = vmatprep.subr.mxu0 %v2735_v13 }
 0x3c7   :  { %931 = vmatpush1.msra.mxu0 %v2741_v14 }
 0x3c8   :  { %932 = vmatprep.subr.mxu0 %v2747_v15 }
 0x3c9   :  { %933 = vmatpush1.msra.mxu0 %v2753_v16 }
 0x3ca   :  { %1187 = vmatprep.subr.mxu0 %v2663_v0 }
 0x41c   :  { %v716_v50 = vpop.permute.xlu1 %715 }
 0x47a   :  { %v699_v53 = vpop.f32.mrf.mxu0 }
 0x47b   :  { %v704_v33 = vadd.f32 %v2245_v51, %v699_v53 }
 0x47c   :  { %v701_v34 = vpop.f32.mrf.mxu0 }
 0x47d   :  { %v706_v35 = vmul.f32 %v704_v33, %v2783_v23  ;;  %v705_v38 = vadd.f32 %v2246_v30, %v701_v34 }
 0x47f   :  { %2573 = vtanh.f32 %v706_v35  ;;  %v707_v39 = vmul.f32 %v705_v38, %v2788_v27 }
 0x481   :  { %2575 = vtanh.f32 %v707_v39 }
 0x48c   :  { %v2574_v40 = vpop.eup %2573 }
 0x48d   :  { %v710_v41 = vmul.f32 %v2574_v40, %v2783_v23 }
 0x48e   :  { %v2576_v42 = vpop.eup %2575 }
 0x48f   :  { %v711_v43 = vmul.f32 %v2576_v42, %v2788_v27  ;;  %v712_v47 = vadd.f32 %v710_v41, %v2796_v36 }
 0x491   :  { %v713_v48 = vadd.f32 %v711_v43, %v2798_v37  ;;  %v718_v52 = vmul.f32 %v716_v50, %v712_v47 }
 0x493   :  { %v719_v49 = vmul.f32 %v713_v48, %v712_v47 }
 0x495   :  { %721 = vrot.lane.b32.xlu0 %v719_v49, %s2615_s16 }
 0x507   :  { %v722_v54 = vpop.permute.xlu0 %721 }
 0x508   :  { %v724_v55 = vadd.f32 %v722_v54, %v718_v52 }
 0x50a   :  { %2577 = vtanh.f32 %v724_v55  ;;  %736 = vrot.lane.b32.xlu0 %v724_v55, %s2615_s16 }
 0x517   :  { %v2578_v56 = vpop.eup %2577 }
 0x518   :  { %v726_v57 = vmul.f32 %v2578_v56, %v713_v48 }
 0x51a   :  { %731 = vrot.lane.b32.xlu1 %v726_v57, %s2615_s16 }
 0x57c   :  { %v737_v58 = vpop.permute.xlu0 %736 }
 0x57d   :  { %v739_v63 = vsel %vm729_vm6, %v737_v58, %v470_v29 }
 0x57e   :  { %984 = vrot.lane.b32.xlu1 %v739_v63, %s2615_s16 }
 0x58c   :  { %v2993_v17 = vpop.permute.xlu1 %731 }
 0x58d   :  { %v734_v21 = vsel %vm729_vm6, %v2993_v17, %v465_v32  ;;  %v2255_v32 = vld [vmem:[%s3478_s0 + $0x38] sm:$0xff] }
 0x58e   :  { %2256 = vmatmul.mubr.msk.f32.vlgmr.msra.gmra.mxu0 %vm75_vm4, %v734_v21 }
 0x58f   :  { %1188 = vmatpush1.msra.mxu0 %v2668_v1  ;;  %1235 = vmatprep.mubr.f32.mxu0 %v2613_v3 }
 0x590   :  { %1189 = vmatprep.subr.mxu0 %v2673_v2 }
 0x591   :  { %1190 = vmatpush1.msra.mxu0 %v2681_v4 }
 0x592   :  { %1191 = vmatprep.subr.mxu0 %v2687_v5 }
 0x593   :  { %1192 = vmatpush1.msra.mxu0 %v2693_v6 }
 0x594   :  { %1193 = vmatprep.subr.mxu0 %v2699_v7 }
 0x595   :  { %1194 = vmatpush1.msra.mxu0 %v2705_v8 }
 0x596   :  { %1195 = vmatprep.subr.mxu0 %v2711_v9 }
 0x597   :  { %1196 = vmatpush1.msra.mxu0 %v2717_v10 }
 0x598   :  { %1197 = vmatprep.subr.mxu0 %v2723_v11 }
 0x599   :  { %1198 = vmatpush1.msra.mxu0 %v2729_v12 }
 0x59a   :  { %1199 = vmatprep.subr.mxu0 %v2735_v13 }
 0x59b   :  { %1200 = vmatpush1.msra.mxu0 %v2741_v14 }
 0x59c   :  { %1201 = vmatprep.subr.mxu0 %v2747_v15 }
 0x59d   :  { %1202 = vmatpush1.msra.mxu0 %v2753_v16 }
 0x59e   :  { %1454 = vmatprep.subr.mxu0 %v2663_v0 }
 0x5f0   :  { %v985_v47 = vpop.permute.xlu1 %984 }
 0x64e   :  { %v968_v29 = vpop.f32.mrf.mxu0 }
 0x64f   :  { %v973_v51 = vadd.f32 %v2254_v26, %v968_v29  ;;  %v2264_v26 = vld [vmem:[%s3478_s0 + $0x48] sm:$0xff] }
 0x650   :  { %v970_v53 = vpop.f32.mrf.mxu0 }
 0x651   :  { %v975_v30 = vmul.f32 %v973_v51, %v2783_v23  ;;  %v974_v33 = vadd.f32 %v2255_v32, %v970_v53 }
 0x653   :  { %2579 = vtanh.f32 %v975_v30  ;;  %v976_v34 = vmul.f32 %v974_v33, %v2788_v27 }
 0x655   :  { %2581 = vtanh.f32 %v976_v34 }
 0x660   :  { %v2580_v35 = vpop.eup %2579 }
 0x661   :  { %v979_v38 = vmul.f32 %v2580_v35, %v2783_v23 }
 0x662   :  { %v2582_v39 = vpop.eup %2581 }
 0x663   :  { %v980_v40 = vmul.f32 %v2582_v39, %v2788_v27  ;;  %v981_v41 = vadd.f32 %v979_v38, %v2796_v36 }
 0x665   :  { %v982_v42 = vadd.f32 %v980_v40, %v2798_v37  ;;  %v987_v48 = vmul.f32 %v985_v47, %v981_v41 }
 0x667   :  { %v988_v43 = vmul.f32 %v982_v42, %v981_v41 }
 0x669   :  { %990 = vrot.lane.b32.xlu0 %v988_v43, %s2615_s16 }
 0x6db   :  { %v991_v49 = vpop.permute.xlu0 %990 }
 0x6dc   :  { %v993_v50 = vadd.f32 %v991_v49, %v987_v48 }
 0x6de   :  { %2583 = vtanh.f32 %v993_v50  ;;  %1005 = vrot.lane.b32.xlu0 %v993_v50, %s2615_s16 }
 0x6eb   :  { %v2584_v52 = vpop.eup %2583 }
 0x6ec   :  { %v995_v54 = vmul.f32 %v2584_v52, %v982_v42 }
 0x6ee   :  { %1000 = vrot.lane.b32.xlu1 %v995_v54, %s2615_s16 }
 0x750   :  { %v1006_v55 = vpop.permute.xlu0 %1005 }
 0x751   :  { %v1008_v56 = vsel %vm998_vm7, %v1006_v55, %v739_v63  ;;  %v2263_v63 = vld [vmem:[%s3478_s0 + $0x40] sm:$0xff] }
 0x752   :  { %1253 = vrot.lane.b32.xlu1 %v1008_v56, %s2615_s16 }
 0x760   :  { %v3038_v57 = vpop.permute.xlu1 %1000 }
 0x761   :  { %v1003_v58 = vsel %vm998_vm7, %v3038_v57, %v734_v21 }
 0x762   :  { %2265 = vmatmul.mubr.msk.f32.vlgmr.msra.gmra.mxu0 %vm75_vm4, %v1003_v58 }
 0x763   :  { %1455 = vmatpush1.msra.mxu0 %v2668_v1  ;;  %1502 = vmatprep.mubr.f32.mxu0 %v2613_v3 }
 0x764   :  { %1456 = vmatprep.subr.mxu0 %v2673_v2 }
 0x765   :  { %1457 = vmatpush1.msra.mxu0 %v2681_v4 }
 0x766   :  { %1458 = vmatprep.subr.mxu0 %v2687_v5 }
 0x767   :  { %1459 = vmatpush1.msra.mxu0 %v2693_v6 }
 0x768   :  { %1460 = vmatprep.subr.mxu0 %v2699_v7 }
 0x769   :  { %1461 = vmatpush1.msra.mxu0 %v2705_v8 }
 0x76a   :  { %1462 = vmatprep.subr.mxu0 %v2711_v9 }
 0x76b   :  { %1463 = vmatpush1.msra.mxu0 %v2717_v10 }
 0x76c   :  { %1464 = vmatprep.subr.mxu0 %v2723_v11 }
 0x76d   :  { %1465 = vmatpush1.msra.mxu0 %v2729_v12 }
 0x76e   :  { %1466 = vmatprep.subr.mxu0 %v2735_v13 }
 0x76f   :  { %1467 = vmatpush1.msra.mxu0 %v2741_v14 }
 0x770   :  { %1468 = vmatprep.subr.mxu0 %v2747_v15 }
 0x771   :  { %1469 = vmatpush1.msra.mxu0 %v2753_v16 }
 0x772   :  { %1721 = vmatprep.subr.mxu0 %v2663_v0 }
 0x7c4   :  { %v1254_v42 = vpop.permute.xlu1 %1253 }
 0x822   :  { %v1237_v21 = vpop.f32.mrf.mxu0 }
 0x823   :  { %v1242_v29 = vadd.f32 %v2263_v63, %v1237_v21  ;;  %v2273_v21 = vld [vmem:[%s3478_s0 + $0x58] sm:$0xff] }
 0x824   :  { %v1239_v32 = vpop.f32.mrf.mxu0 }
 0x825   :  { %v1244_v51 = vmul.f32 %v1242_v29, %v2783_v23  ;;  %v1243_v53 = vadd.f32 %v2264_v26, %v1239_v32 }
 0x827   :  { %2585 = vtanh.f32 %v1244_v51  ;;  %v1245_v30 = vmul.f32 %v1243_v53, %v2788_v27 }
 0x829   :  { %2587 = vtanh.f32 %v1245_v30 }
 0x834   :  { %v2586_v33 = vpop.eup %2585 }
 0x835   :  { %v1248_v34 = vmul.f32 %v2586_v33, %v2783_v23 }
 0x836   :  { %v2588_v35 = vpop.eup %2587 }
 0x837   :  { %v1249_v38 = vmul.f32 %v2588_v35, %v2788_v27  ;;  %v1250_v39 = vadd.f32 %v1248_v34, %v2796_v36 }
 0x839   :  { %v1251_v40 = vadd.f32 %v1249_v38, %v2798_v37  ;;  %v1256_v43 = vmul.f32 %v1254_v42, %v1250_v39 }
 0x83b   :  { %v1257_v41 = vmul.f32 %v1251_v40, %v1250_v39 }
 0x83d   :  { %1259 = vrot.lane.b32.xlu0 %v1257_v41, %s2615_s16 }
 0x8af   :  { %v1260_v47 = vpop.permute.xlu0 %1259 }
 0x8b0   :  { %v1262_v48 = vadd.f32 %v1260_v47, %v1256_v43 }
 0x8b2   :  { %2589 = vtanh.f32 %v1262_v48  ;;  %1274 = vrot.lane.b32.xlu0 %v1262_v48, %s2615_s16 }
 0x8bf   :  { %v2590_v49 = vpop.eup %2589 }
 0x8c0   :  { %v1264_v50 = vmul.f32 %v2590_v49, %v1251_v40 }
 0x8c2   :  { %1269 = vrot.lane.b32.xlu1 %v1264_v50, %s2615_s16 }
 0x924   :  { %v1275_v52 = vpop.permute.xlu0 %1274 }
 0x925   :  { %v1277_v54 = vsel %vm1267_vm8, %v1275_v52, %v1008_v56  ;;  %v2272_v56 = vld [vmem:[%s3478_s0 + $0x50] sm:$0xff] }
 0x926   :  { %1520 = vrot.lane.b32.xlu1 %v1277_v54, %s2615_s16 }
 0x934   :  { %v3083_v55 = vpop.permute.xlu1 %1269 }
 0x935   :  { %v1272_v63 = vsel %vm1267_vm8, %v3083_v55, %v1003_v58 }
 0x936   :  { %2274 = vmatmul.mubr.msk.f32.vlgmr.msra.gmra.mxu0 %vm75_vm4, %v1272_v63 }
 0x937   :  { %1722 = vmatpush1.msra.mxu0 %v2668_v1  ;;  %1769 = vmatprep.mubr.f32.mxu0 %v2613_v3 }
 0x938   :  { %1723 = vmatprep.subr.mxu0 %v2673_v2 }
 0x939   :  { %1724 = vmatpush1.msra.mxu0 %v2681_v4 }
 0x93a   :  { %1725 = vmatprep.subr.mxu0 %v2687_v5 }
 0x93b   :  { %1726 = vmatpush1.msra.mxu0 %v2693_v6 }
 0x93c   :  { %1727 = vmatprep.subr.mxu0 %v2699_v7 }
 0x93d   :  { %1728 = vmatpush1.msra.mxu0 %v2705_v8 }
 0x93e   :  { %1729 = vmatprep.subr.mxu0 %v2711_v9 }
 0x93f   :  { %1730 = vmatpush1.msra.mxu0 %v2717_v10 }
 0x940   :  { %1731 = vmatprep.subr.mxu0 %v2723_v11 }
 0x941   :  { %1732 = vmatpush1.msra.mxu0 %v2729_v12 }
 0x942   :  { %1733 = vmatprep.subr.mxu0 %v2735_v13 }
 0x943   :  { %1734 = vmatpush1.msra.mxu0 %v2741_v14 }
 0x944   :  { %1735 = vmatprep.subr.mxu0 %v2747_v15 }
 0x945   :  { %1736 = vmatpush1.msra.mxu0 %v2753_v16 }
 0x946   :  { %1988 = vmatprep.subr.mxu0 %v2663_v0 }
 0x998   :  { %v1521_v40 = vpop.permute.xlu1 %1520 }
 0x9f6   :  { %v1504_v58 = vpop.f32.mrf.mxu0 }
 0x9f7   :  { %v1509_v26 = vadd.f32 %v2272_v56, %v1504_v58 }
 0x9f8   :  { %v1506_v29 = vpop.f32.mrf.mxu0 }
 0x9f9   :  { %v1511_v32 = vmul.f32 %v1509_v26, %v2783_v23  ;;  %v1510_v51 = vadd.f32 %v2273_v21, %v1506_v29  ;;  %v3174_v26 = vld [vmem:[%s3481_s5 + $0x38] sm:$0xff]  ;;  %v3179_v29 = vld [vmem:[%s3481_s5 + $0x30] sm:$0xff] }
 0x9fa   :  { %2389 = vmatpush3.msra.mxu1 %v3174_v26 }
 0x9fb   :  { %2591 = vtanh.f32 %v1511_v32  ;;  %v1512_v53 = vmul.f32 %v1510_v51, %v2788_v27  ;;  %2390 = vmatprep.subr.mxu1 %v2613_v3 }
 0x9fc   :  { %2391 = vmatpush3.msra.mxu1 %v3179_v29 }
 0x9fd   :  { %2593 = vtanh.f32 %v1512_v53  ;;  %2392 = vmatprep.subr.mxu1 %v2613_v3  ;;  %v3189_v53 = vld [vmem:[%s3481_s5 + $0x28] sm:$0xff] }
 0x9fe   :  { %2393 = vmatpush3.msra.mxu1 %v3189_v53 }
 0x9ff   :  { %2394 = vmatprep.subr.mxu1 %v2613_v3 }
 0xa08   :  { %v2592_v30 = vpop.eup %2591 }
 0xa09   :  { %v1515_v0 = vmul.f32 %v2592_v30, %v2783_v23  ;;  %v3194_v30 = vld [vmem:[%s3481_s5 + $0x20] sm:$0xff] }
 0xa0a   :  { %v2594_v33 = vpop.eup %2593  ;;  %2395 = vmatpush3.msra.mxu1 %v3194_v30 }
 0xa0b   :  { %v1516_v34 = vmul.f32 %v2594_v33, %v2788_v27  ;;  %v1517_v35 = vadd.f32 %v1515_v0, %v2796_v36  ;;  %2399 = vmatprep.subr.mxu1 %v2613_v3 }
 0xa0d   :  { %v1518_v38 = vadd.f32 %v1516_v34, %v2798_v37  ;;  %v1523_v41 = vmul.f32 %v1521_v40, %v1517_v35  ;;  %v3213_v34 = vsel %vm729_vm6, %v2993_v17, 0.0 }
 0xa0f   :  { %v1524_v39 = vmul.f32 %v1518_v38, %v1517_v35 }
 0xa11   :  { %1526 = vrot.lane.b32.xlu0 %v1524_v39, %s2615_s16 }
 0xa83   :  { %v1527_v42 = vpop.permute.xlu0 %1526 }
 0xa84   :  { %v1529_v43 = vadd.f32 %v1527_v42, %v1523_v41 }
 0xa86   :  { %2595 = vtanh.f32 %v1529_v43  ;;  %1541 = vrot.lane.b32.xlu0 %v1529_v43, %s2615_s16 }
 0xa93   :  { %v2596_v47 = vpop.eup %2595 }
 0xa94   :  { %v1531_v48 = vmul.f32 %v2596_v47, %v1518_v38 }
 0xa96   :  { %1536 = vrot.lane.b32.xlu1 %v1531_v48, %s2615_s16 }
 0xaf8   :  { %v1542_v49 = vpop.permute.xlu0 %1541 }
 0xaf9   :  { %v3127_v50 = vsel %vm1534_vm9, %v1542_v49, %v1277_v54 }
 0xafa   :  { %1787 = vrot.lane.b32.xlu1 %v3127_v50, %s2615_s16 }
 0xb08   :  { %v3131_v52 = vpop.permute.xlu1 %1536 }
 0xb09   :  { %v3137_v56 = vsel %vm1534_vm9, %v3131_v52, %v1272_v63 }
 0xb0a   :  { %2283 = vmatmul.mubr.msk.f32.vlgmr.msra.gmra.mxu0 %vm75_vm4, %v3137_v56 }
 0xb0b   :  { %1989 = vmatpush1.msra.mxu0 %v2668_v1  ;;  %2036 = vmatprep.mubr.f32.mxu0 %v2613_v3  ;;  %v2281_v1 = vld [vmem:[%s3478_s0 + $0x60] sm:$0xff] }
 0xb0c   :  { %1990 = vmatprep.subr.mxu0 %v2673_v2 }
 0xb0d   :  { %1991 = vmatpush1.msra.mxu0 %v2681_v4  ;;  %v2282_v4 = vld [vmem:[%s3478_s0 + $0x68] sm:$0xff] }
 0xb0e   :  { %1992 = vmatprep.subr.mxu0 %v2687_v5 }
 0xb0f   :  { %1993 = vmatpush1.msra.mxu0 %v2693_v6 }
 0xb10   :  { %1994 = vmatprep.subr.mxu0 %v2699_v7 }
 0xb11   :  { %1995 = vmatpush1.msra.mxu0 %v2705_v8 }
 0xb12   :  { %1996 = vmatprep.subr.mxu0 %v2711_v9 }
 0xb13   :  { %1997 = vmatpush1.msra.mxu0 %v2717_v10 }
 0xb14   :  { %1998 = vmatprep.subr.mxu0 %v2723_v11 }
 0xb15   :  { %1999 = vmatpush1.msra.mxu0 %v2729_v12 }
 0xb16   :  { %2000 = vmatprep.subr.mxu0 %v2735_v13 }
 0xb17   :  { %2001 = vmatpush1.msra.mxu0 %v2741_v14 }
 0xb18   :  { %2002 = vmatprep.subr.mxu0 %v2747_v15 }
 0xb19   :  { %2003 = vmatpush1.msra.mxu0 %v2753_v16 }
 0xb6c   :  { %v1788_v54 = vpop.permute.xlu1 %1787 }
 0xbca   :  { %v1771_v2 = vpop.f32.mrf.mxu0 }
 0xbcb   :  { %v1776_v5 = vadd.f32 %v2281_v1, %v1771_v2 }
 0xbcc   :  { %v1773_v6 = vpop.f32.mrf.mxu0 }
 0xbcd   :  { %v1778_v7 = vmul.f32 %v1776_v5, %v2783_v23  ;;  %v1777_v8 = vadd.f32 %v2282_v4, %v1773_v6  ;;  %v1009_v5 = vsel %vm998_vm7, %v3038_v57, 0.0 }
 0xbcf   :  { %2597 = vtanh.f32 %v1778_v7  ;;  %v1779_v9 = vmul.f32 %v1777_v8, %v2788_v27 }
 0xbd1   :  { %2599 = vtanh.f32 %v1779_v9 }
 0xbdc   :  { %v2598_v10 = vpop.eup %2597 }
 0xbdd   :  { %v1782_v11 = vmul.f32 %v2598_v10, %v2783_v23  ;;  %v1545_v10 = vsel %vm1534_vm9, %v3131_v52, 0.0  ;;  %v2610_v52 = vld [vmem:[%s3481_s5 + $0x8] sm:$0xff] }
 0xbde   :  { %v2600_v12 = vpop.eup %2599 }
 0xbdf   :  { %v1783_v13 = vmul.f32 %v2600_v12, %v2788_v27  ;;  %v1784_v14 = vadd.f32 %v1782_v11, %v2796_v36  ;;  %v2611_v12 = vld [vmem:[%s3481_s5 + $0x18] sm:$0xff] }
 0xbe1   :  { %v1785_v15 = vadd.f32 %v1783_v13, %v2798_v37  ;;  %v1790_v63 = vmul.f32 %v1788_v54, %v1784_v14 }
 0xbe3   :  { %v1791_v16 = vmul.f32 %v1785_v15, %v1784_v14 }
 0xbe5   :  { %1793 = vrot.lane.b32.xlu0 %v1791_v16, %s2615_s16 }
 0xc57   :  { %v1794_v58 = vpop.permute.xlu0 %1793 }
 0xc58   :  { %v1796_v21 = vadd.f32 %v1794_v58, %v1790_v63 }
 0xc5a   :  { %2601 = vtanh.f32 %v1796_v21  ;;  %1808 = vrot.lane.b32.xlu0 %v1796_v21, %s2615_s16 }
 0xc67   :  { %v2602_v32 = vpop.eup %2601 }
 0xc68   :  { %v1798_v51 = vmul.f32 %v2602_v32, %v1785_v15 }
 0xc6a   :  { %1803 = vrot.lane.b32.xlu1 %v1798_v51, %s2615_s16 }
 0xccc   :  { %v1809_v0 = vpop.permute.xlu0 %1808 }
 0xccd   :  { %v1811_v33 = vsel %vm1801_vm10, %v1809_v0, %v3127_v50 }
 0xcce   :  { %2054 = vrot.lane.b32.xlu1 %v1811_v33, %s2615_s16 }
 0xcd2   :  { %284 = vrot.lane.b32.xlu1 %v2892_v28, %s2619_s4  ;;  %v2290_v28 = vld [vmem:[%s3478_s0 + $0x70] sm:$0xff] }
 0xcd6   :  { %820 = vrot.lane.b32.xlu1 %v3213_v34, %s2619_s4 }
 0xcdc   :  { %v1804_v35 = vpop.permute.xlu1 %1803 }
 0xcdd   :  { %v1806_v38 = vsel %vm1801_vm10, %v1804_v35, %v3137_v56 }
 0xcde   :  { %2292 = vmatmul.mubr.msk.f32.vlgmr.msra.gmra.mxu0 %vm75_vm4, %v1806_v38 }
 0xd40   :  { %v2055_v39 = vpop.permute.xlu1 %2054 }
 0xd44   :  { %v285_v40 = vpop.permute.xlu1 %284 }
 0xd45   :  { %2397 = vmatmul.mubr.msk.f32.vlgmr.msra.gmra.mxu1 %vm206_vm3, %v285_v40 }
 0xd46   :  { %2400 = vmatpush3.msra.mxu1 %v2810_v44  ;;  %2407 = vmatprep.mubr.msk.f32.mxu1 %vm2618_vm1, %v2613_v3 }
 0xd47   :  { %2401 = vmatprep.subr.mxu1 %v2613_v3 }
 0xd48   :  { %2402 = vmatpush3.msra.mxu1 %v2815_v45  ;;  %v821_v9 = vpop.permute.xlu1 %820 }
 0xd49   :  { %2403 = vmatprep.subr.mxu1 %v2613_v3 }
 0xd4a   :  { %2404 = vmatpush3.msra.mxu1 %v2822_v46 }
 0xd4b   :  { %2405 = vmatprep.subr.mxu1 %v2613_v3 }
 0xd4c   :  { %2406 = vmatpush3.msra.mxu1 %v2853_v18 }
 0xd4d   :  { %2408 = vmatmul.mubr.msk.f32.vlgmr.msra.gmra.mxu1 %vm206_vm3, %v471_v59  ;;  %2410 = vmatprep.subr.mxu1 %v2613_v3 }
 0xd4e   :  { %2411 = vmatpush3.msra.mxu1 %v3174_v26  ;;  %2418 = vmatprep.mubr.msk.f32.mxu1 %vm2618_vm1, %v2613_v3 }
 0xd4f   :  { %2412 = vmatprep.subr.mxu1 %v2613_v3 }
 0xd50   :  { %2413 = vmatpush3.msra.mxu1 %v3179_v29 }
 0xd51   :  { %2414 = vmatprep.subr.mxu1 %v2613_v3 }
 0xd52   :  { %2415 = vmatpush3.msra.mxu1 %v3189_v53 }
 0xd53   :  { %2416 = vmatprep.subr.mxu1 %v2613_v3 }
 0xd54   :  { %2417 = vmatpush3.msra.mxu1 %v3194_v30 }
 0xd55   :  { %2421 = vmatprep.subr.mxu1 %v2613_v3 }
 0xd9e   :  { %v2038_v22 = vpop.f32.mrf.mxu0 }
 0xd9f   :  { %v2043_v17 = vadd.f32 %v2290_v28, %v2038_v22 }
 0xda0   :  { %v2040_v41 = vpop.f32.mrf.mxu0 }
 0xda1   :  { %v2045_v42 = vmul.f32 %v2043_v17, %v2783_v23  ;;  %v2044_v43 = vadd.f32 %v2291_v31, %v2040_v41  ;;  %v2248_v17 = vld [vmem:[%s3483_s7 + $0x10] sm:$0xff] }
 0xda3   :  { %2603 = vtanh.f32 %v2045_v42  ;;  %v2046_v47 = vmul.f32 %v2044_v43, %v2788_v27 }
 0xda5   :  { %2605 = vtanh.f32 %v2046_v47 }
 0xdb0   :  { %v2604_v48 = vpop.eup %2603 }
 0xdb1   :  { %v2049_v49 = vmul.f32 %v2604_v48, %v2783_v23  ;;  %v3271_v23 = vsel %vm1267_vm8, %v3083_v55, 0.0 }
 0xdb2   :  { %v2606_v50 = vpop.eup %2605 }
 0xdb3   :  { %v2050_v56 = vmul.f32 %v2606_v50, %v2788_v27  ;;  %v2051_v1 = vadd.f32 %v2049_v49, %v2796_v36  ;;  %v3278_v27 = vsel %vm1801_vm10, %v1804_v35, 0.0 }
 0xdb5   :  { %v2052_v2 = vadd.f32 %v2050_v56, %v2798_v37  ;;  %v2057_v61 = vmul.f32 %v2055_v39, %v2051_v1  ;;  %v2251_v39 = vld [vmem:[%s3483_s7 + $0x28] sm:$0xff] }
 0xdb7   :  { %v2058_v4 = vmul.f32 %v2052_v2, %v2051_v1 }
 0xdb9   :  { %2060 = vrot.lane.b32.xlu0 %v2058_v4, %s2615_s16 }
 0xdbd   :  { %551 = vrot.lane.b32.xlu0 %v471_v59, %s2619_s4 }
 0xdc1   :  { %1089 = vrot.lane.b32.xlu0 %v1009_v5, %s2619_s4 }
 0xdc5   :  { %1356 = vrot.lane.b32.xlu0 %v3271_v23, %s2619_s4 }
 0xdc9   :  { %1890 = vrot.lane.b32.xlu0 %v3278_v27, %s2619_s4 }
 0xe05   :  { %v3282_v36 = vpop.f32.mrf.mxu1 }
 0xe07   :  { %v2398_v37 = vpop.f32.mrf.mxu1 }
 0xe0d   :  { %v3284_v60 = vpop.f32.mrf.mxu1 }
 0xe0e   :  { %v547_v1 = vadd.f32 %v2870_v24, %v3284_v60  ;;  %v2150_v60 = vld [vmem:[%s3483_s7] sm:$0xff] }
 0xe0f   :  { %v2409_v57 = vpop.f32.mrf.mxu1 }
 0xe2b   :  { %v2061_v55 = vpop.permute.xlu0 %2060 }
 0xe2c   :  { %v2063_v6 = vadd.f32 %v2061_v55, %v2057_v61 }
 0xe2e   :  { %2607 = vtanh.f32 %v2063_v6 }
 0xe2f   :  { %v552_v7 = vpop.permute.xlu0 %551 }
 0xe30   :  { %2419 = vmatmul.mubr.msk.f32.vlgmr.msra.gmra.mxu1 %vm206_vm3, %v552_v7 }
 0xe31   :  { %2422 = vmatpush3.msra.mxu1 %v2810_v44  ;;  %2429 = vmatprep.mubr.msk.f32.mxu1 %vm2618_vm1, %v2613_v3 }
 0xe32   :  { %2423 = vmatprep.subr.mxu1 %v2613_v3 }
 0xe33   :  { %2424 = vmatpush3.msra.mxu1 %v2815_v45  ;;  %v1090_v62 = vpop.permute.xlu0 %1089 }
 0xe34   :  { %2425 = vmatprep.subr.mxu1 %v2613_v3 }
 0xe35   :  { %2426 = vmatpush3.msra.mxu1 %v2822_v46 }
 0xe36   :  { %2427 = vmatprep.subr.mxu1 %v2613_v3 }
 0xe37   :  { %2428 = vmatpush3.msra.mxu1 %v2853_v18 }
 0xe38   :  { %2430 = vmatmul.mubr.msk.f32.vlgmr.msra.gmra.mxu1 %vm206_vm3, %v3213_v34  ;;  %2432 = vmatprep.subr.mxu1 %v2613_v3 }
 0xe39   :  { %2433 = vmatpush3.msra.mxu1 %v3174_v26  ;;  %2440 = vmatprep.mubr.msk.f32.mxu1 %vm2618_vm1, %v2613_v3 }
 0xe3a   :  { %2434 = vmatprep.subr.mxu1 %v2613_v3 }
 0xe3b   :  { %v2608_v19 = vpop.eup %2607  ;;  %2435 = vmatpush3.msra.mxu1 %v3179_v29 }
 0xe3c   :  { %2436 = vmatprep.subr.mxu1 %v2613_v3  ;;  %v2065_v8 = vmul.f32 %v2608_v19, %v2052_v2 }
 0xe3d   :  { %2437 = vmatpush3.msra.mxu1 %v3189_v53 }
 0xe3e   :  { %2438 = vmatprep.subr.mxu1 %v2613_v3  ;;  %2070 = vrot.lane.b32.xlu1 %v2065_v8, %s2615_s16 }
 0xe3f   :  { %2439 = vmatpush3.msra.mxu1 %v3194_v30 }
 0xe40   :  { %2441 = vmatmul.mubr.msk.f32.vlgmr.msra.gmra.mxu1 %vm206_vm3, %v821_v9  ;;  %2443 = vmatprep.subr.mxu1 %v2613_v3 }
 0xe41   :  { %2444 = vmatpush3.msra.mxu1 %v2810_v44  ;;  %2451 = vmatprep.mubr.msk.f32.mxu1 %vm2618_vm1, %v2613_v3 }
 0xe42   :  { %2445 = vmatprep.subr.mxu1 %v2613_v3  ;;  %1623 = vrot.lane.b32.xlu1 %v1545_v10, %s2619_s4 }
 0xe43   :  { %2446 = vmatpush3.msra.mxu1 %v2815_v45 }
 0xe44   :  { %2447 = vmatprep.subr.mxu1 %v2613_v3 }
 0xe45   :  { %2448 = vmatpush3.msra.mxu1 %v2822_v46 }
 0xe46   :  { %2449 = vmatprep.subr.mxu1 %v2613_v3 }
 0xe47   :  { %2450 = vmatpush3.msra.mxu1 %v2853_v18 }
 0xe48   :  { %2452 = vmatmul.mubr.msk.f32.vlgmr.msra.gmra.mxu1 %vm206_vm3, %v1009_v5  ;;  %2454 = vmatprep.subr.mxu1 %v2613_v3 }
 0xe49   :  { %2455 = vmatpush3.msra.mxu1 %v3174_v26  ;;  %2462 = vmatprep.mubr.msk.f32.mxu1 %vm2618_vm1, %v2613_v3 }
 0xe4a   :  { %2456 = vmatprep.subr.mxu1 %v2613_v3 }
 0xe4b   :  { %2457 = vmatpush3.msra.mxu1 %v3179_v29 }
 0xe4c   :  { %2458 = vmatprep.subr.mxu1 %v2613_v3 }
 0xe4d   :  { %2459 = vmatpush3.msra.mxu1 %v3189_v53 }
 0xe4e   :  { %2460 = vmatprep.subr.mxu1 %v2613_v3 }
 0xe4f   :  { %2461 = vmatpush3.msra.mxu1 %v3194_v30 }
 0xe50   :  { %2463 = vmatmul.mubr.msk.f32.vlgmr.msra.gmra.mxu1 %vm206_vm3, %v1090_v62  ;;  %2465 = vmatprep.subr.mxu1 %v2613_v3 }
 0xe51   :  { %2466 = vmatpush3.msra.mxu1 %v2810_v44  ;;  %2473 = vmatprep.mubr.msk.f32.mxu1 %vm2618_vm1, %v2613_v3 }
 0xe52   :  { %2467 = vmatprep.subr.mxu1 %v2613_v3 }
 0xe53   :  { %2468 = vmatpush3.msra.mxu1 %v2815_v45  ;;  %v1357_v45 = vpop.permute.xlu0 %1356 }
 0xe54   :  { %2469 = vmatprep.subr.mxu1 %v2613_v3 }
 0xe55   :  { %2470 = vmatpush3.msra.mxu1 %v2822_v46  ;;  %v2609_v46 = vld [vmem:[%s3481_s5 + $0x10] sm:$0xff] }
 0xe56   :  { %2471 = vmatprep.subr.mxu1 %v2613_v3 }
 0xe57   :  { %2472 = vmatpush3.msra.mxu1 %v2853_v18  ;;  %v1891_v25 = vpop.permute.xlu0 %1890 }
 0xe58   :  { %2474 = vmatmul.mubr.msk.f32.vlgmr.msra.gmra.mxu1 %vm206_vm3, %v3271_v23  ;;  %2476 = vmatprep.subr.mxu1 %v2613_v3  ;;  %v358_v23 = vadd.f32 %v2870_v24, %v3282_v36 }
 0xe59   :  { %2477 = vmatpush3.msra.mxu1 %v3174_v26  ;;  %2484 = vmatprep.mubr.msk.f32.mxu1 %vm2618_vm1, %v2613_v3 }
 0xe5a   :  { %2478 = vmatprep.subr.mxu1 %v2613_v3 }
 0xe5b   :  { %2479 = vmatpush3.msra.mxu1 %v3179_v29 }
 0xe5c   :  { %2480 = vmatprep.subr.mxu1 %v2613_v3 }
 0xe5d   :  { %2481 = vmatpush3.msra.mxu1 %v3189_v53 }
 0xe5e   :  { %2482 = vmatprep.subr.mxu1 %v2613_v3 }
 0xe5f   :  { %2483 = vmatpush3.msra.mxu1 %v3194_v30 }
 0xe60   :  { %2485 = vmatmul.mubr.msk.f32.vlgmr.msra.gmra.mxu1 %vm206_vm3, %v1357_v45  ;;  %2487 = vmatprep.subr.mxu1 %v2613_v3 }
 0xe61   :  { %2488 = vmatpush3.msra.mxu1 %v2810_v44  ;;  %2495 = vmatprep.mubr.msk.f32.mxu1 %vm2618_vm1, %v2613_v3 }
 0xe62   :  { %2489 = vmatprep.subr.mxu1 %v2613_v3 }
 0xe63   :  { %2490 = vmatpush3.msra.mxu1 %v2609_v46 }
 0xe64   :  { %2491 = vmatprep.subr.mxu1 %v2613_v3 }
 0xe65   :  { %2492 = vmatpush3.msra.mxu1 %v2610_v52 }
 0xe66   :  { %2493 = vmatprep.subr.mxu1 %v2613_v3 }
 0xe67   :  { %2494 = vmatpush3.msra.mxu1 %v2853_v18 }
 0xe68   :  { %2496 = vmatmul.mubr.msk.f32.vlgmr.msra.gmra.mxu1 %vm206_vm3, %v1545_v10  ;;  %2498 = vmatprep.subr.mxu1 %v2613_v3 }
 0xe69   :  { %2499 = vmatpush3.msra.mxu1 %v3174_v26  ;;  %2506 = vmatprep.mubr.msk.f32.mxu1 %vm2618_vm1, %v2613_v3 }
 0xe6a   :  { %2500 = vmatprep.subr.mxu1 %v2613_v3 }
 0xe6b   :  { %2501 = vmatpush3.msra.mxu1 %v3179_v29 }
 0xe6c   :  { %2502 = vmatprep.subr.mxu1 %v2613_v3 }
 0xe6d   :  { %2503 = vmatpush3.msra.mxu1 %v3189_v53 }
 0xe6e   :  { %2504 = vmatprep.subr.mxu1 %v2613_v3 }
 0xe6f   :  { %2505 = vmatpush3.msra.mxu1 %v3194_v30 }
 0xe70   :  { %2509 = vmatprep.subr.mxu1 %v2613_v3 }
 0xeb0   :  { %v2071_v44 = vpop.permute.xlu1 %2070 }
 0xeb1   :  { %v2073_v18 = vsel %vm2068_vm11, %v2071_v44, 0.0 }
 0xeb2   :  { %2151 = vrot.lane.b32.xlu1 %v2073_v18, %s2619_s4 }
 0xeb4   :  { %v1624_v11 = vpop.permute.xlu1 %1623 }
 0xeb5   :  { %2507 = vmatmul.mubr.msk.f32.vlgmr.msra.gmra.mxu1 %vm206_vm3, %v1624_v11 }
 0xeb6   :  { %2510 = vmatpush3.msra.mxu1 %v2611_v12  ;;  %2517 = vmatprep.mubr.msk.f32.mxu1 %vm2618_vm1, %v2613_v3 }
 0xeb7   :  { %2511 = vmatprep.subr.mxu1 %v2613_v3 }
 0xeb8   :  { %2512 = vmatpush3.msra.mxu1 %v2609_v46 }
 0xeb9   :  { %2513 = vmatprep.subr.mxu1 %v2613_v3 }
 0xeba   :  { %2514 = vmatpush3.msra.mxu1 %v2610_v52 }
 0xebb   :  { %2515 = vmatprep.subr.mxu1 %v2613_v3 }
 0xebc   :  { %2516 = vmatpush3.msra.mxu1 %v2612_v20 }
 0xebd   :  { %2518 = vmatmul.mubr.msk.f32.vlgmr.msra.gmra.mxu1 %vm206_vm3, %v3278_v27  ;;  %2520 = vmatprep.subr.mxu1 %v2613_v3 }
 0xebe   :  { %2521 = vmatpush3.msra.mxu1 %v3174_v26  ;;  %2528 = vmatprep.mubr.msk.f32.mxu1 %vm2618_vm1, %v2613_v3 }
 0xebf   :  { %2522 = vmatprep.subr.mxu1 %v2613_v3 }
 0xec0   :  { %2523 = vmatpush3.msra.mxu1 %v3179_v29 }
 0xec1   :  { %2524 = vmatprep.subr.mxu1 %v2613_v3 }
 0xec2   :  { %2525 = vmatpush3.msra.mxu1 %v3189_v53 }
 0xec3   :  { %2526 = vmatprep.subr.mxu1 %v2613_v3 }
 0xec4   :  { %2527 = vmatpush3.msra.mxu1 %v3194_v30 }
 0xec5   :  { %2529 = vmatmul.mubr.msk.f32.vlgmr.msra.gmra.mxu1 %vm206_vm3, %v1891_v25  ;;  %2531 = vmatprep.subr.mxu1 %v2613_v3 }
 0xec6   :  { %2532 = vmatpush3.msra.mxu1 %v2611_v12  ;;  %2539 = vmatprep.mubr.msk.f32.mxu1 %vm2618_vm1, %v2613_v3 }
 0xec7   :  { %2533 = vmatprep.subr.mxu1 %v2613_v3 }
 0xec8   :  { %2534 = vmatpush3.msra.mxu1 %v2609_v46 }
 0xec9   :  { %2535 = vmatprep.subr.mxu1 %v2613_v3 }
 0xeca   :  { %2536 = vmatpush3.msra.mxu1 %v2610_v52 }
 0xecb   :  { %2537 = vmatprep.subr.mxu1 %v2613_v3 }
 0xecc   :  { %2538 = vmatpush3.msra.mxu1 %v2612_v20 }
 0xecd   :  { %2540 = vmatmul.mubr.msk.f32.vlgmr.msra.gmra.mxu1 %vm206_vm3, %v2073_v18  ;;  %2542 = vmatprep.subr.mxu1 %v2613_v3 }
 0xece   :  { %2543 = vmatpush3.msra.mxu1 %v3174_v26  ;;  %2550 = vmatprep.mubr.msk.f32.mxu1 %vm2618_vm1, %v2613_v3 }
 0xecf   :  { %2544 = vmatprep.subr.mxu1 %v2613_v3 }
 0xed0   :  { %2545 = vmatpush3.msra.mxu1 %v3179_v29  ;;  %v2260_v29 = vld [vmem:[%s3483_s7 + $0x20] sm:$0xff] }
 0xed1   :  { %2546 = vmatprep.subr.mxu1 %v2613_v3 }
 0xed2   :  { %2547 = vmatpush3.msra.mxu1 %v3189_v53 }
 0xed3   :  { %2548 = vmatprep.subr.mxu1 %v2613_v3 }
 0xed4   :  { %2549 = vmatpush3.msra.mxu1 %v3194_v30  ;;  %v2257_v30 = vld [vmem:[%s3483_s7 + $0x18] sm:$0xff] }
 0xef0   :  { %v621_v13 = vpop.f32.mrf.mxu1 }
 0xef1   :  { %v625_v48 = vadd.f32 %v2870_v24, %v621_v13 }
 0xef2   :  { %v2420_v14 = vpop.f32.mrf.mxu1 }
 0xef8   :  { %v812_v15 = vpop.f32.mrf.mxu1 }
 0xef9   :  { %v816_v41 = vadd.f32 %v2248_v17, %v812_v15 }
 0xefa   :  { %v2431_v16 = vpop.f32.mrf.mxu1 }
 0xf00   :  { %v890_v54 = vpop.f32.mrf.mxu1 }
 0xf01   :  { %v894_v59 = vadd.f32 %v2251_v39, %v890_v54 }
 0xf02   :  { %v2442_v63 = vpop.f32.mrf.mxu1 }
 0xf08   :  { %v1081_v58 = vpop.f32.mrf.mxu1 }
 0xf09   :  { %v1085_v33 = vadd.f32 %v2257_v30, %v1081_v58 }
 0xf0a   :  { %v2453_v21 = vpop.f32.mrf.mxu1 }
 0xf10   :  { %v1159_v26 = vpop.f32.mrf.mxu1 }
 0xf11   :  { %v1163_v51 = vadd.f32 %v2260_v29, %v1159_v26 }
 0xf12   :  { %v2464_v32 = vpop.f32.mrf.mxu1 }
 0xf18   :  { %v1349_v53 = vpop.f32.mrf.mxu1 }
 0xf19   :  { %v1353_v0 = vadd.f32 %v1349_v53, %v1163_v51 }
 0xf1a   :  { %v2475_v3 = vpop.f32.mrf.mxu1 }
 0xf1b   :  { %2268 = vst [vmem:[%s3483_s7 + $0x20] sm:$0xff] %v1353_v0 }
 0xf20   :  { %v1426_v34 = vpop.f32.mrf.mxu1 }
 0xf21   :  { %v1430_v35 = vadd.f32 %v1426_v34, %v1085_v33 }
 0xf22   :  { %v2486_v38 = vpop.f32.mrf.mxu1 }
 0xf23   :  { %2271 = vst [vmem:[%s3483_s7 + $0x18] sm:$0xff] %v1430_v35 }
 0xf24   :  { %v2152_v40 = vpop.permute.xlu1 %2151 }
 0xf25   :  { %2551 = vmatmul.mubr.msk.f32.vlgmr.msra.gmra.mxu1 %vm206_vm3, %v2152_v40 }
 0xf28   :  { %v1616_v28 = vpop.f32.mrf.mxu1 }
 0xf29   :  { %v1620_v22 = vadd.f32 %v1616_v28, %v894_v59 }
 0xf2a   :  { %v2497_v31 = vpop.f32.mrf.mxu1 }
 0xf2b   :  { %2277 = vst [vmem:[%s3483_s7 + $0x28] sm:$0xff] %v1620_v22 }
 0xf75   :  { %v1693_v42 = vpop.f32.mrf.mxu1 }
 0xf76   :  { %v1697_v43 = vadd.f32 %v1693_v42, %v816_v41 }
 0xf77   :  { %v2508_v47 = vpop.f32.mrf.mxu1 }
 0xf78   :  { %2280 = vst [vmem:[%s3483_s7 + $0x10] sm:$0xff] %v1697_v43 }
 0xf7d   :  { %v1883_v49 = vpop.f32.mrf.mxu1 }
 0xf7e   :  { %v1887_v50 = vadd.f32 %v1883_v49, %v625_v48 }
 0xf7f   :  { %v2519_v56 = vpop.f32.mrf.mxu1 }
 0xf80   :  { %2286 = vst [vmem:[%s3483_s7 + $0x30] sm:$0xff] %v1887_v50 }
 0xf85   :  { %v1960_v2 = vpop.f32.mrf.mxu1 }
 0xf86   :  { %v1964_v4 = vadd.f32 %v1960_v2, %v547_v1 }
 0xf87   :  { %v2530_v5 = vpop.f32.mrf.mxu1 }
 0xf88   :  { %2289 = vst [vmem:[%s3483_s7 + $0x8] sm:$0xff] %v1964_v4 }
 0xf8d   :  { %v2144_v27 = vpop.f32.mrf.mxu1 }
 0xf8e   :  { %v2148_v37 = vadd.f32 %v2144_v27, %v358_v23 }
 0xf8f   :  { %v2541_v57 = vpop.f32.mrf.mxu1 }
 0xf90   :  { %2295 = vst [vmem:[%s3483_s7 + $0x38] sm:$0xff] %v2148_v37 }
 0xfe5   :  { %v2221_v61 = vpop.f32.mrf.mxu1 }
 0xfe6   :  { %v2225_v55 = vadd.f32 %v2221_v61, %v2150_v60 }
 0xfe7   :  { %v2552_v6 = vpop.f32.mrf.mxu1 }
 0xfe8   :  { %2226 = vst [vmem:[%s3483_s7] sm:$0xff] %v2225_v55 }

</bundles_post_ra>
